<compile_context>
chip_gen: v5e
topology: v5e:2x2
jax: 0.10.0
libtpu: 0.0.40
codegen_flags: <defaults>
</compile_context>

<pallas_src>
import functools

import jax
import jax.numpy as jnp
from jax.experimental import pallas as pl
from jax.experimental.pallas import tpu as pltpu


LANES = 128          # one vreg-wide gate slab per cell group (assumes 3*H <= 128)


def _gru_wave_kernel(
    # inputs
    tok_ref, cat_ref,          # ((S+2)*Bp, 1) int32 token / category ids (time-major)
    h0_ref,                    # (Bp, 128)  [h1_0 | h2_0 | h3_0 | 0]
    wemb_ref,                  # (O+2, 512) one-hot table: (embeddings @ wih1) in wide layout
    base_ref,                  # (1, 512)   all GRU biases in wide layout
    wwave_ref,                 # (128, 512) combined 3-cell recurrent weight
    fc_ref, fcb_ref,           # (128, 128), (1, 128) final Linear (lane-dense padded)
    # outputs
    out_ref,                   # (S*Bp, 128)
    h1f_ref, h2f_ref, h3f_ref, # (Bp, 128) snapshots of hcat at waves S-1, S, S+1
    # scratch
    add_ref,                   # ((S+2)*Bp, 512) per-wave additive (gi1 + biases)
    *, seq_len, batch_pad, hidden, vocab,
):
    S, Bp, H, O = seq_len, batch_pad, hidden, vocab
    n_waves = S + 2
    N = n_waves * Bp
    E = wemb_ref.shape[0]      # O + 2

    # ---- prologue: in-kernel embedding gather fused with cell-1 input proj --
    # one-hot over [word vocab | 2 categories]; one MXU matmul builds every
    # wave's additive term (input projection of cell 1 + all biases).
    col = jax.lax.broadcasted_iota(jnp.int32, (N, E), 1)
    hit = (col == tok_ref[...]) | (col == cat_ref[...] + O)
    onehot = jnp.where(hit, 1.0, 0.0)
    add_ref[...] = (
        jnp.dot(onehot, wemb_ref[...], preferred_element_type=jnp.float32)
        + base_ref[...]
    )

    wwave = wwave_ref[...]                     # (128, 512)
    hcat = h0_ref[...]                         # (Bp, 128) = [h1 | h2 | h3 | pad]

    # Startup freeze masks (cells 2 & 3 are not active yet at waves 0/1):
    lane = jax.lax.broadcasted_iota(jnp.int32, (Bp, LANES), 1)
    freeze23 = (lane >= H) & (lane < 3 * H)    # freeze h2 and h3 blocks
    freeze3 = (lane >= 2 * H) & (lane < 3 * H)  # freeze h3 block

    h3_snaps = []
    for k in range(n_waves):
        # One matmul per wave: all three cells' gates at once.
        g = (
            jnp.dot(hcat, wwave, preferred_element_type=jnp.float32)
            + add_ref[k * Bp:(k + 1) * Bp, :]
        )
        r = jax.nn.sigmoid(g[:, 0:LANES])                  # [r1|r2|r3|pad]
        z = jax.nn.sigmoid(g[:, LANES:2 * LANES])          # [z1|z2|z3|pad]
        if k == 0:
            z = jnp.where(freeze23, 1.0, z)                # cells 2,3 inactive
        elif k == 1:
            z = jnp.where(freeze3, 1.0, z)                 # cell 3 inactive
        n = jnp.tanh(g[:, 3 * LANES:4 * LANES] + r * g[:, 2 * LANES:3 * LANES])
        hcat = (1.0 - z) * n + z * hcat                    # exact freeze when z==1

        if k >= 2:                     # h3(k-2) now lives in lanes 2H:3H
            h3_snaps.append(hcat)
        if k == S - 1:                 # final h1 (later waves clobber its block)
            h1f_ref[...] = hcat
        if k == S:                     # final h2
            h2f_ref[...] = hcat
        if k == S + 1:                 # final h3
            h3f_ref[...] = hcat

    # ---- epilogue: deferred final Linear — one matmul, lane-dense store -----
    # fc weight is zero outside rows [2H,3H), so the full hcat snapshots can be
    # used directly (no lane extraction of the h3 block is ever needed).
    hall = jnp.concatenate(h3_snaps, axis=0)               # (S*Bp, 128)
    out_ref[...] = (
        jnp.dot(hall, fc_ref[...], preferred_element_type=jnp.float32)
        + fcb_ref[...]
    )


def _place_gates(dst, rows, mat3h, cell, n_block_base, H):
    """Scatter a (rows, 3H) [r|z|n] matrix into the wide 4x128 column layout."""
    c = cell * H
    dst = dst.at[rows, 0 + c:0 + c + H].set(mat3h[:, 0:H])                  # r slab
    dst = dst.at[rows, LANES + c:LANES + c + H].set(mat3h[:, H:2 * H])      # z slab
    dst = dst.at[rows, n_block_base + c:n_block_base + c + H].set(mat3h[:, 2 * H:3 * H])
    return dst


def gru_with_cells_category_forward(params, input_token, hidden_state, category):
    """Forward pass matching GRU_with_cells_category.forward.

    input_token: (B, S) int32 indices into the word embedding [0, output_size)
    hidden_state: tuple of three (B, H) float32 arrays
    category:    (B, S) int32 indices into the category embedding {0, 1}
    returns (final_output (B, S, O), (h1, h2, h3))
    """
    h1_0, h2_0, h3_0 = hidden_state
    B, S = input_token.shape
    H = params["word_embedding"].shape[1]
    O = params["fc_w"].shape[1]
    assert 3 * H <= LANES, "wavefront layout assumes the 3 hidden states fit one vreg"
    Bp = ((B + 7) // 8) * 8
    W = 4 * LANES                       # wide gate layout: [r | z | hn | in]
    n_waves = S + 2
    N = n_waves * Bp
    E = O + 2                           # one-hot width: vocab + 2 categories
    OP = ((O + LANES - 1) // LANES) * LANES

    f32 = jnp.float32

    # --- index arrays: time-major, batch-padded, +2 padding waves -------------
    def to_wave_rows(idx):
        t = jnp.transpose(idx.astype(jnp.int32))             # (S, B)
        t = jnp.pad(t, ((0, 2), (0, Bp - B)))                 # (S+2, Bp)
        return t.reshape(N, 1)

    tok_ids = to_wave_rows(input_token)
    cat_ids = to_wave_rows(category)

    # --- initial fused state tile [h1 | h2 | h3 | pad] -------------------------
    h0 = jnp.zeros((Bp, LANES), f32)
    h0 = h0.at[:B, 0:H].set(h1_0.astype(f32))
    h0 = h0.at[:B, H:2 * H].set(h2_0.astype(f32))
    h0 = h0.at[:B, 2 * H:3 * H].set(h3_0.astype(f32))

    # --- parameter prep (tiny, parameter-only) --------------------------------
    wih1 = params["wih1"].astype(f32)                         # (2H, 3H)
    gi_word = params["word_embedding"].astype(f32) @ wih1[:H]  # (O, 3H)
    gi_cat = params["cat_embedding"].astype(f32) @ wih1[H:]    # (2, 3H)
    gi_rows = jnp.concatenate([gi_word, gi_cat], axis=0)       # (O+2, 3H)
    wemb_wide = _place_gates(jnp.zeros((E, W), f32), slice(0, E), gi_rows, 0, 3 * LANES, H)

    # combined 3-cell recurrent weight (rows = [h1 | h2 | h3 | pad])
    ww = jnp.zeros((LANES, W), f32)
    ww = _place_gates(ww, slice(0, H), params["whh1"].astype(f32), 0, 2 * LANES, H)       # cell1 hidden
    ww = _place_gates(ww, slice(0, H), params["wih2"].astype(f32), 1, 3 * LANES, H)       # cell2 input (h1)
    ww = _place_gates(ww, slice(H, 2 * H), params["whh2"].astype(f32), 1, 2 * LANES, H)   # cell2 hidden
    ww = _place_gates(ww, slice(H, 2 * H), params["wih3"].astype(f32), 2, 3 * LANES, H)   # cell3 input (h2)
    ww = _place_gates(ww, slice(2 * H, 3 * H), params["whh3"].astype(f32), 2, 2 * LANES, H)  # cell3 hidden

    # all biases in the wide layout
    br = jnp.zeros((1, W), f32)
    bihs = (params["bih1"], params["bih2"], params["bih3"])
    bhhs = (params["bhh1"], params["bhh2"], params["bhh3"])
    for c in range(3):
        bih = bihs[c].astype(f32)
        bhh = bhhs[c].astype(f32)
        cH = c * H
        br = br.at[:, cH:cH + H].set(bih[:, 0:H] + bhh[:, 0:H])                           # r
        br = br.at[:, LANES + cH:LANES + cH + H].set(bih[:, H:2 * H] + bhh[:, H:2 * H])   # z
        br = br.at[:, 2 * LANES + cH:2 * LANES + cH + H].set(bhh[:, 2 * H:3 * H])         # hn
        br = br.at[:, 3 * LANES + cH:3 * LANES + cH + H].set(bih[:, 2 * H:3 * H])         # in

    # lane-dense final Linear: zero everywhere except the h3 rows / first O cols
    fcw = jnp.zeros((LANES, OP), f32).at[2 * H:3 * H, 0:O].set(params["fc_w"].astype(f32))
    fcb = jnp.zeros((1, OP), f32).at[:, 0:O].set(params["fc_b"].astype(f32))

    in_arrays = (tok_ids, cat_ids, h0, wemb_wide, br, ww, fcw, fcb)
    out_shapes = (
        jax.ShapeDtypeStruct((S * Bp, OP), f32),
        jax.ShapeDtypeStruct((Bp, LANES), f32),
        jax.ShapeDtypeStruct((Bp, LANES), f32),
        jax.ShapeDtypeStruct((Bp, LANES), f32),
    )

    kernel = functools.partial(_gru_wave_kernel, seq_len=S, batch_pad=Bp,
                               hidden=H, vocab=O)

    # Single grid step: everything VMEM-resident (a few hundred KiB at S=8).
    # TODO(synk): for S in the thousands, tile the wave axis on an 'arbitrary'
    # grid dimension (carry hcat in scratch) to stay under v7x's 64 MiB VMEM.
    out2d, h1f, h2f, h3f = pl.pallas_call(
        kernel,
        out_shape=out_shapes,
        grid_spec=pltpu.PrefetchScalarGridSpec(
            num_scalar_prefetch=0,
            grid=(1,),
            in_specs=[pl.BlockSpec(a.shape, lambda i: (0, 0)) for a in in_arrays],
            out_specs=tuple(pl.BlockSpec(s.shape, lambda i: (0, 0)) for s in out_shapes),
            scratch_shapes=[pltpu.VMEM((N, W), f32)],
        ),
        compiler_params=pltpu.CompilerParams(
            dimension_semantics=("arbitrary",),
            vmem_limit_bytes=32 * 1024 * 1024,
        ),
    )(*in_arrays)

    final_output = jnp.transpose(out2d.reshape(S, Bp, OP)[:, :B, :O], (1, 0, 2))
    h1 = h1f[:B, 0:H]
    h2 = h2f[:B, H:2 * H]
    h3 = h3f[:B, 2 * H:3 * H]
    return final_output, (h1, h2, h3)


# ------------------------- pure-JAX reference ------------------------------
def _reference_forward(params, input_token, hidden_state, category):
    h1, h2, h3 = hidden_state
    B, S = input_token.shape
    H = params["word_embedding"].shape[1]
    ew = params["word_embedding"][input_token]
    ec = params["cat_embedding"][category]
    combined = jnp.concatenate([ew, ec], axis=2)

    def cell(x, h, wih, whh, bih, bhh):
        gi = x @ wih + bih
        gh = h @ whh + bhh
        r = jax.nn.sigmoid(gi[:, :H] + gh[:, :H])
        z = jax.nn.sigmoid(gi[:, H:2 * H] + gh[:, H:2 * H])
        n = jnp.tanh(gi[:, 2 * H:] + r * gh[:, 2 * H:])
        return (1 - z) * n + z * h

    outs = []
    for i in range(S):
        xi = combined[:, i, :]
        h1 = cell(xi, h1, params["wih1"], params["whh1"], params["bih1"], params["bhh1"])
        h2 = cell(h1, h2, params["wih2"], params["whh2"], params["bih2"], params["bhh2"])
        h3 = cell(h2, h3, params["wih3"], params["whh3"], params["bih3"], params["bhh3"])
        outs.append(h3 @ params["fc_w"] + params["fc_b"])
    return jnp.stack(outs, axis=1), (h1, h2, h3)


# ------------------------------- main ---------------------------------------
if __name__ == "__main__":
    B, S = 4, 8           # batch, sequence length
    H = 32                # hidden_size
    O = 48                # output_size (vocab)

    key = jax.random.PRNGKey(0)
    keys = jax.random.split(key, 24)
    bound = 1.0 / jnp.sqrt(H)

    def u(k, shape):
        return jax.random.uniform(k, shape, jnp.float32, -bound, bound)

    # PyTorch-style init; weights stored pre-transposed so kernels do x @ W.
    params = {
        "word_embedding": jax.random.normal(keys[0], (O, H), jnp.float32),
        "cat_embedding": jax.random.normal(keys[1], (2, H), jnp.float32),
        # GRU cell 1: input 2H -> hidden H
        "wih1": u(keys[2], (2 * H, 3 * H)),
        "whh1": u(keys[3], (H, 3 * H)),
        "bih1": u(keys[4], (1, 3 * H)),
        "bhh1": u(keys[5], (1, 3 * H)),
        # GRU cell 2: H -> H
        "wih2": u(keys[6], (H, 3 * H)),
        "whh2": u(keys[7], (H, 3 * H)),
        "bih2": u(keys[8], (1, 3 * H)),
        "bhh2": u(keys[9], (1, 3 * H)),
        # GRU cell 3: H -> H
        "wih3": u(keys[10], (H, 3 * H)),
        "whh3": u(keys[11], (H, 3 * H)),
        "bih3": u(keys[12], (1, 3 * H)),
        "bhh3": u(keys[13], (1, 3 * H)),
        # fc: H -> O
        "fc_w": u(keys[14], (H, O)),
        "fc_b": u(keys[15], (1, O)),
    }

    input_token = jax.random.randint(keys[16], (B, S), 0, O, jnp.int32)
    category = jax.random.randint(keys[17], (B, S), 0, 2, jnp.int32)

    # init_hidden(batch_size): zeros
    h0 = (jnp.zeros((B, H), jnp.float32),
          jnp.zeros((B, H), jnp.float32),
          jnp.zeros((B, H), jnp.float32))

    fwd = jax.jit(gru_with_cells_category_forward)
    out, (h1, h2, h3) = fwd(params, input_token, h0, category)
    jax.block_until_ready((out, h1, h2, h3))

    # correctness check against pure-JAX reference
    ref_out, (r1, r2, r3) = _reference_forward(params, input_token, h0, category)
    assert out.shape == (B, S, O)
    assert jnp.allclose(out, ref_out, atol=1e-4, rtol=1e-4)
    assert jnp.allclose(h1, r1, atol=1e-4, rtol=1e-4)
    assert jnp.allclose(h2, r2, atol=1e-4, rtol=1e-4)
    assert jnp.allclose(h3, r3, atol=1e-4, rtol=1e-4)

    print("KERNEL_OK")
</pallas_src>

<mosaic_0001>
module attributes {stable_mosaic.version = 11 : i64} {
  func.func @_gru_wave_kernel(%arg0: i32, %arg1: memref<80x1xi32, #tpu.memory_space<vmem>>, %arg2: memref<80x1xi32, #tpu.memory_space<vmem>>, %arg3: memref<8x128xf32, #tpu.memory_space<vmem>>, %arg4: memref<50x512xf32, #tpu.memory_space<vmem>>, %arg5: memref<1x512xf32, #tpu.memory_space<vmem>>, %arg6: memref<128x512xf32, #tpu.memory_space<vmem>>, %arg7: memref<128x128xf32, #tpu.memory_space<vmem>>, %arg8: memref<1x128xf32, #tpu.memory_space<vmem>>, %arg9: memref<64x128xf32, #tpu.memory_space<vmem>>, %arg10: memref<8x128xf32, #tpu.memory_space<vmem>>, %arg11: memref<8x128xf32, #tpu.memory_space<vmem>>, %arg12: memref<8x128xf32, #tpu.memory_space<vmem>>, %arg13: memref<80x512xf32, #tpu.memory_space<vmem>>) attributes {dimension_semantics = [#tpu.dimension_semantics<arbitrary>], iteration_bounds = array<i64: 1>, scalar_prefetch = 0 : i64, scratch_operands = 1 : i64, tpu.core_type = #tpu.core_type<tc>, window_params = [{pipeline_mode = #tpu.pipeline_mode<synchronous>, transform_indices = @transform_0, window_bounds = array<i64: 80, 1>}, {pipeline_mode = #tpu.pipeline_mode<synchronous>, transform_indices = @transform_1, window_bounds = array<i64: 80, 1>}, {pipeline_mode = #tpu.pipeline_mode<synchronous>, transform_indices = @transform_2, window_bounds = array<i64: 8, 128>}, {pipeline_mode = #tpu.pipeline_mode<synchronous>, transform_indices = @transform_3, window_bounds = array<i64: 50, 512>}, {pipeline_mode = #tpu.pipeline_mode<synchronous>, transform_indices = @transform_4, window_bounds = array<i64: 1, 512>}, {pipeline_mode = #tpu.pipeline_mode<synchronous>, transform_indices = @transform_5, window_bounds = array<i64: 128, 512>}, {pipeline_mode = #tpu.pipeline_mode<synchronous>, transform_indices = @transform_6, window_bounds = array<i64: 128, 128>}, {pipeline_mode = #tpu.pipeline_mode<synchronous>, transform_indices = @transform_7, window_bounds = array<i64: 1, 128>}, {pipeline_mode = #tpu.pipeline_mode<synchronous>, transform_indices = @transform_8, window_bounds = array<i64: 64, 128>}, {pipeline_mode = #tpu.pipeline_mode<synchronous>, transform_indices = @transform_9, window_bounds = array<i64: 8, 128>}, {pipeline_mode = #tpu.pipeline_mode<synchronous>, transform_indices = @transform_10, window_bounds = array<i64: 8, 128>}, {pipeline_mode = #tpu.pipeline_mode<synchronous>, transform_indices = @transform_11, window_bounds = array<i64: 8, 128>}]} {
    %0 = tpu.iota {dimensions = array<i32: 1>} : vector<80x50xi32>
    %c0 = arith.constant 0 : index
    %c0_0 = arith.constant 0 : index
    %1 = vector.load %arg1[%c0, %c0_0] : memref<80x1xi32, #tpu.memory_space<vmem>>, vector<80x1xi32>
    %2 = vector.broadcast %1 : vector<80x1xi32> to vector<80x50xi32>
    %3 = arith.cmpi eq, %0, %2 : vector<80x50xi32>
    %c0_1 = arith.constant 0 : index
    %c0_2 = arith.constant 0 : index
    %4 = vector.load %arg2[%c0_1, %c0_2] : memref<80x1xi32, #tpu.memory_space<vmem>>, vector<80x1xi32>
    %c48_i32 = arith.constant 48 : i32
    %5 = vector.broadcast %c48_i32 : i32 to vector<80x1xi32>
    %6 = arith.addi %4, %5 : vector<80x1xi32>
    %7 = vector.broadcast %6 : vector<80x1xi32> to vector<80x50xi32>
    %8 = arith.cmpi eq, %0, %7 : vector<80x50xi32>
    %9 = arith.ori %3, %8 : vector<80x50xi1>
    %cst = arith.constant 1.000000e+00 : f32
    %cst_3 = arith.constant 0.000000e+00 : f32
    %10 = vector.broadcast %cst : f32 to vector<80x50xf32>
    %11 = vector.broadcast %cst_3 : f32 to vector<80x50xf32>
    %12 = arith.select %9, %10, %11 : vector<80x50xi1>, vector<80x50xf32>
    %c0_4 = arith.constant 0 : index
    %c0_5 = arith.constant 0 : index
    %13 = vector.load %arg4[%c0_4, %c0_5] : memref<50x512xf32, #tpu.memory_space<vmem>>, vector<50x512xf32>
    %cst_6 = arith.constant dense<0.000000e+00> : vector<80x512xf32>
    %14 = tpu.matmul %12, %13, %cst_6 {dimension_numbers = #tpu.dot_dimension_numbers<[1], [0], [0], [1], [0, 0, 1, 1], [], []>} : vector<80x50xf32>, vector<50x512xf32>, vector<80x512xf32> -> vector<80x512xf32>
    %c0_7 = arith.constant 0 : index
    %c0_8 = arith.constant 0 : index
    %15 = vector.load %arg5[%c0_7, %c0_8] : memref<1x512xf32, #tpu.memory_space<vmem>>, vector<1x512xf32>
    %16 = vector.broadcast %15 : vector<1x512xf32> to vector<80x512xf32>
    %17 = arith.addf %14, %16 : vector<80x512xf32>
    %c0_9 = arith.constant 0 : index
    %c0_10 = arith.constant 0 : index
    %18 = vector.load %arg13[%c0_9, %c0_10] : memref<80x512xf32, #tpu.memory_space<vmem>>, vector<80x512xf32>
    tpu.vector_store %arg13[%c0_9, %c0_10], %17 {strides = array<i32>} : memref<80x512xf32, #tpu.memory_space<vmem>>, vector<80x512xf32>,
    %c0_11 = arith.constant 0 : index
    %c0_12 = arith.constant 0 : index
    %19 = vector.load %arg6[%c0_11, %c0_12] : memref<128x512xf32, #tpu.memory_space<vmem>>, vector<128x512xf32>
    %c0_13 = arith.constant 0 : index
    %c0_14 = arith.constant 0 : index
    %20 = vector.load %arg3[%c0_13, %c0_14] : memref<8x128xf32, #tpu.memory_space<vmem>>, vector<8x128xf32>
    %21 = tpu.iota {dimensions = array<i32: 1>} : vector<8x128xi32>
    %c32_i32 = arith.constant 32 : i32
    %22 = vector.broadcast %c32_i32 : i32 to vector<8x128xi32>
    %23 = arith.cmpi sge, %21, %22 : vector<8x128xi32>
    %c96_i32 = arith.constant 96 : i32
    %24 = vector.broadcast %c96_i32 : i32 to vector<8x128xi32>
    %25 = arith.cmpi slt, %21, %24 : vector<8x128xi32>
    %26 = arith.andi %23, %25 : vector<8x128xi1>
    %c64_i32 = arith.constant 64 : i32
    %27 = vector.broadcast %c64_i32 : i32 to vector<8x128xi32>
    %28 = arith.cmpi sge, %21, %27 : vector<8x128xi32>
    %c96_i32_15 = arith.constant 96 : i32
    %29 = vector.broadcast %c96_i32_15 : i32 to vector<8x128xi32>
    %30 = arith.cmpi slt, %21, %29 : vector<8x128xi32>
    %31 = arith.andi %28, %30 : vector<8x128xi1>
    %cst_16 = arith.constant dense<0.000000e+00> : vector<8x512xf32>
    %32 = tpu.matmul %20, %19, %cst_16 {dimension_numbers = #tpu.dot_dimension_numbers<[1], [0], [0], [1], [0, 0, 1, 1], [], []>} : vector<8x128xf32>, vector<128x512xf32>, vector<8x512xf32> -> vector<8x512xf32>
    %c0_17 = arith.constant 0 : index
    %c0_18 = arith.constant 0 : index
    %33 = vector.load %arg13[%c0_17, %c0_18] : memref<80x512xf32, #tpu.memory_space<vmem>>, vector<8x512xf32>
    %34 = arith.addf %32, %33 : vector<8x512xf32>
    %35 = vector.extract_strided_slice %34 {offsets = [0, 0], sizes = [8, 128], strides = [1, 1]} : vector<8x512xf32> to vector<8x128xf32>
    %36 = arith.negf %35 : vector<8x128xf32>
    %37 = math.exp %36 : vector<8x128xf32>
    %cst_19 = arith.constant 1.000000e+00 : f32
    %38 = vector.broadcast %cst_19 : f32 to vector<8x128xf32>
    %39 = arith.addf %38, %37 : vector<8x128xf32>
    %40 = arith.divf %38, %39 : vector<8x128xf32>
    %41 = vector.extract_strided_slice %34 {offsets = [0, 128], sizes = [8, 128], strides = [1, 1]} : vector<8x512xf32> to vector<8x128xf32>
    %42 = arith.negf %41 : vector<8x128xf32>
    %43 = math.exp %42 : vector<8x128xf32>
    %cst_20 = arith.constant 1.000000e+00 : f32
    %44 = vector.broadcast %cst_20 : f32 to vector<8x128xf32>
    %45 = arith.addf %44, %43 : vector<8x128xf32>
    %46 = arith.divf %44, %45 : vector<8x128xf32>
    %cst_21 = arith.constant 1.000000e+00 : f32
    %47 = vector.broadcast %cst_21 : f32 to vector<8x128xf32>
    %48 = arith.select %26, %47, %46 : vector<8x128xi1>, vector<8x128xf32>
    %49 = vector.extract_strided_slice %34 {offsets = [0, 384], sizes = [8, 128], strides = [1, 1]} : vector<8x512xf32> to vector<8x128xf32>
    %50 = vector.extract_strided_slice %34 {offsets = [0, 256], sizes = [8, 128], strides = [1, 1]} : vector<8x512xf32> to vector<8x128xf32>
    %51 = arith.mulf %40, %50 : vector<8x128xf32>
    %52 = arith.addf %49, %51 : vector<8x128xf32>
    %53 = math.tanh %52 : vector<8x128xf32>
    %cst_22 = arith.constant 1.000000e+00 : f32
    %54 = vector.broadcast %cst_22 : f32 to vector<8x128xf32>
    %55 = arith.subf %54, %48 : vector<8x128xf32>
    %56 = arith.mulf %55, %53 : vector<8x128xf32>
    %57 = arith.mulf %48, %20 : vector<8x128xf32>
    %58 = arith.addf %56, %57 : vector<8x128xf32>
    %cst_23 = arith.constant dense<0.000000e+00> : vector<8x512xf32>
    %59 = tpu.matmul %58, %19, %cst_23 {dimension_numbers = #tpu.dot_dimension_numbers<[1], [0], [0], [1], [0, 0, 1, 1], [], []>} : vector<8x128xf32>, vector<128x512xf32>, vector<8x512xf32> -> vector<8x512xf32>
    %c8 = arith.constant 8 : index
    %c0_24 = arith.constant 0 : index
    %60 = vector.load %arg13[%c8, %c0_24] : memref<80x512xf32, #tpu.memory_space<vmem>>, vector<8x512xf32>
    %61 = arith.addf %59, %60 : vector<8x512xf32>
    %62 = vector.extract_strided_slice %61 {offsets = [0, 0], sizes = [8, 128], strides = [1, 1]} : vector<8x512xf32> to vector<8x128xf32>
    %63 = arith.negf %62 : vector<8x128xf32>
    %64 = math.exp %63 : vector<8x128xf32>
    %cst_25 = arith.constant 1.000000e+00 : f32
    %65 = vector.broadcast %cst_25 : f32 to vector<8x128xf32>
    %66 = arith.addf %65, %64 : vector<8x128xf32>
    %67 = arith.divf %65, %66 : vector<8x128xf32>
    %68 = vector.extract_strided_slice %61 {offsets = [0, 128], sizes = [8, 128], strides = [1, 1]} : vector<8x512xf32> to vector<8x128xf32>
    %69 = arith.negf %68 : vector<8x128xf32>
    %70 = math.exp %69 : vector<8x128xf32>
    %cst_26 = arith.constant 1.000000e+00 : f32
    %71 = vector.broadcast %cst_26 : f32 to vector<8x128xf32>
    %72 = arith.addf %71, %70 : vector<8x128xf32>
    %73 = arith.divf %71, %72 : vector<8x128xf32>
    %cst_27 = arith.constant 1.000000e+00 : f32
    %74 = vector.broadcast %cst_27 : f32 to vector<8x128xf32>
    %75 = arith.select %31, %74, %73 : vector<8x128xi1>, vector<8x128xf32>
    %76 = vector.extract_strided_slice %61 {offsets = [0, 384], sizes = [8, 128], strides = [1, 1]} : vector<8x512xf32> to vector<8x128xf32>
    %77 = vector.extract_strided_slice %61 {offsets = [0, 256], sizes = [8, 128], strides = [1, 1]} : vector<8x512xf32> to vector<8x128xf32>
    %78 = arith.mulf %67, %77 : vector<8x128xf32>
    %79 = arith.addf %76, %78 : vector<8x128xf32>
    %80 = math.tanh %79 : vector<8x128xf32>
    %cst_28 = arith.constant 1.000000e+00 : f32
    %81 = vector.broadcast %cst_28 : f32 to vector<8x128xf32>
    %82 = arith.subf %81, %75 : vector<8x128xf32>
    %83 = arith.mulf %82, %80 : vector<8x128xf32>
    %84 = arith.mulf %75, %58 : vector<8x128xf32>
    %85 = arith.addf %83, %84 : vector<8x128xf32>
    %cst_29 = arith.constant dense<0.000000e+00> : vector<8x512xf32>
    %86 = tpu.matmul %85, %19, %cst_29 {dimension_numbers = #tpu.dot_dimension_numbers<[1], [0], [0], [1], [0, 0, 1, 1], [], []>} : vector<8x128xf32>, vector<128x512xf32>, vector<8x512xf32> -> vector<8x512xf32>
    %c16 = arith.constant 16 : index
    %c0_30 = arith.constant 0 : index
    %87 = vector.load %arg13[%c16, %c0_30] : memref<80x512xf32, #tpu.memory_space<vmem>>, vector<8x512xf32>
    %88 = arith.addf %86, %87 : vector<8x512xf32>
    %89 = vector.extract_strided_slice %88 {offsets = [0, 0], sizes = [8, 128], strides = [1, 1]} : vector<8x512xf32> to vector<8x128xf32>
    %90 = arith.negf %89 : vector<8x128xf32>
    %91 = math.exp %90 : vector<8x128xf32>
    %cst_31 = arith.constant 1.000000e+00 : f32
    %92 = vector.broadcast %cst_31 : f32 to vector<8x128xf32>
    %93 = arith.addf %92, %91 : vector<8x128xf32>
    %94 = arith.divf %92, %93 : vector<8x128xf32>
    %95 = vector.extract_strided_slice %88 {offsets = [0, 128], sizes = [8, 128], strides = [1, 1]} : vector<8x512xf32> to vector<8x128xf32>
    %96 = arith.negf %95 : vector<8x128xf32>
    %97 = math.exp %96 : vector<8x128xf32>
    %cst_32 = arith.constant 1.000000e+00 : f32
    %98 = vector.broadcast %cst_32 : f32 to vector<8x128xf32>
    %99 = arith.addf %98, %97 : vector<8x128xf32>
    %100 = arith.divf %98, %99 : vector<8x128xf32>
    %101 = vector.extract_strided_slice %88 {offsets = [0, 384], sizes = [8, 128], strides = [1, 1]} : vector<8x512xf32> to vector<8x128xf32>
    %102 = vector.extract_strided_slice %88 {offsets = [0, 256], sizes = [8, 128], strides = [1, 1]} : vector<8x512xf32> to vector<8x128xf32>
    %103 = arith.mulf %94, %102 : vector<8x128xf32>
    %104 = arith.addf %101, %103 : vector<8x128xf32>
    %105 = math.tanh %104 : vector<8x128xf32>
    %cst_33 = arith.constant 1.000000e+00 : f32
    %106 = vector.broadcast %cst_33 : f32 to vector<8x128xf32>
    %107 = arith.subf %106, %100 : vector<8x128xf32>
    %108 = arith.mulf %107, %105 : vector<8x128xf32>
    %109 = arith.mulf %100, %85 : vector<8x128xf32>
    %110 = arith.addf %108, %109 : vector<8x128xf32>
    %cst_34 = arith.constant dense<0.000000e+00> : vector<8x512xf32>
    %111 = tpu.matmul %110, %19, %cst_34 {dimension_numbers = #tpu.dot_dimension_numbers<[1], [0], [0], [1], [0, 0, 1, 1], [], []>} : vector<8x128xf32>, vector<128x512xf32>, vector<8x512xf32> -> vector<8x512xf32>
    %c24 = arith.constant 24 : index
    %c0_35 = arith.constant 0 : index
    %112 = vector.load %arg13[%c24, %c0_35] : memref<80x512xf32, #tpu.memory_space<vmem>>, vector<8x512xf32>
    %113 = arith.addf %111, %112 : vector<8x512xf32>
    %114 = vector.extract_strided_slice %113 {offsets = [0, 0], sizes = [8, 128], strides = [1, 1]} : vector<8x512xf32> to vector<8x128xf32>
    %115 = arith.negf %114 : vector<8x128xf32>
    %116 = math.exp %115 : vector<8x128xf32>
    %cst_36 = arith.constant 1.000000e+00 : f32
    %117 = vector.broadcast %cst_36 : f32 to vector<8x128xf32>
    %118 = arith.addf %117, %116 : vector<8x128xf32>
    %119 = arith.divf %117, %118 : vector<8x128xf32>
    %120 = vector.extract_strided_slice %113 {offsets = [0, 128], sizes = [8, 128], strides = [1, 1]} : vector<8x512xf32> to vector<8x128xf32>
    %121 = arith.negf %120 : vector<8x128xf32>
    %122 = math.exp %121 : vector<8x128xf32>
    %cst_37 = arith.constant 1.000000e+00 : f32
    %123 = vector.broadcast %cst_37 : f32 to vector<8x128xf32>
    %124 = arith.addf %123, %122 : vector<8x128xf32>
    %125 = arith.divf %123, %124 : vector<8x128xf32>
    %126 = vector.extract_strided_slice %113 {offsets = [0, 384], sizes = [8, 128], strides = [1, 1]} : vector<8x512xf32> to vector<8x128xf32>
    %127 = vector.extract_strided_slice %113 {offsets = [0, 256], sizes = [8, 128], strides = [1, 1]} : vector<8x512xf32> to vector<8x128xf32>
    %128 = arith.mulf %119, %127 : vector<8x128xf32>
    %129 = arith.addf %126, %128 : vector<8x128xf32>
    %130 = math.tanh %129 : vector<8x128xf32>
    %cst_38 = arith.constant 1.000000e+00 : f32
    %131 = vector.broadcast %cst_38 : f32 to vector<8x128xf32>
    %132 = arith.subf %131, %125 : vector<8x128xf32>
    %133 = arith.mulf %132, %130 : vector<8x128xf32>
    %134 = arith.mulf %125, %110 : vector<8x128xf32>
    %135 = arith.addf %133, %134 : vector<8x128xf32>
    %cst_39 = arith.constant dense<0.000000e+00> : vector<8x512xf32>
    %136 = tpu.matmul %135, %19, %cst_39 {dimension_numbers = #tpu.dot_dimension_numbers<[1], [0], [0], [1], [0, 0, 1, 1], [], []>} : vector<8x128xf32>, vector<128x512xf32>, vector<8x512xf32> -> vector<8x512xf32>
    %c32 = arith.constant 32 : index
    %c0_40 = arith.constant 0 : index
    %137 = vector.load %arg13[%c32, %c0_40] : memref<80x512xf32, #tpu.memory_space<vmem>>, vector<8x512xf32>
    %138 = arith.addf %136, %137 : vector<8x512xf32>
    %139 = vector.extract_strided_slice %138 {offsets = [0, 0], sizes = [8, 128], strides = [1, 1]} : vector<8x512xf32> to vector<8x128xf32>
    %140 = arith.negf %139 : vector<8x128xf32>
    %141 = math.exp %140 : vector<8x128xf32>
    %cst_41 = arith.constant 1.000000e+00 : f32
    %142 = vector.broadcast %cst_41 : f32 to vector<8x128xf32>
    %143 = arith.addf %142, %141 : vector<8x128xf32>
    %144 = arith.divf %142, %143 : vector<8x128xf32>
    %145 = vector.extract_strided_slice %138 {offsets = [0, 128], sizes = [8, 128], strides = [1, 1]} : vector<8x512xf32> to vector<8x128xf32>
    %146 = arith.negf %145 : vector<8x128xf32>
    %147 = math.exp %146 : vector<8x128xf32>
    %cst_42 = arith.constant 1.000000e+00 : f32
    %148 = vector.broadcast %cst_42 : f32 to vector<8x128xf32>
    %149 = arith.addf %148, %147 : vector<8x128xf32>
    %150 = arith.divf %148, %149 : vector<8x128xf32>
    %151 = vector.extract_strided_slice %138 {offsets = [0, 384], sizes = [8, 128], strides = [1, 1]} : vector<8x512xf32> to vector<8x128xf32>
    %152 = vector.extract_strided_slice %138 {offsets = [0, 256], sizes = [8, 128], strides = [1, 1]} : vector<8x512xf32> to vector<8x128xf32>
    %153 = arith.mulf %144, %152 : vector<8x128xf32>
    %154 = arith.addf %151, %153 : vector<8x128xf32>
    %155 = math.tanh %154 : vector<8x128xf32>
    %cst_43 = arith.constant 1.000000e+00 : f32
    %156 = vector.broadcast %cst_43 : f32 to vector<8x128xf32>
    %157 = arith.subf %156, %150 : vector<8x128xf32>
    %158 = arith.mulf %157, %155 : vector<8x128xf32>
    %159 = arith.mulf %150, %135 : vector<8x128xf32>
    %160 = arith.addf %158, %159 : vector<8x128xf32>
    %cst_44 = arith.constant dense<0.000000e+00> : vector<8x512xf32>
    %161 = tpu.matmul %160, %19, %cst_44 {dimension_numbers = #tpu.dot_dimension_numbers<[1], [0], [0], [1], [0, 0, 1, 1], [], []>} : vector<8x128xf32>, vector<128x512xf32>, vector<8x512xf32> -> vector<8x512xf32>
    %c40 = arith.constant 40 : index
    %c0_45 = arith.constant 0 : index
    %162 = vector.load %arg13[%c40, %c0_45] : memref<80x512xf32, #tpu.memory_space<vmem>>, vector<8x512xf32>
    %163 = arith.addf %161, %162 : vector<8x512xf32>
    %164 = vector.extract_strided_slice %163 {offsets = [0, 0], sizes = [8, 128], strides = [1, 1]} : vector<8x512xf32> to vector<8x128xf32>
    %165 = arith.negf %164 : vector<8x128xf32>
    %166 = math.exp %165 : vector<8x128xf32>
    %cst_46 = arith.constant 1.000000e+00 : f32
    %167 = vector.broadcast %cst_46 : f32 to vector<8x128xf32>
    %168 = arith.addf %167, %166 : vector<8x128xf32>
    %169 = arith.divf %167, %168 : vector<8x128xf32>
    %170 = vector.extract_strided_slice %163 {offsets = [0, 128], sizes = [8, 128], strides = [1, 1]} : vector<8x512xf32> to vector<8x128xf32>
    %171 = arith.negf %170 : vector<8x128xf32>
    %172 = math.exp %171 : vector<8x128xf32>
    %cst_47 = arith.constant 1.000000e+00 : f32
    %173 = vector.broadcast %cst_47 : f32 to vector<8x128xf32>
    %174 = arith.addf %173, %172 : vector<8x128xf32>
    %175 = arith.divf %173, %174 : vector<8x128xf32>
    %176 = vector.extract_strided_slice %163 {offsets = [0, 384], sizes = [8, 128], strides = [1, 1]} : vector<8x512xf32> to vector<8x128xf32>
    %177 = vector.extract_strided_slice %163 {offsets = [0, 256], sizes = [8, 128], strides = [1, 1]} : vector<8x512xf32> to vector<8x128xf32>
    %178 = arith.mulf %169, %177 : vector<8x128xf32>
    %179 = arith.addf %176, %178 : vector<8x128xf32>
    %180 = math.tanh %179 : vector<8x128xf32>
    %cst_48 = arith.constant 1.000000e+00 : f32
    %181 = vector.broadcast %cst_48 : f32 to vector<8x128xf32>
    %182 = arith.subf %181, %175 : vector<8x128xf32>
    %183 = arith.mulf %182, %180 : vector<8x128xf32>
    %184 = arith.mulf %175, %160 : vector<8x128xf32>
    %185 = arith.addf %183, %184 : vector<8x128xf32>
    %cst_49 = arith.constant dense<0.000000e+00> : vector<8x512xf32>
    %186 = tpu.matmul %185, %19, %cst_49 {dimension_numbers = #tpu.dot_dimension_numbers<[1], [0], [0], [1], [0, 0, 1, 1], [], []>} : vector<8x128xf32>, vector<128x512xf32>, vector<8x512xf32> -> vector<8x512xf32>
    %c48 = arith.constant 48 : index
    %c0_50 = arith.constant 0 : index
    %187 = vector.load %arg13[%c48, %c0_50] : memref<80x512xf32, #tpu.memory_space<vmem>>, vector<8x512xf32>
    %188 = arith.addf %186, %187 : vector<8x512xf32>
    %189 = vector.extract_strided_slice %188 {offsets = [0, 0], sizes = [8, 128], strides = [1, 1]} : vector<8x512xf32> to vector<8x128xf32>
    %190 = arith.negf %189 : vector<8x128xf32>
    %191 = math.exp %190 : vector<8x128xf32>
    %cst_51 = arith.constant 1.000000e+00 : f32
    %192 = vector.broadcast %cst_51 : f32 to vector<8x128xf32>
    %193 = arith.addf %192, %191 : vector<8x128xf32>
    %194 = arith.divf %192, %193 : vector<8x128xf32>
    %195 = vector.extract_strided_slice %188 {offsets = [0, 128], sizes = [8, 128], strides = [1, 1]} : vector<8x512xf32> to vector<8x128xf32>
    %196 = arith.negf %195 : vector<8x128xf32>
    %197 = math.exp %196 : vector<8x128xf32>
    %cst_52 = arith.constant 1.000000e+00 : f32
    %198 = vector.broadcast %cst_52 : f32 to vector<8x128xf32>
    %199 = arith.addf %198, %197 : vector<8x128xf32>
    %200 = arith.divf %198, %199 : vector<8x128xf32>
    %201 = vector.extract_strided_slice %188 {offsets = [0, 384], sizes = [8, 128], strides = [1, 1]} : vector<8x512xf32> to vector<8x128xf32>
    %202 = vector.extract_strided_slice %188 {offsets = [0, 256], sizes = [8, 128], strides = [1, 1]} : vector<8x512xf32> to vector<8x128xf32>
    %203 = arith.mulf %194, %202 : vector<8x128xf32>
    %204 = arith.addf %201, %203 : vector<8x128xf32>
    %205 = math.tanh %204 : vector<8x128xf32>
    %cst_53 = arith.constant 1.000000e+00 : f32
    %206 = vector.broadcast %cst_53 : f32 to vector<8x128xf32>
    %207 = arith.subf %206, %200 : vector<8x128xf32>
    %208 = arith.mulf %207, %205 : vector<8x128xf32>
    %209 = arith.mulf %200, %185 : vector<8x128xf32>
    %210 = arith.addf %208, %209 : vector<8x128xf32>
    %cst_54 = arith.constant dense<0.000000e+00> : vector<8x512xf32>
    %211 = tpu.matmul %210, %19, %cst_54 {dimension_numbers = #tpu.dot_dimension_numbers<[1], [0], [0], [1], [0, 0, 1, 1], [], []>} : vector<8x128xf32>, vector<128x512xf32>, vector<8x512xf32> -> vector<8x512xf32>
    %c56 = arith.constant 56 : index
    %c0_55 = arith.constant 0 : index
    %212 = vector.load %arg13[%c56, %c0_55] : memref<80x512xf32, #tpu.memory_space<vmem>>, vector<8x512xf32>
    %213 = arith.addf %211, %212 : vector<8x512xf32>
    %214 = vector.extract_strided_slice %213 {offsets = [0, 0], sizes = [8, 128], strides = [1, 1]} : vector<8x512xf32> to vector<8x128xf32>
    %215 = arith.negf %214 : vector<8x128xf32>
    %216 = math.exp %215 : vector<8x128xf32>
    %cst_56 = arith.constant 1.000000e+00 : f32
    %217 = vector.broadcast %cst_56 : f32 to vector<8x128xf32>
    %218 = arith.addf %217, %216 : vector<8x128xf32>
    %219 = arith.divf %217, %218 : vector<8x128xf32>
    %220 = vector.extract_strided_slice %213 {offsets = [0, 128], sizes = [8, 128], strides = [1, 1]} : vector<8x512xf32> to vector<8x128xf32>
    %221 = arith.negf %220 : vector<8x128xf32>
    %222 = math.exp %221 : vector<8x128xf32>
    %cst_57 = arith.constant 1.000000e+00 : f32
    %223 = vector.broadcast %cst_57 : f32 to vector<8x128xf32>
    %224 = arith.addf %223, %222 : vector<8x128xf32>
    %225 = arith.divf %223, %224 : vector<8x128xf32>
    %226 = vector.extract_strided_slice %213 {offsets = [0, 384], sizes = [8, 128], strides = [1, 1]} : vector<8x512xf32> to vector<8x128xf32>
    %227 = vector.extract_strided_slice %213 {offsets = [0, 256], sizes = [8, 128], strides = [1, 1]} : vector<8x512xf32> to vector<8x128xf32>
    %228 = arith.mulf %219, %227 : vector<8x128xf32>
    %229 = arith.addf %226, %228 : vector<8x128xf32>
    %230 = math.tanh %229 : vector<8x128xf32>
    %cst_58 = arith.constant 1.000000e+00 : f32
    %231 = vector.broadcast %cst_58 : f32 to vector<8x128xf32>
    %232 = arith.subf %231, %225 : vector<8x128xf32>
    %233 = arith.mulf %232, %230 : vector<8x128xf32>
    %234 = arith.mulf %225, %210 : vector<8x128xf32>
    %235 = arith.addf %233, %234 : vector<8x128xf32>
    %c0_59 = arith.constant 0 : index
    %c0_60 = arith.constant 0 : index
    %236 = vector.load %arg10[%c0_59, %c0_60] : memref<8x128xf32, #tpu.memory_space<vmem>>, vector<8x128xf32>
    tpu.vector_store %arg10[%c0_59, %c0_60], %235 {strides = array<i32>} : memref<8x128xf32, #tpu.memory_space<vmem>>, vector<8x128xf32>,
    %cst_61 = arith.constant dense<0.000000e+00> : vector<8x512xf32>
    %237 = tpu.matmul %235, %19, %cst_61 {dimension_numbers = #tpu.dot_dimension_numbers<[1], [0], [0], [1], [0, 0, 1, 1], [], []>} : vector<8x128xf32>, vector<128x512xf32>, vector<8x512xf32> -> vector<8x512xf32>
    %c64 = arith.constant 64 : index
    %c0_62 = arith.constant 0 : index
    %238 = vector.load %arg13[%c64, %c0_62] : memref<80x512xf32, #tpu.memory_space<vmem>>, vector<8x512xf32>
    %239 = arith.addf %237, %238 : vector<8x512xf32>
    %240 = vector.extract_strided_slice %239 {offsets = [0, 0], sizes = [8, 128], strides = [1, 1]} : vector<8x512xf32> to vector<8x128xf32>
    %241 = arith.negf %240 : vector<8x128xf32>
    %242 = math.exp %241 : vector<8x128xf32>
    %cst_63 = arith.constant 1.000000e+00 : f32
    %243 = vector.broadcast %cst_63 : f32 to vector<8x128xf32>
    %244 = arith.addf %243, %242 : vector<8x128xf32>
    %245 = arith.divf %243, %244 : vector<8x128xf32>
    %246 = vector.extract_strided_slice %239 {offsets = [0, 128], sizes = [8, 128], strides = [1, 1]} : vector<8x512xf32> to vector<8x128xf32>
    %247 = arith.negf %246 : vector<8x128xf32>
    %248 = math.exp %247 : vector<8x128xf32>
    %cst_64 = arith.constant 1.000000e+00 : f32
    %249 = vector.broadcast %cst_64 : f32 to vector<8x128xf32>
    %250 = arith.addf %249, %248 : vector<8x128xf32>
    %251 = arith.divf %249, %250 : vector<8x128xf32>
    %252 = vector.extract_strided_slice %239 {offsets = [0, 384], sizes = [8, 128], strides = [1, 1]} : vector<8x512xf32> to vector<8x128xf32>
    %253 = vector.extract_strided_slice %239 {offsets = [0, 256], sizes = [8, 128], strides = [1, 1]} : vector<8x512xf32> to vector<8x128xf32>
    %254 = arith.mulf %245, %253 : vector<8x128xf32>
    %255 = arith.addf %252, %254 : vector<8x128xf32>
    %256 = math.tanh %255 : vector<8x128xf32>
    %cst_65 = arith.constant 1.000000e+00 : f32
    %257 = vector.broadcast %cst_65 : f32 to vector<8x128xf32>
    %258 = arith.subf %257, %251 : vector<8x128xf32>
    %259 = arith.mulf %258, %256 : vector<8x128xf32>
    %260 = arith.mulf %251, %235 : vector<8x128xf32>
    %261 = arith.addf %259, %260 : vector<8x128xf32>
    %c0_66 = arith.constant 0 : index
    %c0_67 = arith.constant 0 : index
    %262 = vector.load %arg11[%c0_66, %c0_67] : memref<8x128xf32, #tpu.memory_space<vmem>>, vector<8x128xf32>
    tpu.vector_store %arg11[%c0_66, %c0_67], %261 {strides = array<i32>} : memref<8x128xf32, #tpu.memory_space<vmem>>, vector<8x128xf32>,
    %cst_68 = arith.constant dense<0.000000e+00> : vector<8x512xf32>
    %263 = tpu.matmul %261, %19, %cst_68 {dimension_numbers = #tpu.dot_dimension_numbers<[1], [0], [0], [1], [0, 0, 1, 1], [], []>} : vector<8x128xf32>, vector<128x512xf32>, vector<8x512xf32> -> vector<8x512xf32>
    %c72 = arith.constant 72 : index
    %c0_69 = arith.constant 0 : index
    %264 = vector.load %arg13[%c72, %c0_69] : memref<80x512xf32, #tpu.memory_space<vmem>>, vector<8x512xf32>
    %265 = arith.addf %263, %264 : vector<8x512xf32>
    %266 = vector.extract_strided_slice %265 {offsets = [0, 0], sizes = [8, 128], strides = [1, 1]} : vector<8x512xf32> to vector<8x128xf32>
    %267 = arith.negf %266 : vector<8x128xf32>
    %268 = math.exp %267 : vector<8x128xf32>
    %cst_70 = arith.constant 1.000000e+00 : f32
    %269 = vector.broadcast %cst_70 : f32 to vector<8x128xf32>
    %270 = arith.addf %269, %268 : vector<8x128xf32>
    %271 = arith.divf %269, %270 : vector<8x128xf32>
    %272 = vector.extract_strided_slice %265 {offsets = [0, 128], sizes = [8, 128], strides = [1, 1]} : vector<8x512xf32> to vector<8x128xf32>
    %273 = arith.negf %272 : vector<8x128xf32>
    %274 = math.exp %273 : vector<8x128xf32>
    %cst_71 = arith.constant 1.000000e+00 : f32
    %275 = vector.broadcast %cst_71 : f32 to vector<8x128xf32>
    %276 = arith.addf %275, %274 : vector<8x128xf32>
    %277 = arith.divf %275, %276 : vector<8x128xf32>
    %278 = vector.extract_strided_slice %265 {offsets = [0, 384], sizes = [8, 128], strides = [1, 1]} : vector<8x512xf32> to vector<8x128xf32>
    %279 = vector.extract_strided_slice %265 {offsets = [0, 256], sizes = [8, 128], strides = [1, 1]} : vector<8x512xf32> to vector<8x128xf32>
    %280 = arith.mulf %271, %279 : vector<8x128xf32>
    %281 = arith.addf %278, %280 : vector<8x128xf32>
    %282 = math.tanh %281 : vector<8x128xf32>
    %cst_72 = arith.constant 1.000000e+00 : f32
    %283 = vector.broadcast %cst_72 : f32 to vector<8x128xf32>
    %284 = arith.subf %283, %277 : vector<8x128xf32>
    %285 = arith.mulf %284, %282 : vector<8x128xf32>
    %286 = arith.mulf %277, %261 : vector<8x128xf32>
    %287 = arith.addf %285, %286 : vector<8x128xf32>
    %c0_73 = arith.constant 0 : index
    %c0_74 = arith.constant 0 : index
    %288 = vector.load %arg12[%c0_73, %c0_74] : memref<8x128xf32, #tpu.memory_space<vmem>>, vector<8x128xf32>
    tpu.vector_store %arg12[%c0_73, %c0_74], %287 {strides = array<i32>} : memref<8x128xf32, #tpu.memory_space<vmem>>, vector<8x128xf32>,
    %289 = tpu.concatenate %110, %135, %160, %185, %210, %235, %261, %287 in 0 : vector<8x128xf32>, vector<8x128xf32>, vector<8x128xf32>, vector<8x128xf32>, vector<8x128xf32>, vector<8x128xf32>, vector<8x128xf32>, vector<8x128xf32> -> vector<64x128xf32>
    %c0_75 = arith.constant 0 : index
    %c0_76 = arith.constant 0 : index
    %290 = vector.load %arg7[%c0_75, %c0_76] : memref<128x128xf32, #tpu.memory_space<vmem>>, vector<128x128xf32>
    %cst_77 = arith.constant dense<0.000000e+00> : vector<64x128xf32>
    %291 = tpu.matmul %289, %290, %cst_77 {dimension_numbers = #tpu.dot_dimension_numbers<[1], [0], [0], [1], [0, 0, 1, 1], [], []>} : vector<64x128xf32>, vector<128x128xf32>, vector<64x128xf32> -> vector<64x128xf32>
    %c0_78 = arith.constant 0 : index
    %c0_79 = arith.constant 0 : index
    %292 = vector.load %arg8[%c0_78, %c0_79] : memref<1x128xf32, #tpu.memory_space<vmem>>, vector<1x128xf32>
    %293 = vector.broadcast %292 : vector<1x128xf32> to vector<64x128xf32>
    %294 = arith.addf %291, %293 : vector<64x128xf32>
    %c0_80 = arith.constant 0 : index
    %c0_81 = arith.constant 0 : index
    %295 = vector.load %arg9[%c0_80, %c0_81] : memref<64x128xf32, #tpu.memory_space<vmem>>, vector<64x128xf32>
    tpu.vector_store %arg9[%c0_80, %c0_81], %294 {strides = array<i32>} : memref<64x128xf32, #tpu.memory_space<vmem>>, vector<64x128xf32>,
    return
  }
  func.func @transform_0(%arg0: i32) -> (i32, i32) {
    %c0_i32 = arith.constant 0 : i32
    %c0_i32_0 = arith.constant 0 : i32
    %c0_i32_1 = arith.constant 0 : i32
    return %c0_i32, %c0_i32_0 : i32, i32
  }
  func.func @transform_1(%arg0: i32) -> (i32, i32) {
    %c0_i32 = arith.constant 0 : i32
    %c0_i32_0 = arith.constant 0 : i32
    %c0_i32_1 = arith.constant 0 : i32
    return %c0_i32, %c0_i32_0 : i32, i32
  }
  func.func @transform_2(%arg0: i32) -> (i32, i32) {
    %c0_i32 = arith.constant 0 : i32
    %c0_i32_0 = arith.constant 0 : i32
    %c0_i32_1 = arith.constant 0 : i32
    return %c0_i32, %c0_i32_0 : i32, i32
  }
  func.func @transform_3(%arg0: i32) -> (i32, i32) {
    %c0_i32 = arith.constant 0 : i32
    %c0_i32_0 = arith.constant 0 : i32
    %c0_i32_1 = arith.constant 0 : i32
    return %c0_i32, %c0_i32_0 : i32, i32
  }
  func.func @transform_4(%arg0: i32) -> (i32, i32) {
    %c0_i32 = arith.constant 0 : i32
    %c0_i32_0 = arith.constant 0 : i32
    %c0_i32_1 = arith.constant 0 : i32
    return %c0_i32, %c0_i32_0 : i32, i32
  }
  func.func @transform_5(%arg0: i32) -> (i32, i32) {
    %c0_i32 = arith.constant 0 : i32
    %c0_i32_0 = arith.constant 0 : i32
    %c0_i32_1 = arith.constant 0 : i32
    return %c0_i32, %c0_i32_0 : i32, i32
  }
  func.func @transform_6(%arg0: i32) -> (i32, i32) {
    %c0_i32 = arith.constant 0 : i32
    %c0_i32_0 = arith.constant 0 : i32
    %c0_i32_1 = arith.constant 0 : i32
    return %c0_i32, %c0_i32_0 : i32, i32
  }
  func.func @transform_7(%arg0: i32) -> (i32, i32) {
    %c0_i32 = arith.constant 0 : i32
    %c0_i32_0 = arith.constant 0 : i32
    %c0_i32_1 = arith.constant 0 : i32
    return %c0_i32, %c0_i32_0 : i32, i32
  }
  func.func @transform_8(%arg0: i32) -> (i32, i32) {
    %c0_i32 = arith.constant 0 : i32
    %c0_i32_0 = arith.constant 0 : i32
    %c0_i32_1 = arith.constant 0 : i32
    return %c0_i32, %c0_i32_0 : i32, i32
  }
  func.func @transform_9(%arg0: i32) -> (i32, i32) {
    %c0_i32 = arith.constant 0 : i32
    %c0_i32_0 = arith.constant 0 : i32
    %c0_i32_1 = arith.constant 0 : i32
    return %c0_i32, %c0_i32_0 : i32, i32
  }
  func.func @transform_10(%arg0: i32) -> (i32, i32) {
    %c0_i32 = arith.constant 0 : i32
    %c0_i32_0 = arith.constant 0 : i32
    %c0_i32_1 = arith.constant 0 : i32
    return %c0_i32, %c0_i32_0 : i32, i32
  }
  func.func @transform_11(%arg0: i32) -> (i32, i32) {
    %c0_i32 = arith.constant 0 : i32
    %c0_i32_0 = arith.constant 0 : i32
    %c0_i32_1 = arith.constant 0 : i32
    return %c0_i32, %c0_i32_0 : i32, i32
  }
}

</mosaic_0001>

<bundles_post_ra>
// kernel: gru_with_cells_category_forward.1
= control target key start
LH: loop header
LB: loop body
LE: loop exit
PB: predicated region body
PF: predicated region fallthrough
CT: control target
= control target key end

     0   :  { %v2195_v0 = vmov 0   ;;  %vm234_vm0 = vcmask 1041408   ;;  %vm203_vm4 = vcmask 408576   ;;  %s4271_s0 = inlined_call_operand.vmem [shape: s32[80,1], index: 0, kind: input, shape index: {}]   ;;  %s4272_s1 = inlined_call_operand.vmem [shape: s32[80,1], index: 1, kind: input, shape index: {}]   ;;  %s4273_s5 = inlined_call_operand.vmem [shape: f32[128,512], index: 5, kind: input, shape index: {}]   ;;  %s4274_s3 = inlined_call_operand.vmem [shape: f32[50,512], index: 3, kind: input, shape index: {}]   ;;  %s4275_s2 = inlined_call_operand.vmem [shape: f32[8,128], index: 2, kind: input, shape index: {}]   ;;  %s4276_s4 = inlined_call_operand.vmem [shape: f32[1,512], index: 4, kind: input, shape index: {}]   ;;  %s4277_s9 = inlined_call_operand.vmem [shape: f32[8,128], index: 9, kind: output, shape index: {1}]   ;;  %s4278_s6 = inlined_call_operand.vmem [shape: f32[128,128], index: 6, kind: input, shape index: {}]   ;;  %s4279_s10 = inlined_call_operand.vmem [shape: f32[8,128], index: 10, kind: output, shape index: {2}]   ;;  %s4280_s7 = inlined_call_operand.vmem [shape: f32[1,128], index: 7, kind: input, shape index: {}]   ;;  %s4281_s8 = inlined_call_operand.vmem [shape: f32[64,128], index: 8, kind: output, shape index: {0}]   ;;  %s4282_s11 = inlined_call_operand.vmem [shape: f32[8,128], index: 11, kind: output, shape index: {3}]  }
   0x1   :  { %2006 = vset.pattern.permute.xlu1 %v2195_v0  ;;  %2005 = vset.pattern.permute.xlu0 %v2195_v0  ;;  %v36_v1 = vld [vmem:[%s4271_s0 + $0x8] sm:$0xff]  ;;  %v35_v2 = vld [vmem:[%s4271_s0] sm:$0xff]  ;;  %v91_v6 = vld [vmem:[%s4272_s1 + $0x30] sm:$0xff] }
   0x2   :  { %v86_v3 = vld [vmem:[%s4272_s1 + $0x8] sm:$0xff]  ;;  %49 = vperm.xlu1 %2006, %v36_v1   ;;  %46 = vperm.xlu0 %2005, %v35_v2   ;;  %v85_v5 = vld [vmem:[%s4272_s1] sm:$0xff]  ;;  %v41_v8 = vld [vmem:[%s4271_s0 + $0x30] sm:$0xff]  ;;  %v101_v9 = vadd.s32 48, %v91_v6  ;;  %v33_v2 = vlaneseq }
   0x3   :  { %v96_v4 = vadd.s32 48, %v86_v3  ;;  %2007 = vset.pattern.permute.xlu2 %v2195_v0  ;;  %v95_v7 = vadd.s32 48, %v85_v5  ;;  %v88_v10 = vld [vmem:[%s4272_s1 + $0x18] sm:$0xff]  ;;  %v37_v13 = vld [vmem:[%s4271_s0 + $0x10] sm:$0xff]  ;;  %v89_v19 = vld [vmem:[%s4272_s1 + $0x20] sm:$0xff] }
   0x4   :  { %v98_v11 = vadd.s32 48, %v88_v10  ;;  %v38_v12 = vld [vmem:[%s4271_s0 + $0x18] sm:$0xff]  ;;  %v87_v14 = vld [vmem:[%s4272_s1 + $0x10] sm:$0xff]  ;;  %v99_v20 = vadd.s32 48, %v89_v19  ;;  %v39_v21 = vld [vmem:[%s4271_s0 + $0x20] sm:$0xff] }
   0x5   :  { %109 = vperm.xlu2 %2007, %v96_v4   ;;  %v92_v15 = vld [vmem:[%s4272_s1 + $0x38] sm:$0xff]  ;;  %v97_v16 = vadd.s32 48, %v87_v14  ;;  %v43_v22 = vld [vmem:[%s4271_s0 + $0x40] sm:$0xff]  ;;  %v90_v24 = vld [vmem:[%s4272_s1 + $0x28] sm:$0xff] }
   0x6   :  { %v42_v17 = vld [vmem:[%s4271_s0 + $0x38] sm:$0xff]  ;;  %v102_v18 = vadd.s32 48, %v92_v15  ;;  %v93_v23 = vld [vmem:[%s4272_s1 + $0x40] sm:$0xff]  ;;  %v40_v26 = vld [vmem:[%s4271_s0 + $0x28] sm:$0xff]  ;;  %v100_v27 = vadd.s32 48, %v90_v24 }
   0x7   :  { %v103_v25 = vadd.s32 48, %v93_v23  ;;  %v94_v28 = vld [vmem:[%s4272_s1 + $0x48] sm:$0xff]  ;;  %v2320_v31 = vld [vmem:[%s4273_s5 + $0x1e0] sm:$0xff]  ;;  %v192_v60 = vld [vmem:[%s4274_s3 + $0xd8] sm:$0x3] }
   0x8   :  { %v104_v29 = vadd.s32 48, %v94_v28  ;;  %v44_v30 = vld [vmem:[%s4271_s0 + $0x48] sm:$0xff]  ;;  %v2325_v32 = vld [vmem:[%s4273_s5 + $0x1c0] sm:$0xff]  ;;  %549 = vmatpush.msra.mxu0 %v2320_v31  ;;  %v188_v3 = vld [vmem:[%s4274_s3 + $0xb8] sm:$0xff] }
   0x9   :  { %v2332_v33 = vld [vmem:[%s4273_s5 + $0x1a0] sm:$0xff]  ;;  %v190_v56 = vld [vmem:[%s4274_s3 + $0xc8] sm:$0x3]  ;;  %v191_v4 = vld [vmem:[%s4274_s3 + $0xd0] sm:$0x3] }
   0xa   :  { %64 = vperm.xlu1 %2006, %v41_v8   ;;  %106 = vperm.xlu0 %2005, %v95_v7   ;;  %v2338_v34 = vld [vmem:[%s4273_s5 + $0x180] sm:$0xff]  ;;  %v186_v57 = vld [vmem:[%s4274_s3 + $0xa8] sm:$0xff]  ;;  %v187_v6 = vld [vmem:[%s4274_s3 + $0xb0] sm:$0xff]  ;;  %v2495_v8 = vand.u32 127, %v33_v2 }
   0xb   :  { %550 = vmatpush.msra.mxu0 %v2325_v32  ;;  %v2343_v35 = vld [vmem:[%s4273_s5 + $0x160] sm:$0xff]  ;;  %v182_v58 = vld [vmem:[%s4274_s3 + $0x88] sm:$0xff]  ;;  %v184_v7 = vld [vmem:[%s4274_s3 + $0x98] sm:$0xff] }
   0xc   :  { %v2349_v36 = vld [vmem:[%s4273_s5 + $0x140] sm:$0xff]  ;;  %v178_v61 = vld [vmem:[%s4274_s3 + $0x68] sm:$0xff]  ;;  %v183_v14 = vld [vmem:[%s4274_s3 + $0x90] sm:$0xff] }
   0xd   :  { %124 = vperm.xlu2 %2007, %v101_v9   ;;  %551 = vmatpush.msra.mxu0 %v2332_v33  ;;  %v2356_v37 = vld [vmem:[%s4273_s5 + $0x120] sm:$0xff]  ;;  %v174_v62 = vld [vmem:[%s4274_s3 + $0x48] sm:$0xff]  ;;  %v175_v19 = vld [vmem:[%s4274_s3 + $0x50] sm:$0xff] }
   0xe   :  { %v2362_v38 = vld [vmem:[%s4273_s5 + $0x100] sm:$0xff]  ;;  %v170_v1 = vld [vmem:[%s4274_s3 + $0x28] sm:$0xff]  ;;  %v171_v23 = vld [vmem:[%s4274_s3 + $0x30] sm:$0xff] }
   0xf   :  { %552 = vmatpush.msra.mxu0 %v2338_v34  ;;  %v189_v39 = vld [vmem:[%s4274_s3 + $0xc0] sm:$0x3]  ;;  %v166_v5 = vld [vmem:[%s4274_s3 + $0x8] sm:$0xff]  ;;  %v172_v28 = vld [vmem:[%s4274_s3 + $0x38] sm:$0xff] }
  0x10   :  { %1925 = vmatpush.msk.msra.mxu1 %vm234_vm0, %v189_v39  ;;  %1990 = vmatpush.msk.msra.mxu3 %vm234_vm0, %v189_v39  ;;  %v2372_v40 = vld [vmem:[%s4273_s5 + $0xe0] sm:$0xff]  ;;  %v2721_v2 = vld [vmem:[%s4273_s5 + $0x150] sm:$0xff] }
  0x11   :  { %553 = vmatpush.msra.mxu0 %v2343_v35  ;;  %1989 = vmatpush.msk.msra.mxu2 %vm234_vm0, %v189_v39  ;;  %v185_v41 = vld [vmem:[%s4274_s3 + $0xa0] sm:$0xff]  ;;  %v2581_v39 = vld [vmem:[%s4273_s5 + $0x1f0] sm:$0xff] }
  0x12   :  { %115 = vperm.xlu1 %2006, %v98_v11   ;;  %55 = vperm.xlu0 %2005, %v38_v12   ;;  %v2383_v42 = vld [vmem:[%s4273_s5 + $0xc0] sm:$0xff]  ;;  %v2196_v12 = vmov 0.0  }
  0x13   :  { %554 = vmatpush.msra.mxu0 %v2349_v36  ;;  %257 = vmatpush.msra.mxu1 %v185_v41  ;;  %v181_v43 = vld [vmem:[%s4274_s3 + $0x80] sm:$0xff] }
  0x14   :  { %1992 = vmatpush.msra.mxu3 %v185_v41  ;;  %v2392_v44 = vld [vmem:[%s4273_s5 + $0xa0] sm:$0xff]  ;;  %1991 = vmatpush.msra.mxu2 %v185_v41  ;;  %v2587_v41 = vld [vmem:[%s4273_s5 + $0x188] sm:$0xff] }
  0x15   :  { %52 = vperm.xlu2 %2007, %v37_v13   ;;  %555 = vmatpush.msra.mxu0 %v2356_v37  ;;  %v177_v45 = vld [vmem:[%s4274_s3 + $0x60] sm:$0xff] }
  0x16   :  { %258 = vmatpush.msra.mxu1 %v181_v43  ;;  %1994 = vmatpush.msra.mxu3 %v181_v43  ;;  %v2400_v46 = vld [vmem:[%s4273_s5 + $0x80] sm:$0xff] }
  0x17   :  { %556 = vmatpush.msra.mxu0 %v2362_v38  ;;  %v173_v47 = vld [vmem:[%s4274_s3 + $0x40] sm:$0xff]  ;;  %1993 = vmatpush.msra.mxu2 %v181_v43 }
  0x18   :  { %259 = vmatpush.msra.mxu1 %v177_v45  ;;  %1996 = vmatpush.msra.mxu3 %v177_v45  ;;  %v2409_v48 = vld [vmem:[%s4273_s5 + $0x60] sm:$0xff] }
  0x19   :  { %557 = vmatpush.msra.mxu0 %v2372_v40  ;;  %1995 = vmatpush.msra.mxu2 %v177_v45  ;;  %v169_v49 = vld [vmem:[%s4274_s3 + $0x20] sm:$0xff] }
  0x1a   :  { %112 = vperm.xlu1 %2006, %v97_v16   ;;  %67 = vperm.xlu0 %2005, %v42_v17   ;;  %v2419_v50 = vld [vmem:[%s4273_s5 + $0x40] sm:$0xff]  ;;  %v180_v16 = vld [vmem:[%s4274_s3 + $0x78] sm:$0xff]  ;;  %v2525_v17 = vld [vmem:[%s4273_s5 + $0x1e8] sm:$0xff] }
  0x1b   :  { %558 = vmatpush.msra.mxu0 %v2383_v42  ;;  %260 = vmatpush.msra.mxu1 %v173_v47  ;;  %v165_v51 = vld [vmem:[%s4274_s3] sm:$0xff] }
  0x1c   :  { %1998 = vmatpush.msra.mxu3 %v173_v47  ;;  %1997 = vmatpush.msra.mxu2 %v173_v47  ;;  %v2428_v52 = vld [vmem:[%s4273_s5 + $0x20] sm:$0xff] }
  0x1d   :  { %127 = vperm.xlu2 %2007, %v102_v18   ;;  %559 = vmatpush.msra.mxu0 %v2392_v44  ;;  %v2434_v53 = vld [vmem:[%s4273_s5] sm:$0xff]  ;;  %v179_v18 = vld [vmem:[%s4274_s3 + $0x70] sm:$0xff] }
  0x1e   :  { %261 = vmatpush.msra.mxu1 %v169_v49  ;;  %2000 = vmatpush.msra.mxu3 %v169_v49  ;;  %v2439_v54 = vld [vmem:[%s4275_s2] sm:$0xff] }
  0x1f   :  { %560 = vmatpush.msra.mxu0 %v2400_v46  ;;  %1999 = vmatpush.msra.mxu2 %v169_v49 }
  0x20   :  { %262 = vmatpush.msra.mxu1 %v165_v51  ;;  %2002 = vmatpush.msra.mxu3 %v165_v51 }
  0x21   :  { %561 = vmatpush.msra.mxu0 %v2409_v48  ;;  %2001 = vmatpush.msra.mxu2 %v165_v51  ;;  %v2617_v51 = vld [vmem:[%s4273_s5 + $0x1d0] sm:$0xff] }
  0x22   :  { %118 = vperm.xlu1 %2006, %v99_v20   ;;  %58 = vperm.xlu0 %2005, %v39_v21   ;;  %v176_v20 = vld [vmem:[%s4274_s3 + $0x58] sm:$0xff] }
  0x23   :  { %562 = vmatpush.msra.mxu0 %v2419_v50  ;;  %1936 = vmatpush.msk.msrb.mxu1 %vm234_vm0, %v190_v56 }
  0x24   :  { %1958 = vmatpush.msk.msrb.mxu3 %vm234_vm0, %v192_v60  ;;  %1947 = vmatpush.msk.msrb.mxu2 %vm234_vm0, %v191_v4  ;;  %v2666_v60 = vld [vmem:[%s4273_s5 + $0x190] sm:$0xff] }
  0x25   :  { %70 = vperm.xlu2 %2007, %v43_v22   ;;  %563 = vmatpush.msra.mxu0 %v2428_v52 }
  0x26   :  { %304 = vmatpush.msrb.mxu1 %v186_v57  ;;  %398 = vmatpush.msrb.mxu3 %v188_v3 }
  0x27   :  { %564 = vmatpush.msra.mxu0 %v2434_v53  ;;  %351 = vmatpush.msrb.mxu2 %v187_v6  ;;  %v2759_v6 = vld [vmem:[%s4273_s5 + $0xc8] sm:$0xff] }
  0x28   :  { %565 = vmatmul.f32.vlgmr.msra.gmra.mxu0 %v2439_v54  ;;  %305 = vmatpush.msrb.mxu1 %v182_v58 }
  0x29   :  { %679 = vmatpush.msrb.mxu0 %v2320_v31  ;;  %399 = vmatpush.msrb.mxu3 %v184_v7  ;;  %v2764_v7 = vld [vmem:[%s4273_s5 + $0x138] sm:$0xff] }
  0x2a   :  { %61 = vperm.xlu1 %2006, %v40_v26   ;;  %130 = vperm.xlu0 %2005, %v103_v25   ;;  %v2554_v26 = vld [vmem:[%s4273_s5 + $0x1c8] sm:$0xff] }
  0x2b   :  { %680 = vmatpush.msrb.mxu0 %v2325_v32  ;;  %306 = vmatpush.msrb.mxu1 %v178_v61  ;;  %v2671_v61 = vld [vmem:[%s4273_s5 + $0x128] sm:$0xff] }
  0x2c   :  { %352 = vmatpush.msrb.mxu2 %v183_v14  ;;  %400 = vmatpush.msrb.mxu3 %v180_v16  ;;  %v2821_v14 = vld [vmem:[%s4273_s5 + $0xd0] sm:$0xff]  ;;  %v2833_v16 = vld [vmem:[%s4273_s5 + $0xd8] sm:$0xff] }
  0x2d   :  { %121 = vperm.xlu2 %2007, %v100_v27   ;;  %681 = vmatpush.msrb.mxu0 %v2332_v33  ;;  %v167_v27 = vld [vmem:[%s4274_s3 + $0x10] sm:$0xff] }
  0x2e   :  { %307 = vmatpush.msrb.mxu1 %v174_v62  ;;  %353 = vmatpush.msrb.mxu2 %v179_v18  ;;  %v2676_v62 = vld [vmem:[%s4273_s5 + $0x198] sm:$0xff]  ;;  %v2846_v18 = vld [vmem:[%s4273_s5 + $0xb0] sm:$0xff] }
  0x2f   :  { %682 = vmatpush.msrb.mxu0 %v2338_v34  ;;  %401 = vmatpush.msrb.mxu3 %v176_v20  ;;  %v2856_v20 = vld [vmem:[%s4273_s5 + $0xb8] sm:$0xff] }
  0x30   :  { %308 = vmatpush.msrb.mxu1 %v170_v1  ;;  %354 = vmatpush.msrb.mxu2 %v175_v19  ;;  %v2714_v1 = vld [vmem:[%s4273_s5 + $0x178] sm:$0xff]  ;;  %v2851_v19 = vld [vmem:[%s4273_s5 + $0x48] sm:$0xff]  ;;  %4391 = vst [vmem:[#allocation6_spill] sm:$0xff] %v2856_v20 }
  0x31   :  { %683 = vmatpush.msrb.mxu0 %v2343_v35  ;;  %402 = vmatpush.msrb.mxu3 %v172_v28  ;;  %4390 = vst [vmem:[#allocation5_spill] sm:$0xff] %v2851_v19  ;;  %v2900_v28 = vld [vmem:[%s4273_s5 + $0x78] sm:$0xff] }
  0x32   :  { %133 = vperm.xlu1 %2006, %v104_v29   ;;  %73 = vperm.xlu0 %2005, %v44_v30   ;;  %v2573_v30 = vld [vmem:[%s4273_s5 + $0x1a8] sm:$0xff]  ;;  %4397 = vst [vmem:[#allocation12_spill] sm:$0xff] %v2900_v28 }
  0x33   :  { %684 = vmatpush.msrb.mxu0 %v2349_v36  ;;  %309 = vmatpush.msrb.mxu1 %v166_v5 }
  0x34   :  { %355 = vmatpush.msrb.mxu2 %v171_v23  ;;  %v2874_v23 = vld [vmem:[%s4273_s5 + $0x8] sm:$0xff] }
  0x35   :  { %685 = vmatpush.msrb.mxu0 %v2356_v37  ;;  %4394 = vst [vmem:[#allocation9_spill] sm:$0xff] %v2874_v23 }
  0x36   :  { %356 = vmatpush.msrb.mxu2 %v167_v27  ;;  %v2895_v27 = vld [vmem:[%s4273_s5 + $0x70] sm:$0xff] }
  0x37   :  { %686 = vmatpush.msrb.mxu0 %v2362_v38  ;;  %4396 = vst [vmem:[#allocation11_spill] sm:$0xff] %v2895_v27 }
  0x39   :  { %687 = vmatpush.msrb.mxu0 %v2372_v40 }
  0x3b   :  { %688 = vmatpush.msrb.mxu0 %v2383_v42 }
  0x3d   :  { %689 = vmatpush.msrb.mxu0 %v2392_v44 }
  0x3f   :  { %690 = vmatpush.msrb.mxu0 %v2400_v46 }
  0x41   :  { %691 = vmatpush.msrb.mxu0 %v2409_v48 }
  0x43   :  { %692 = vmatpush.msrb.mxu0 %v2419_v50 }
  0x45   :  { %693 = vmatpush.msrb.mxu0 %v2428_v52 }
  0x47   :  { %694 = vmatpush.msrb.mxu0 %v2434_v53 }
  0x49   :  { %809 = vmatpush.msra.mxu0 %v2320_v31  ;;  %v168_v31 = vld [vmem:[%s4274_s3 + $0x18] sm:$0xff] }
  0x4a   :  { %403 = vmatpush.msrb.mxu3 %v168_v31  ;;  %v2927_v31 = vld [vmem:[%s4273_s5 + $0x30] sm:$0xff] }
  0x4b   :  { %810 = vmatpush.msra.mxu0 %v2325_v32  ;;  %4400 = vst [vmem:[#allocation15_spill] sm:$0xff] %v2927_v31 }
  0x4d   :  { %811 = vmatpush.msra.mxu0 %v2332_v33  ;;  %v2612_v33 = vld [vmem:[%s4273_s5 + $0x1f8] sm:$0xff] }
  0x4f   :  { %812 = vmatpush.msra.mxu0 %v2338_v34  ;;  %v2622_v34 = vld [vmem:[%s4273_s5 + $0x168] sm:$0xff] }
  0x51   :  { %813 = vmatpush.msra.mxu0 %v2343_v35  ;;  %v2648_v35 = vld [vmem:[%s4273_s5 + $0x1b0] sm:$0xff] }
  0x53   :  { %814 = vmatpush.msra.mxu0 %v2349_v36  ;;  %v2653_v36 = vld [vmem:[%s4273_s5 + $0x148] sm:$0xff] }
  0x55   :  { %815 = vmatpush.msra.mxu0 %v2356_v37  ;;  %v2658_v37 = vld [vmem:[%s4273_s5 + $0x1b8] sm:$0xff] }
  0x57   :  { %816 = vmatpush.msra.mxu0 %v2362_v38 }
  0x59   :  { %817 = vmatpush.msra.mxu0 %v2372_v40 }
  0x5b   :  { %818 = vmatpush.msra.mxu0 %v2383_v42  ;;  %v2704_v42 = vld [vmem:[%s4273_s5 + $0x170] sm:$0xff] }
  0x5d   :  { %819 = vmatpush.msra.mxu0 %v2392_v44  ;;  %v2709_v44 = vld [vmem:[%s4273_s5 + $0x108] sm:$0xff] }
  0x5f   :  { %v2444_v55 = vpop.permute.xlu2 %109  ;;  %820 = vmatpush.msra.mxu0 %v2400_v46  ;;  %v2742_v46 = vld [vmem:[%s4273_s5 + $0xe8] sm:$0xff] }
  0x60   :  { %vm136_vm8 = vcmp.eq.s32.totalorder %v2495_v8, %v2444_v55  ;;  %v2629_v55 = vld [vmem:[%s4273_s5 + $0x1d8] sm:$0xff] }
  0x61   :  { %821 = vmatpush.msra.mxu0 %v2409_v48  ;;  %v2747_v48 = vld [vmem:[%s4273_s5 + $0x158] sm:$0xff] }
  0x63   :  { %822 = vmatpush.msra.mxu0 %v2419_v50  ;;  %v2752_v50 = vld [vmem:[%s4273_s5 + $0x130] sm:$0xff] }
  0x65   :  { %823 = vmatpush.msra.mxu0 %v2428_v52  ;;  %v2785_v52 = vld [vmem:[%s4273_s5 + $0xa8] sm:$0xff] }
  0x67   :  { %v125_v59 = vpop.permute.xlu2 %124  ;;  %824 = vmatpush.msra.mxu0 %v2434_v53  ;;  %v2790_v53 = vld [vmem:[%s4273_s5 + $0x118] sm:$0xff] }
  0x68   :  { %vm141_vm1 = vcmp.eq.s32.totalorder %v2495_v8, %v125_v59 }
  0x6f   :  { %v2497_v9 = vpop.permute.xlu2 %52 }
  0x70   :  { %vm77_vm14 = vcmp.eq.s32.totalorder %v2495_v8, %v2497_v9  ;;  %v2780_v9 = vld [vmem:[%s4273_s5 + $0x110] sm:$0xff] }
  0x74   :  { %v50_v63 = vpop.permute.xlu1 %49  ;;  %v47_v0 = vpop.permute.xlu0 %46 }
  0x75   :  { %vm75_vm5 = vcmp.eq.s32.totalorder %v2495_v8, %v47_v0  ;;  %vm76_vm9 = vcmp.eq.s32.totalorder %v2495_v8, %v50_v63 }
  0x76   :  { %vm146_vm10 = vmor %vm76_vm9, %vm136_vm8 }
  0x77   :  { %v128_v24 = vpop.permute.xlu2 %127  ;;  %v2563_v29 = vsel %vm146_vm10, 1.0, %v2196_v12 }
  0x7c   :  { %v65_v10 = vpop.permute.xlu1 %64  ;;  %v107_v11 = vpop.permute.xlu0 %106 }
  0x7d   :  { %vm81_vm2 = vcmp.eq.s32.totalorder %v2495_v8, %v65_v10  ;;  %vm135_vm3 = vcmp.eq.s32.totalorder %v2495_v8, %v107_v11  ;;  %v2797_v10 = vld [vmem:[%s4273_s5 + $0xf0] sm:$0xff]  ;;  %v2802_v11 = vld [vmem:[%s4273_s5 + $0x88] sm:$0xff] }
  0x7e   :  { %vm151_vm6 = vmor %vm81_vm2, %vm141_vm1  ;;  %vm142_vm1 = vcmp.eq.s32.totalorder %v2495_v8, %v128_v24  ;;  %4388 = vst [vmem:[#allocation3_spill] sm:$0xff] %v2802_v11  ;;  %v2879_v24 = vld [vmem:[%s4273_s5 + $0x98] sm:$0xff] }
  0x7f   :  { %v2506_v13 = vsel %vm151_vm6, 1.0, %v2196_v12  ;;  %vm145_vm7 = vmor %vm75_vm5, %vm135_vm3  ;;  %v71_v32 = vpop.permute.xlu2 %70  ;;  %4395 = vst [vmem:[#allocation10_spill] sm:$0xff] %v2879_v24 }
  0x80   :  { %v2513_v15 = vsel %vm145_vm7, 1.0, %v2196_v12  ;;  %1932 = vmatmul.msk.f32.vlgmr.msra.gmra.mxu3 %vm203_vm4, %v2506_v13 }
  0x81   :  { %1926 = vmatmul.msk.f32.vlgmr.msra.gmra.mxu1 %vm203_vm4, %v2513_v15  ;;  %609 = vmatpush.msra.mxu3 %v2612_v33 }
  0x82   :  { %569 = vmatpush.msra.mxu1 %v2525_v17 }
  0x83   :  { %610 = vmatpush.msra.mxu3 %v2629_v55 }
  0x84   :  { %v116_v21 = vpop.permute.xlu1 %115  ;;  %v56_v22 = vpop.permute.xlu0 %55  ;;  %570 = vmatpush.msra.mxu1 %v2554_v26 }
  0x85   :  { %vm138_vm11 = vcmp.eq.s32.totalorder %v2495_v8, %v116_v21  ;;  %vm78_vm12 = vcmp.eq.s32.totalorder %v2495_v8, %v56_v22  ;;  %611 = vmatpush.msra.mxu3 %v2658_v37  ;;  %v2863_v21 = vld [vmem:[%s4273_s5 + $0x28] sm:$0xff]  ;;  %v2868_v22 = vld [vmem:[%s4273_s5 + $0x90] sm:$0xff] }
  0x86   :  { %vm148_vm13 = vmor %vm78_vm12, %vm138_vm11  ;;  %571 = vmatpush.msra.mxu1 %v2573_v30  ;;  %vm83_vm11 = vcmp.eq.s32.totalorder %v2495_v8, %v71_v32  ;;  %4392 = vst [vmem:[#allocation7_spill] sm:$0xff] %v2863_v21  ;;  %v3030_v32 = vld [vmem:[%s4276_s4] sm:$0xf] }
  0x87   :  { %v2549_v25 = vsel %vm148_vm13, 1.0, %v2196_v12  ;;  %v122_v59 = vpop.permute.xlu2 %121  ;;  %612 = vmatpush.msra.mxu3 %v2676_v62  ;;  %4393 = vst [vmem:[#allocation8_spill] sm:$0xff] %v2868_v22 }
  0x88   :  { %1929 = vmatmul.msk.f32.vlgmr.msra.gmra.mxu2 %vm203_vm4, %v2549_v25  ;;  %572 = vmatpush.msra.mxu1 %v2587_v41  ;;  %vm140_vm8 = vcmp.eq.s32.totalorder %v2495_v8, %v122_v59 }
  0x89   :  { %1927 = vmatmul.msk.f32.gmra.mxu1 %vm203_vm4, %v2563_v29  ;;  %589 = vmatpush.msra.mxu2 %v2581_v39 }
  0x8a   :  { %573 = vmatpush.msra.mxu1 %v2622_v34  ;;  %613 = vmatpush.msra.mxu3 %v2714_v1 }
  0x8b   :  { %590 = vmatpush.msra.mxu2 %v2617_v51 }
  0x8c   :  { %v113_v43 = vpop.permute.xlu1 %112  ;;  %v68_v45 = vpop.permute.xlu0 %67  ;;  %574 = vmatpush.msra.mxu1 %v2653_v36  ;;  %614 = vmatpush.msra.mxu3 %v2747_v48 }
  0x8d   :  { %vm137_vm15 = vcmp.eq.s32.totalorder %v2495_v8, %v113_v43  ;;  %vm82_vm0 = vcmp.eq.s32.totalorder %v2495_v8, %v68_v45  ;;  %591 = vmatpush.msra.mxu2 %v2648_v35  ;;  %v2932_v43 = vld [vmem:[%s4273_s5 + $0x38] sm:$0xff]  ;;  %v2939_v45 = vld [vmem:[%s4273_s5 + $0x10] sm:$0xff] }
  0x8e   :  { %vm147_vm2 = vmor %vm77_vm14, %vm137_vm15  ;;  %575 = vmatpush.msra.mxu1 %v2671_v61  ;;  %615 = vmatpush.msra.mxu3 %v2764_v7  ;;  %4401 = vst [vmem:[#allocation16_spill] sm:$0xff] %v2932_v43 }
  0x8f   :  { %v2599_v47 = vsel %vm147_vm2, 1.0, %v2196_v12  ;;  %vm152_vm3 = vmor %vm82_vm0, %vm142_vm1  ;;  %592 = vmatpush.msra.mxu2 %v2666_v60  ;;  %4402 = vst [vmem:[#allocation17_spill] sm:$0xff] %v2939_v45 }
  0x90   :  { %v2603_v49 = vsel %vm152_vm3, 1.0, %v2196_v12  ;;  %576 = vmatpush.msra.mxu1 %v2709_v44  ;;  %616 = vmatpush.msra.mxu3 %v2790_v53 }
  0x91   :  { %1928 = vmatmul.msk.f32.gmra.mxu1 %vm203_vm4, %v2599_v47  ;;  %1933 = vmatmul.msk.f32.gmra.mxu3 %vm203_vm4, %v2603_v49 }
  0x92   :  { %593 = vmatpush.msra.mxu2 %v2704_v42  ;;  %577 = vmatpush.msra.mxu1 %v2742_v46 }
  0x94   :  { %v119_v56 = vpop.permute.xlu1 %118  ;;  %v59_v57 = vpop.permute.xlu0 %58  ;;  %594 = vmatpush.msra.mxu2 %v2721_v2  ;;  %578 = vmatpush.msra.mxu1 %v2759_v6 }
  0x95   :  { %vm139_vm5 = vcmp.eq.s32.totalorder %v2495_v8, %v119_v56  ;;  %vm79_vm6 = vcmp.eq.s32.totalorder %v2495_v8, %v59_v57 }
  0x96   :  { %vm149_vm7 = vmor %vm79_vm6, %vm139_vm5  ;;  %595 = vmatpush.msra.mxu2 %v2752_v50  ;;  %579 = vmatpush.msra.mxu1 %v2785_v52 }
  0x97   :  { %v2638_v58 = vsel %vm149_vm7, 1.0, %v2196_v12 }
  0x98   :  { %1930 = vmatmul.msk.f32.gmra.mxu2 %vm203_vm4, %v2638_v58  ;;  %580 = vmatpush.msra.mxu1 %v2802_v11 }
  0x99   :  { %1937 = vmatmul.msk.f32.vlgmr.msrb.gmra.mxu1 %vm203_vm4, %v2513_v15  ;;  %596 = vmatpush.msra.mxu2 %v2780_v9 }
  0x9b   :  { %597 = vmatpush.msra.mxu2 %v2797_v10 }
  0x9c   :  { %v62_v38 = vpop.permute.xlu1 %61  ;;  %v131_v63 = vpop.permute.xlu0 %130 }
  0x9d   :  { %vm80_vm9 = vcmp.eq.s32.totalorder %v2495_v8, %v62_v38  ;;  %vm143_vm10 = vcmp.eq.s32.totalorder %v2495_v8, %v131_v63  ;;  %598 = vmatpush.msra.mxu2 %v2821_v14 }
  0x9e   :  { %vm150_vm12 = vmor %vm80_vm9, %vm140_vm8  ;;  %vm540_vm8 = vcmp.ge.s32.totalorder %v2495_v8, 32  ;;  %vm541_vm9 = vcmp.lt.s32.totalorder %v2495_v8, 96 }
  0x9f   :  { %v2689_v40 = vsel %vm150_vm12, 1.0, %v2196_v12  ;;  %vm153_vm13 = vmor %vm83_vm11, %vm143_vm10  ;;  %599 = vmatpush.msra.mxu2 %v2846_v18 }
  0xa0   :  { %v2693_v0 = vsel %vm153_vm13, 1.0, %v2196_v12  ;;  %1931 = vmatmul.msk.f32.gmra.mxu2 %vm203_vm4, %v2689_v40  ;;  %vm542_vm11 = vmand %vm540_vm8, %vm541_vm9 }
  0xa1   :  { %1934 = vmatmul.msk.f32.gmra.mxu3 %vm203_vm4, %v2693_v0  ;;  %1938 = vmatmul.msk.f32.gmra.mxu1 %vm203_vm4, %v2563_v29 }
  0xa2   :  { %600 = vmatpush.msra.mxu2 %v2868_v22 }
  0xa4   :  { %v134_v3 = vpop.permute.xlu1 %133  ;;  %v74_v4 = vpop.permute.xlu0 %73  ;;  %601 = vmatpush.msra.mxu2 %v2895_v27 }
  0xa5   :  { %vm144_vm14 = vcmp.eq.s32.totalorder %v2495_v8, %v134_v3  ;;  %vm84_vm15 = vcmp.eq.s32.totalorder %v2495_v8, %v74_v4 }
  0xa6   :  { %vm154_vm0 = vmor %vm84_vm15, %vm144_vm14 }
  0xa7   :  { %v2730_v5 = vsel %vm154_vm0, 1.0, %v2196_v12  ;;  %v2816_v12 = vld [vmem:[%s4273_s5 + $0xf8] sm:$0xff] }
  0xa8   :  { %1948 = vmatmul.msk.f32.vlgmr.msrb.gmra.mxu2 %vm203_vm4, %v2513_v15  ;;  %617 = vmatpush.msra.mxu3 %v2816_v12 }
  0xa9   :  { %1935 = vmatmul.msk.f32.gmra.mxu3 %vm203_vm4, %v2730_v5  ;;  %1939 = vmatmul.msk.f32.gmra.mxu1 %vm203_vm4, %v2599_v47 }
  0xaa   :  { %618 = vmatpush.msra.mxu3 %v2833_v16 }
  0xac   :  { %619 = vmatpush.msra.mxu3 %v2856_v20 }
  0xae   :  { %620 = vmatpush.msra.mxu3 %v2879_v24 }
  0xb0   :  { %1949 = vmatmul.msk.f32.gmra.mxu2 %vm203_vm4, %v2563_v29  ;;  %621 = vmatpush.msra.mxu3 %v2900_v28 }
  0xb1   :  { %1940 = vmatmul.msk.f32.gmra.mxu1 %vm203_vm4, %v2549_v25  ;;  %1959 = vmatmul.msk.f32.vlgmr.msrb.gmra.mxu3 %vm203_vm4, %v2513_v15  ;;  %v2826_v15 = vld [vmem:[%s4273_s5 + $0x68] sm:$0xff] }
  0xb2   :  { %4389 = vst [vmem:[#allocation4_spill] sm:$0xff] %v2826_v15  ;;  %581 = vmatpush.msra.mxu1 %v2826_v15 }
  0xb4   :  { %582 = vmatpush.msra.mxu1 %v2851_v19 }
  0xb6   :  { %583 = vmatpush.msra.mxu1 %v2863_v21 }
  0xb8   :  { %1950 = vmatmul.msk.f32.gmra.mxu2 %vm203_vm4, %v2599_v47  ;;  %584 = vmatpush.msra.mxu1 %v2874_v23 }
  0xb9   :  { %1941 = vmatmul.msk.f32.gmra.mxu1 %vm203_vm4, %v2638_v58  ;;  %1960 = vmatmul.msk.f32.gmra.mxu3 %vm203_vm4, %v2563_v29  ;;  %v2905_v29 = vld [vmem:[%s4273_s5 + $0x50] sm:$0xff] }
  0xba   :  { %699 = vmatpush.msrb.mxu1 %v2525_v17  ;;  %4398 = vst [vmem:[#allocation13_spill] sm:$0xff] %v2905_v29  ;;  %602 = vmatpush.msra.mxu2 %v2905_v29 }
  0xbc   :  { %700 = vmatpush.msrb.mxu1 %v2554_v26  ;;  %603 = vmatpush.msra.mxu2 %v2927_v31 }
  0xbe   :  { %701 = vmatpush.msrb.mxu1 %v2573_v30  ;;  %604 = vmatpush.msra.mxu2 %v2939_v45 }
  0xc0   :  { %1951 = vmatmul.msk.f32.gmra.mxu2 %vm203_vm4, %v2549_v25  ;;  %702 = vmatpush.msrb.mxu1 %v2587_v41 }
  0xc1   :  { %1942 = vmatmul.msk.f32.gmra.mxu1 %vm203_vm4, %v2689_v40  ;;  %1961 = vmatmul.msk.f32.gmra.mxu3 %vm203_vm4, %v2599_v47  ;;  %v2957_v47 = vld [vmem:[%s4273_s5 + $0x18] sm:$0xff] }
  0xc2   :  { %703 = vmatpush.msrb.mxu1 %v2622_v34  ;;  %719 = vmatpush.msrb.mxu2 %v2581_v39  ;;  %4403 = vst [vmem:[#allocation18_spill] sm:$0xff] %v2957_v47 }
  0xc4   :  { %704 = vmatpush.msrb.mxu1 %v2653_v36  ;;  %720 = vmatpush.msrb.mxu2 %v2617_v51 }
  0xc6   :  { %705 = vmatpush.msrb.mxu1 %v2671_v61  ;;  %721 = vmatpush.msrb.mxu2 %v2648_v35 }
  0xc8   :  { %1952 = vmatmul.msk.f32.gmra.mxu2 %vm203_vm4, %v2638_v58  ;;  %706 = vmatpush.msrb.mxu1 %v2709_v44 }
  0xc9   :  { %1943 = vmatmul.msk.f32.gmra.mxu1 %vm203_vm4, %v2506_v13  ;;  %1962 = vmatmul.msk.f32.gmra.mxu3 %vm203_vm4, %v2549_v25  ;;  %v2922_v25 = vld [vmem:[%s4273_s5 + $0x58] sm:$0xff] }
  0xca   :  { %4399 = vst [vmem:[#allocation14_spill] sm:$0xff] %v2922_v25  ;;  %622 = vmatpush.msra.mxu3 %v2922_v25  ;;  %722 = vmatpush.msrb.mxu2 %v2666_v60 }
  0xcb   :  { %707 = vmatpush.msrb.mxu1 %v2742_v46 }
  0xcc   :  { %623 = vmatpush.msra.mxu3 %v2932_v43  ;;  %723 = vmatpush.msrb.mxu2 %v2704_v42 }
  0xcd   :  { %708 = vmatpush.msrb.mxu1 %v2759_v6 }
  0xce   :  { %624 = vmatpush.msra.mxu3 %v2957_v47  ;;  %724 = vmatpush.msrb.mxu2 %v2721_v2 }
  0xcf   :  { %709 = vmatpush.msrb.mxu1 %v2785_v52 }
  0xd0   :  { %1953 = vmatmul.msk.f32.gmra.mxu2 %vm203_vm4, %v2689_v40  ;;  %739 = vmatpush.msrb.mxu3 %v2612_v33 }
  0xd1   :  { %1944 = vmatmul.msk.f32.gmra.mxu1 %vm203_vm4, %v2603_v49  ;;  %1963 = vmatmul.msk.f32.gmra.mxu3 %vm203_vm4, %v2638_v58 }
  0xd2   :  { %740 = vmatpush.msrb.mxu3 %v2629_v55  ;;  %725 = vmatpush.msrb.mxu2 %v2752_v50 }
  0xd3   :  { %710 = vmatpush.msrb.mxu1 %v2802_v11 }
  0xd4   :  { %741 = vmatpush.msrb.mxu3 %v2658_v37  ;;  %726 = vmatpush.msrb.mxu2 %v2780_v9 }
  0xd5   :  { %711 = vmatpush.msrb.mxu1 %v2826_v15 }
  0xd6   :  { %742 = vmatpush.msrb.mxu3 %v2676_v62  ;;  %727 = vmatpush.msrb.mxu2 %v2797_v10 }
  0xd7   :  { %712 = vmatpush.msrb.mxu1 %v2851_v19 }
  0xd8   :  { %1954 = vmatmul.msk.f32.gmra.mxu2 %vm203_vm4, %v2506_v13  ;;  %743 = vmatpush.msrb.mxu3 %v2714_v1 }
  0xd9   :  { %1945 = vmatmul.msk.f32.gmra.mxu1 %vm203_vm4, %v2693_v0  ;;  %1964 = vmatmul.msk.f32.gmra.mxu3 %vm203_vm4, %v2689_v40 }
  0xda   :  { %744 = vmatpush.msrb.mxu3 %v2747_v48  ;;  %728 = vmatpush.msrb.mxu2 %v2821_v14 }
  0xdb   :  { %713 = vmatpush.msrb.mxu1 %v2863_v21 }
  0xdc   :  { %745 = vmatpush.msrb.mxu3 %v2764_v7  ;;  %729 = vmatpush.msrb.mxu2 %v2846_v18 }
  0xdd   :  { %714 = vmatpush.msrb.mxu1 %v2874_v23 }
  0xde   :  { %746 = vmatpush.msrb.mxu3 %v2790_v53  ;;  %730 = vmatpush.msrb.mxu2 %v2868_v22 }
  0xe0   :  { %1955 = vmatmul.msk.f32.gmra.mxu2 %vm203_vm4, %v2603_v49  ;;  %747 = vmatpush.msrb.mxu3 %v2816_v12 }
  0xe1   :  { %1946 = vmatmul.msk.f32.gmra.mxu1 %vm203_vm4, %v2730_v5  ;;  %1965 = vmatmul.msk.f32.gmra.mxu3 %vm203_vm4, %v2506_v13 }
  0xe2   :  { %748 = vmatpush.msrb.mxu3 %v2833_v16  ;;  %731 = vmatpush.msrb.mxu2 %v2895_v27 }
  0xe4   :  { %749 = vmatpush.msrb.mxu3 %v2856_v20  ;;  %732 = vmatpush.msrb.mxu2 %v2905_v29 }
  0xe6   :  { %750 = vmatpush.msrb.mxu3 %v2879_v24  ;;  %733 = vmatpush.msrb.mxu2 %v2927_v31 }
  0xe8   :  { %1956 = vmatmul.msk.f32.gmra.mxu2 %vm203_vm4, %v2693_v0  ;;  %751 = vmatpush.msrb.mxu3 %v2900_v28 }
  0xe9   :  { %1966 = vmatmul.msk.f32.gmra.mxu3 %vm203_vm4, %v2603_v49  ;;  %585 = vmatmul.f32.vlgmr.msra.gmra.mxu1 %v2439_v54  ;;  %v3037_v49 = vperm.slane %v3030_v32, 0 }
  0xea   :  { %829 = vmatpush.msra.mxu1 %v2525_v17  ;;  %752 = vmatpush.msrb.mxu3 %v2922_v25 }
  0xeb   :  { %734 = vmatpush.msrb.mxu2 %v2939_v45 }
  0xec   :  { %830 = vmatpush.msra.mxu1 %v2554_v26  ;;  %753 = vmatpush.msrb.mxu3 %v2932_v43 }
  0xee   :  { %831 = vmatpush.msra.mxu1 %v2573_v30  ;;  %754 = vmatpush.msrb.mxu3 %v2957_v47 }
  0xf0   :  { %1957 = vmatmul.msk.f32.gmra.mxu2 %vm203_vm4, %v2730_v5  ;;  %832 = vmatpush.msra.mxu1 %v2587_v41 }
  0xf1   :  { %1967 = vmatmul.msk.f32.gmra.mxu3 %vm203_vm4, %v2693_v0 }
  0xf2   :  { %833 = vmatpush.msra.mxu1 %v2622_v34 }
  0xf4   :  { %834 = vmatpush.msra.mxu1 %v2653_v36 }
  0xf6   :  { %835 = vmatpush.msra.mxu1 %v2671_v61 }
  0xf8   :  { %605 = vmatmul.f32.vlgmr.msra.gmra.mxu2 %v2439_v54  ;;  %836 = vmatpush.msra.mxu1 %v2709_v44 }
  0xf9   :  { %1968 = vmatmul.msk.f32.gmra.mxu3 %vm203_vm4, %v2730_v5  ;;  %849 = vmatpush.msra.mxu2 %v2581_v39 }
  0xfa   :  { %837 = vmatpush.msra.mxu1 %v2742_v46 }
  0xfb   :  { %850 = vmatpush.msra.mxu2 %v2617_v51 }
  0xfc   :  { %838 = vmatpush.msra.mxu1 %v2759_v6 }
  0xfd   :  { %851 = vmatpush.msra.mxu2 %v2648_v35 }
  0xfe   :  { %v3024_v13 = vpop.f32.mrf.mxu1  ;;  %839 = vmatpush.msra.mxu1 %v2785_v52 }
  0xff   :  { %852 = vmatpush.msra.mxu2 %v2666_v60 }
 0x100   :  { %840 = vmatpush.msra.mxu1 %v2802_v11 }
 0x101   :  { %625 = vmatmul.f32.vlgmr.msra.gmra.mxu3 %v2439_v54  ;;  %853 = vmatpush.msra.mxu2 %v2704_v42 }
 0x102   :  { %869 = vmatpush.msra.mxu3 %v2612_v33  ;;  %841 = vmatpush.msra.mxu1 %v2826_v15 }
 0x103   :  { %v282_v56 = vpop.f32.mrf.mxu3  ;;  %854 = vmatpush.msra.mxu2 %v2721_v2 }
 0x104   :  { %v3043_v57 = vadd.f32 %v282_v56, %v3037_v49  ;;  %870 = vmatpush.msra.mxu3 %v2629_v55  ;;  %842 = vmatpush.msra.mxu1 %v2851_v19 }
 0x105   :  { %855 = vmatpush.msra.mxu2 %v2752_v50 }
 0x106   :  { %4404 = vst [vmem:[#allocation19_spill] sm:$0xff] %v3043_v57  ;;  %v267_v58 = vpop.f32.mrf.mxu1  ;;  %871 = vmatpush.msra.mxu3 %v2658_v37  ;;  %843 = vmatpush.msra.mxu1 %v2863_v21 }
 0x107   :  { %v3051_v59 = vadd.f32 %v267_v58, %v3037_v49  ;;  %856 = vmatpush.msra.mxu2 %v2780_v9 }
 0x108   :  { %872 = vmatpush.msra.mxu3 %v2676_v62  ;;  %844 = vmatpush.msra.mxu1 %v2874_v23 }
 0x109   :  { %4405 = vst [vmem:[#allocation20_spill] sm:$0xff] %v3051_v59  ;;  %857 = vmatpush.msra.mxu2 %v2797_v10 }
 0x10a   :  { %873 = vmatpush.msra.mxu3 %v2714_v1 }
 0x10b   :  { %v273_v38 = vpop.f32.mrf.mxu2  ;;  %858 = vmatpush.msra.mxu2 %v2821_v14 }
 0x10c   :  { %v3061_v63 = vadd.f32 %v273_v38, %v3037_v49  ;;  %874 = vmatpush.msra.mxu3 %v2747_v48 }
 0x10d   :  { %859 = vmatpush.msra.mxu2 %v2846_v18 }
 0x10e   :  { %4406 = vst [vmem:[#allocation21_spill] sm:$0xff] %v3061_v63  ;;  %v270_v40 = vpop.f32.mrf.mxu1  ;;  %875 = vmatpush.msra.mxu3 %v2764_v7 }
 0x10f   :  { %v3069_v0 = vadd.f32 %v270_v40, %v3037_v49  ;;  %860 = vmatpush.msra.mxu2 %v2868_v22 }
 0x110   :  { %876 = vmatpush.msra.mxu3 %v2790_v53 }
 0x111   :  { %4407 = vst [vmem:[#allocation22_spill] sm:$0xff] %v3069_v0  ;;  %861 = vmatpush.msra.mxu2 %v2895_v27 }
 0x112   :  { %877 = vmatpush.msra.mxu3 %v2816_v12 }
 0x113   :  { %862 = vmatpush.msra.mxu2 %v2905_v29 }
 0x114   :  { %v285_v3 = vpop.f32.mrf.mxu3  ;;  %878 = vmatpush.msra.mxu3 %v2833_v16 }
 0x115   :  { %v3081_v4 = vadd.f32 %v285_v3, %v3037_v49  ;;  %863 = vmatpush.msra.mxu2 %v2927_v31 }
 0x116   :  { %v311_v5 = vpop.f32.mrf.mxu1  ;;  %879 = vmatpush.msra.mxu3 %v2856_v20 }
 0x117   :  { %4408 = vst [vmem:[#allocation23_spill] sm:$0xff] %v3081_v4  ;;  %864 = vmatpush.msra.mxu2 %v2939_v45 }
 0x118   :  { %880 = vmatpush.msra.mxu3 %v2879_v24 }
 0x11a   :  { %881 = vmatpush.msra.mxu3 %v2900_v28 }
 0x11b   :  { %v276_v56 = vpop.f32.mrf.mxu2 }
 0x11c   :  { %v3089_v58 = vadd.f32 %v276_v56, %v3037_v49  ;;  %882 = vmatpush.msra.mxu3 %v2922_v25 }
 0x11e   :  { %4409 = vst [vmem:[#allocation24_spill] sm:$0xff] %v3089_v58  ;;  %v3092_v38 = vpop.f32.mrf.mxu1  ;;  %883 = vmatpush.msra.mxu3 %v2932_v43 }
 0x11f   :  { %4410 = vst [vmem:[#allocation25_spill] sm:$0xff] %v3092_v38 }
 0x120   :  { %884 = vmatpush.msra.mxu3 %v2957_v47 }
 0x123   :  { %v279_v40 = vpop.f32.mrf.mxu2 }
 0x124   :  { %v3097_v3 = vadd.f32 %v279_v40, %v3037_v49  ;;  %v288_v4 = vpop.f32.mrf.mxu3 }
 0x125   :  { %v3100_v57 = vadd.f32 %v288_v4, %v3037_v49 }
 0x126   :  { %4411 = vst [vmem:[#allocation26_spill] sm:$0xff] %v3097_v3  ;;  %v3102_v63 = vpop.f32.mrf.mxu1 }
 0x127   :  { %4412 = vst [vmem:[#allocation27_spill] sm:$0xff] %v3100_v57 }
 0x128   :  { %4413 = vst [vmem:[#allocation28_spill] sm:$0xff] %v3102_v63 }
 0x12b   :  { %v358_v56 = vpop.f32.mrf.mxu2 }
 0x12c   :  { %v291_v58 = vpop.f32.mrf.mxu3 }
 0x12d   :  { %v3105_v0 = vadd.f32 %v291_v58, %v3037_v49 }
 0x12e   :  { %v3107_v59 = vpop.f32.mrf.mxu1 }
 0x12f   :  { %4414 = vst [vmem:[#allocation29_spill] sm:$0xff] %v3105_v0  ;;  %v265_v0 = vadd.f32 %v3024_v13, %v3037_v49 }
 0x130   :  { %4415 = vst [vmem:[#allocation30_spill] sm:$0xff] %v3107_v59  ;;  %v566_v59 = vpop.f32.mrf.mxu0 }
 0x131   :  { %v567_v23 = vadd.f32 %v566_v59, %v265_v0  ;;  %v3148_v59 = vperm.slane %v3030_v32, 1 }
 0x133   :  { %v3109_v38 = vpop.f32.mrf.mxu2  ;;  %4433 = vst [vmem:[#allocation48_spill] sm:$0xff] %v3148_v59 }
 0x134   :  { %4416 = vst [vmem:[#allocation31_spill] sm:$0xff] %v3109_v38  ;;  %v3111_v47 = vpop.f32.mrf.mxu3 }
 0x136   :  { %v3113_v45 = vpop.f32.mrf.mxu1 }
 0x137   :  { %4417 = vst [vmem:[#allocation32_spill] sm:$0xff] %v3113_v45 }
 0x13b   :  { %v3115_v40 = vpop.f32.mrf.mxu2 }
 0x13c   :  { %4418 = vst [vmem:[#allocation33_spill] sm:$0xff] %v3115_v40  ;;  %v3117_v3 = vpop.f32.mrf.mxu3 }
 0x13d   :  { %4419 = vst [vmem:[#allocation34_spill] sm:$0xff] %v3117_v3  ;;  %v1969_v3 = vmul.f32 -1.442695, %v567_v23 }
 0x13e   :  { %v3119_v4 = vpop.f32.mrf.mxu1 }
 0x13f   :  { %4420 = vst [vmem:[#allocation35_spill] sm:$0xff] %v3119_v4  ;;  %2009 = vpow2.f32 %v1969_v3  ;;  %v312_v3 = vadd.f32 %v311_v5, %v3148_v59  ;;  %v3164_v5 = vperm.slane %v3030_v32, 2 }
 0x141   :  { %4440 = vst [vmem:[#allocation55_spill] sm:$0xff] %v3164_v5 }
 0x143   :  { %v3121_v57 = vpop.f32.mrf.mxu2 }
 0x144   :  { %4421 = vst [vmem:[#allocation36_spill] sm:$0xff] %v3121_v57  ;;  %v3123_v63 = vpop.f32.mrf.mxu3 }
 0x145   :  { %4422 = vst [vmem:[#allocation37_spill] sm:$0xff] %v3123_v63 }
 0x146   :  { %v3125_v58 = vpop.f32.mrf.mxu1 }
 0x147   :  { %4423 = vst [vmem:[#allocation38_spill] sm:$0xff] %v3125_v58  ;;  %v2010_v58 = vpop.eup %2009 }
 0x148   :  { %v632_v49 = vadd.f32 1.0, %v2010_v58 }
 0x14a   :  { %2011 = vrcp.f32 %v632_v49  ;;  %vm638_vm1 = vweird.f32 %v632_v49 }
 0x14b   :  { %v3129_v38 = vpop.f32.mrf.mxu2 }
 0x14c   :  { %4424 = vst [vmem:[#allocation39_spill] sm:$0xff] %v3129_v38  ;;  %v3131_v45 = vpop.f32.mrf.mxu3 }
 0x14d   :  { %4425 = vst [vmem:[#allocation40_spill] sm:$0xff] %v3131_v45 }
 0x14e   :  { %v3133_v40 = vpop.f32.mrf.mxu1 }
 0x14f   :  { %4426 = vst [vmem:[#allocation41_spill] sm:$0xff] %v3133_v40 }
 0x153   :  { %v3135_v43 = vpop.f32.mrf.mxu2 }
 0x154   :  { %4427 = vst [vmem:[#allocation42_spill] sm:$0xff] %v3135_v43  ;;  %v3137_v4 = vpop.f32.mrf.mxu3 }
 0x155   :  { %4428 = vst [vmem:[#allocation43_spill] sm:$0xff] %v3137_v4 }
 0x156   :  { %v3139_v57 = vpop.f32.mrf.mxu1 }
 0x157   :  { %4429 = vst [vmem:[#allocation44_spill] sm:$0xff] %v3139_v57  ;;  %v2012_v57 = vpop.eup %2011 }
 0x158   :  { %vm639_vm4 = vweird.f32 %v2012_v57 }
 0x159   :  { %vm640_vm2 = vmor %vm638_vm1, %vm639_vm4 }
 0x15b   :  { %v3141_v63 = vpop.f32.mrf.mxu2 }
 0x15c   :  { %4430 = vst [vmem:[#allocation45_spill] sm:$0xff] %v3141_v63  ;;  %v3143_v13 = vpop.f32.mrf.mxu3  ;;  %v634_v63 = vmul.f32 %v2012_v57, %v632_v49 }
 0x15d   :  { %4431 = vst [vmem:[#allocation46_spill] sm:$0xff] %v3143_v13 }
 0x15e   :  { %v3145_v38 = vpop.f32.mrf.mxu1 }
 0x15f   :  { %4432 = vst [vmem:[#allocation47_spill] sm:$0xff] %v3145_v38  ;;  %v635_v38 = vsub.f32 1.0, %v634_v63  ;;  %v359_v63 = vadd.f32 %v358_v56, %v3164_v5 }
 0x161   :  { %v636_v21 = vmul.f32 %v2012_v57, %v635_v38 }
 0x163   :  { %v3150_v23 = vpop.f32.mrf.mxu2 }
 0x164   :  { %4434 = vst [vmem:[#allocation49_spill] sm:$0xff] %v3150_v23  ;;  %v3152_v0 = vpop.f32.mrf.mxu3 }
 0x165   :  { %4435 = vst [vmem:[#allocation50_spill] sm:$0xff] %v3152_v0 }
 0x166   :  { %v586_v40 = vpop.f32.mrf.mxu1 }
 0x167   :  { %v587_v43 = vadd.f32 %v586_v40, %v312_v3  ;;  %v637_v40 = vadd.f32 %v2012_v57, %v636_v21  ;;  %v3170_v21 = vperm.slane %v3030_v32, 3 }
 0x169   :  { %v1970_v4 = vmul.f32 -1.442695, %v587_v43  ;;  %v644_v43 = vand.u32 2147483648, %v632_v49  ;;  %4442 = vst [vmem:[#allocation57_spill] sm:$0xff] %v3170_v21 }
 0x16b   :  { %2013 = vpow2.f32 %v1970_v4  ;;  %v3155_v13 = vpop.f32.mrf.mxu2  ;;  %v642_v4 = vand.u32 2147483647, %v632_v49 }
 0x16c   :  { %4436 = vst [vmem:[#allocation51_spill] sm:$0xff] %v3155_v13  ;;  %v3157_v58 = vpop.f32.mrf.mxu3  ;;  %v641_v13 = vsel %vm640_vm2, %v2012_v57, %v637_v40  ;;  %v406_v57 = vadd.f32 %v3111_v47, %v3170_v21  ;;  %vm543_vm2 = vcmp.ge.s32.totalorder %v2495_v8, 64  ;;  %v3350_v8 = vld [vmem:[%s4273_s5 + $0x1e8] sm:$0xff] }
 0x16d   :  { %4437 = vst [vmem:[#allocation52_spill] sm:$0xff] %v3157_v58  ;;  %v645_v58 = vor.u32 1.1754944e-38, %v644_v43  ;;  %vm643_vm3 = vcmp.eq.f32.partialorder %v642_v4, 8.507059e+37 }
 0x16f   :  { %v646_v59 = vsel %vm643_vm3, %v645_v58, %v641_v13 }
 0x171   :  { %v2014_v45 = vpop.eup %2013 }
 0x172   :  { %v651_v31 = vadd.f32 1.0, %v2014_v45 }
 0x173   :  { %v3159_v25 = vpop.f32.mrf.mxu2 }
 0x174   :  { %4438 = vst [vmem:[#allocation53_spill] sm:$0xff] %v3159_v25  ;;  %2015 = vrcp.f32 %v651_v31  ;;  %v3161_v23 = vpop.f32.mrf.mxu3  ;;  %v663_v28 = vand.u32 2147483648, %v651_v31  ;;  %vm657_vm6 = vweird.f32 %v651_v31  ;;  %v661_v56 = vand.u32 2147483647, %v651_v31 }
 0x175   :  { %4439 = vst [vmem:[#allocation54_spill] sm:$0xff] %v3161_v23 }
 0x176   :  { %vm662_vm10 = vcmp.eq.f32.partialorder %v661_v56, 8.507059e+37  ;;  %v4448_v56 = vld [vmem:[#allocation5_spill] sm:$0xff] }
 0x17a   :  { %v2016_v3 = vpop.eup %2015 }
 0x17b   :  { %v653_v45 = vmul.f32 %v2016_v3, %v651_v31  ;;  %v606_v38 = vpop.f32.mrf.mxu2  ;;  %vm658_vm5 = vweird.f32 %v2016_v3 }
 0x17c   :  { %v3167_v25 = vpop.f32.mrf.mxu3  ;;  %v607_v0 = vadd.f32 %v606_v38, %v359_v63  ;;  %vm659_vm7 = vmor %vm657_vm6, %vm658_vm5  ;;  %v3278_v63 = vld [vmem:[%s4273_s5 + $0xa0] sm:$0xff] }
 0x17d   :  { %4441 = vst [vmem:[#allocation56_spill] sm:$0xff] %v3167_v25  ;;  %v654_v23 = vsub.f32 1.0, %v653_v45  ;;  %v3287_v45 = vld [vmem:[%s4273_s5 + $0x80] sm:$0xff]  ;;  %v4460_v25 = vld [vmem:[#allocation25_spill] sm:$0xff]  ;;  %vm544_vm5 = vmand %vm543_vm2, %vm541_vm9 }
 0x17e   :  { %v668_v29 = vmul.f32 %v646_v59, %v607_v0  ;;  %v664_v0 = vor.u32 1.1754944e-38, %v663_v28  ;;  %v3188_v28 = vld [vmem:[%s4273_s5 + $0x1e0] sm:$0xff]  ;;  %4443 = vst [vmem:[#allocation58_spill] sm:$0xff] %v3278_v63 }
 0x17f   :  { %v655_v19 = vmul.f32 %v2016_v3, %v654_v23  ;;  %4444 = vst [vmem:[#allocation59_spill] sm:$0xff] %v3287_v45  ;;  %v3296_v38 = vld [vmem:[%s4273_s5 + $0x60] sm:$0xff] }
 0x180   :  { %4445 = vst [vmem:[#allocation60_spill] sm:$0xff] %v3296_v38 }
 0x181   :  { %v656_v49 = vadd.f32 %v2016_v3, %v655_v19 }
 0x183   :  { %v660_v59 = vsel %vm659_vm7, %v2016_v3, %v656_v49  ;;  %v3269_v3 = vld [vmem:[%s4273_s5 + $0xc0] sm:$0xff]  ;;  %v4446_v49 = vld [vmem:[#allocation12_spill] sm:$0xff] }
 0x184   :  { %v626_v40 = vpop.f32.mrf.mxu3  ;;  %v665_v19 = vsel %vm662_vm10, %v664_v0, %v660_v59  ;;  %v3314_v59 = vld [vmem:[%s4273_s5 + $0x20] sm:$0xff] }
 0x185   :  { %v627_v13 = vadd.f32 %v626_v40, %v406_v57  ;;  %v667_v23 = vsel %vm542_vm11, 1.0, %v665_v19  ;;  %v3305_v57 = vld [vmem:[%s4273_s5 + $0x40] sm:$0xff]  ;;  %v4449_v40 = vld [vmem:[#allocation13_spill] sm:$0xff]  ;;  %4451 = vst [vmem:[#allocation62_spill] sm:$0xff] %v3314_v59  ;;  %v4454_v19 = vld [vmem:[#allocation16_spill] sm:$0xff] }
 0x186   :  { %v671_v47 = vsub.f32 1.0, %v667_v23  ;;  %v673_v43 = vmul.f32 %v667_v23, %v2439_v54  ;;  %v3197_v54 = vld [vmem:[%s4273_s5 + $0x1c0] sm:$0xff]  ;;  %4447 = vst [vmem:[#allocation61_spill] sm:$0xff] %v3305_v57 }
 0x187   :  { %v669_v32 = vadd.f32 %v668_v29, %v627_v13  ;;  %v3260_v29 = vld [vmem:[%s4273_s5 + $0xe0] sm:$0xff]  ;;  %v4450_v13 = vld [vmem:[#allocation14_spill] sm:$0xff] }
 0x188   :  { %v4452_v0 = vld [vmem:[#allocation7_spill] sm:$0xff] }
 0x189   :  { %2017 = vtanh.f32 %v669_v32  ;;  %v4453_v32 = vld [vmem:[#allocation15_spill] sm:$0xff] }
 0x18a   :  { %v3323_v23 = vld [vmem:[%s4273_s5] sm:$0xff] }
 0x18b   :  { %4455 = vst [vmem:[#allocation63_spill] sm:$0xff] %v3323_v23 }
 0x18f   :  { %v2018_v58 = vpop.eup %2017 }
 0x190   :  { %v672_v31 = vmul.f32 %v2018_v58, %v671_v47  ;;  %v4456_v47 = vld [vmem:[#allocation9_spill] sm:$0xff] }
 0x191   :  { %v4457_v58 = vld [vmem:[#allocation17_spill] sm:$0xff] }
 0x192   :  { %v3179_v4 = vadd.f32 %v673_v43, %v672_v31  ;;  %v4458_v31 = vld [vmem:[#allocation18_spill] sm:$0xff]  ;;  %v4459_v43 = vld [vmem:[#allocation48_spill] sm:$0xff] }
 0x194   :  { %695 = vmatmul.f32.vlgmr.msrb.gmra.mxu0 %v3179_v4  ;;  %715 = vmatmul.f32.vlgmr.msrb.gmra.mxu1 %v3179_v4 }
 0x195   :  { %735 = vmatmul.f32.vlgmr.msrb.gmra.mxu2 %v3179_v4  ;;  %755 = vmatmul.f32.vlgmr.msrb.gmra.mxu3 %v3179_v4 }
 0x196   :  { %938 = vmatpush.msrb.mxu0 %v3188_v28  ;;  %958 = vmatpush.msrb.mxu1 %v2525_v17  ;;  %v3206_v17 = vld [vmem:[%s4273_s5 + $0x1a0] sm:$0xff] }
 0x197   :  { %978 = vmatpush.msrb.mxu2 %v2581_v39  ;;  %998 = vmatpush.msrb.mxu3 %v2612_v33  ;;  %v3233_v39 = vld [vmem:[%s4273_s5 + $0x140] sm:$0xff] }
 0x198   :  { %939 = vmatpush.msrb.mxu0 %v3197_v54  ;;  %959 = vmatpush.msrb.mxu1 %v2554_v26  ;;  %v3215_v26 = vld [vmem:[%s4273_s5 + $0x180] sm:$0xff] }
 0x199   :  { %979 = vmatpush.msrb.mxu2 %v2617_v51  ;;  %999 = vmatpush.msrb.mxu3 %v2629_v55 }
 0x19a   :  { %940 = vmatpush.msrb.mxu0 %v3206_v17  ;;  %960 = vmatpush.msrb.mxu1 %v2573_v30  ;;  %v3224_v30 = vld [vmem:[%s4273_s5 + $0x160] sm:$0xff] }
 0x19b   :  { %980 = vmatpush.msrb.mxu2 %v2648_v35  ;;  %1000 = vmatpush.msrb.mxu3 %v2658_v37 }
 0x19c   :  { %941 = vmatpush.msrb.mxu0 %v3215_v26  ;;  %961 = vmatpush.msrb.mxu1 %v2587_v41  ;;  %v3242_v41 = vld [vmem:[%s4273_s5 + $0x120] sm:$0xff] }
 0x19d   :  { %981 = vmatpush.msrb.mxu2 %v2666_v60  ;;  %1001 = vmatpush.msrb.mxu3 %v2676_v62 }
 0x19e   :  { %942 = vmatpush.msrb.mxu0 %v3224_v30  ;;  %962 = vmatpush.msrb.mxu1 %v2622_v34  ;;  %v3251_v34 = vld [vmem:[%s4273_s5 + $0x100] sm:$0xff] }
 0x19f   :  { %982 = vmatpush.msrb.mxu2 %v2704_v42  ;;  %1002 = vmatpush.msrb.mxu3 %v2714_v1 }
 0x1a0   :  { %943 = vmatpush.msrb.mxu0 %v3233_v39  ;;  %963 = vmatpush.msrb.mxu1 %v2653_v36 }
 0x1a1   :  { %983 = vmatpush.msrb.mxu2 %v2721_v2  ;;  %1003 = vmatpush.msrb.mxu3 %v2747_v48 }
 0x1a2   :  { %944 = vmatpush.msrb.mxu0 %v3242_v41  ;;  %964 = vmatpush.msrb.mxu1 %v2671_v61 }
 0x1a3   :  { %984 = vmatpush.msrb.mxu2 %v2752_v50  ;;  %1004 = vmatpush.msrb.mxu3 %v2764_v7 }
 0x1a4   :  { %945 = vmatpush.msrb.mxu0 %v3251_v34  ;;  %965 = vmatpush.msrb.mxu1 %v2709_v44 }
 0x1a5   :  { %985 = vmatpush.msrb.mxu2 %v2780_v9  ;;  %1005 = vmatpush.msrb.mxu3 %v2790_v53 }
 0x1a6   :  { %946 = vmatpush.msrb.mxu0 %v3260_v29  ;;  %966 = vmatpush.msrb.mxu1 %v2742_v46 }
 0x1a7   :  { %986 = vmatpush.msrb.mxu2 %v2797_v10  ;;  %1006 = vmatpush.msrb.mxu3 %v2816_v12 }
 0x1a8   :  { %947 = vmatpush.msrb.mxu0 %v3269_v3  ;;  %967 = vmatpush.msrb.mxu1 %v2759_v6 }
 0x1a9   :  { %987 = vmatpush.msrb.mxu2 %v2821_v14  ;;  %1007 = vmatpush.msrb.mxu3 %v2833_v16 }
 0x1aa   :  { %948 = vmatpush.msrb.mxu0 %v3278_v63  ;;  %968 = vmatpush.msrb.mxu1 %v2785_v52 }
 0x1ab   :  { %988 = vmatpush.msrb.mxu2 %v2846_v18  ;;  %1008 = vmatpush.msrb.mxu3 %v2856_v20 }
 0x1ac   :  { %949 = vmatpush.msrb.mxu0 %v3287_v45  ;;  %969 = vmatpush.msrb.mxu1 %v2802_v11 }
 0x1ad   :  { %989 = vmatpush.msrb.mxu2 %v2868_v22  ;;  %1009 = vmatpush.msrb.mxu3 %v2879_v24 }
 0x1ae   :  { %950 = vmatpush.msrb.mxu0 %v3296_v38  ;;  %970 = vmatpush.msrb.mxu1 %v2826_v15 }
 0x1af   :  { %990 = vmatpush.msrb.mxu2 %v2895_v27  ;;  %1010 = vmatpush.msrb.mxu3 %v4446_v49 }
 0x1b0   :  { %951 = vmatpush.msrb.mxu0 %v3305_v57  ;;  %971 = vmatpush.msrb.mxu1 %v4448_v56 }
 0x1b1   :  { %991 = vmatpush.msrb.mxu2 %v4449_v40  ;;  %1011 = vmatpush.msrb.mxu3 %v4450_v13  ;;  %v4461_v13 = vld [vmem:[#allocation20_spill] sm:$0xff] }
 0x1b2   :  { %952 = vmatpush.msrb.mxu0 %v3314_v59  ;;  %972 = vmatpush.msrb.mxu1 %v4452_v0  ;;  %v315_v0 = vadd.f32 %v4460_v25, %v4459_v43 }
 0x1b3   :  { %992 = vmatpush.msrb.mxu2 %v4453_v32  ;;  %1012 = vmatpush.msrb.mxu3 %v4454_v19 }
 0x1b4   :  { %953 = vmatpush.msrb.mxu0 %v3323_v23  ;;  %973 = vmatpush.msrb.mxu1 %v4456_v47 }
 0x1b5   :  { %993 = vmatpush.msrb.mxu2 %v4457_v58  ;;  %1013 = vmatpush.msrb.mxu3 %v4458_v31 }
 0x211   :  { %v696_v59 = vpop.f32.mrf.mxu0  ;;  %v716_v32 = vpop.f32.mrf.mxu1 }
 0x212   :  { %v697_v19 = vadd.f32 %v696_v59, %v4461_v13  ;;  %v717_v40 = vadd.f32 %v716_v32, %v315_v0 }
 0x214   :  { %v1971_v56 = vmul.f32 -1.442695, %v697_v19  ;;  %v1972_v57 = vmul.f32 -1.442695, %v717_v40 }
 0x216   :  { %2019 = vpow2.f32 %v1971_v56  ;;  %v4462_v56 = vld [vmem:[#allocation31_spill] sm:$0xff] }
 0x217   :  { %2021 = vpow2.f32 %v1972_v57  ;;  %v362_v57 = vadd.f32 %v4462_v56, %v3164_v5 }
 0x218   :  { %v736_v22 = vpop.f32.mrf.mxu2 }
 0x219   :  { %v737_v11 = vadd.f32 %v736_v22, %v362_v57  ;;  %v4487_v57 = vld [vmem:[#allocation22_spill] sm:$0xff] }
 0x21c   :  { %v2020_v49 = vpop.eup %2019 }
 0x21d   :  { %v2022_v23 = vpop.eup %2021  ;;  %v762_v27 = vadd.f32 1.0, %v2020_v49  ;;  %v4463_v49 = vld [vmem:[#allocation34_spill] sm:$0xff] }
 0x21e   :  { %v781_v47 = vadd.f32 1.0, %v2022_v23  ;;  %v409_v0 = vadd.f32 %v4463_v49, %v3170_v21 }
 0x21f   :  { %2023 = vrcp.f32 %v762_v27  ;;  %v774_v24 = vand.u32 2147483648, %v762_v27  ;;  %v772_v59 = vand.u32 2147483647, %v762_v27  ;;  %vm768_vm14 = vweird.f32 %v762_v27 }
 0x220   :  { %2025 = vrcp.f32 %v781_v47  ;;  %v793_v23 = vand.u32 2147483648, %v781_v47  ;;  %vm787_vm0 = vweird.f32 %v781_v47 }
 0x221   :  { %vm773_vm4 = vcmp.eq.f32.partialorder %v772_v59, 8.507059e+37 }
 0x222   :  { %v794_v21 = vor.u32 1.1754944e-38, %v793_v23 }
 0x225   :  { %v2024_v58 = vpop.eup %2023 }
 0x226   :  { %v2026_v31 = vpop.eup %2025  ;;  %v764_v15 = vmul.f32 %v2024_v58, %v762_v27  ;;  %vm769_vm12 = vweird.f32 %v2024_v58 }
 0x227   :  { %v783_v38 = vmul.f32 %v2026_v31, %v781_v47  ;;  %vm788_vm13 = vweird.f32 %v2026_v31  ;;  %vm770_vm15 = vmor %vm768_vm14, %vm769_vm12 }
 0x228   :  { %v765_v25 = vsub.f32 1.0, %v764_v15  ;;  %v775_v15 = vor.u32 1.1754944e-38, %v774_v24  ;;  %vm789_vm1 = vmor %vm787_vm0, %vm788_vm13 }
 0x229   :  { %v784_v43 = vsub.f32 1.0, %v783_v38  ;;  %v756_v38 = vpop.f32.mrf.mxu3 }
 0x22a   :  { %v766_v13 = vmul.f32 %v2024_v58, %v765_v25  ;;  %v791_v25 = vand.u32 2147483647, %v781_v47 }
 0x22b   :  { %v785_v40 = vmul.f32 %v2026_v31, %v784_v43  ;;  %v757_v43 = vadd.f32 %v756_v38, %v409_v0 }
 0x22c   :  { %v767_v32 = vadd.f32 %v2024_v58, %v766_v13  ;;  %vm792_vm3 = vcmp.eq.f32.partialorder %v791_v25, 8.507059e+37 }
 0x22d   :  { %v786_v19 = vadd.f32 %v2026_v31, %v785_v40 }
 0x22e   :  { %v771_v45 = vsel %vm770_vm15, %v2024_v58, %v767_v32 }
 0x22f   :  { %v776_v20 = vsel %vm773_vm4, %v775_v15, %v771_v45  ;;  %v790_v49 = vsel %vm789_vm1, %v2026_v31, %v786_v19 }
 0x230   :  { %v798_v56 = vmul.f32 %v776_v20, %v737_v11  ;;  %v795_v22 = vsel %vm792_vm3, %v794_v21, %v790_v49  ;;  %v3356_v11 = vld [vmem:[%s4273_s5 + $0x1f0] sm:$0xff]  ;;  %v3364_v20 = vld [vmem:[%s4273_s5 + $0x1c8] sm:$0xff] }
 0x231   :  { %v797_v24 = vsel %vm544_vm5, 1.0, %v795_v22  ;;  %v3373_v21 = vld [vmem:[%s4273_s5 + $0x1a8] sm:$0xff] }
 0x232   :  { %v799_v27 = vadd.f32 %v798_v56, %v757_v43  ;;  %v801_v13 = vsub.f32 1.0, %v797_v24  ;;  %v803_v59 = vmul.f32 %v797_v24, %v3179_v4 }
 0x234   :  { %2027 = vtanh.f32 %v799_v27 }
 0x23a   :  { %v2028_v47 = vpop.eup %2027 }
 0x23b   :  { %v802_v58 = vmul.f32 %v2028_v47, %v801_v13 }
 0x23d   :  { %v3340_v45 = vadd.f32 %v803_v59, %v802_v58 }
 0x23f   :  { %825 = vmatmul.f32.vlgmr.msra.gmra.mxu0 %v3340_v45  ;;  %845 = vmatmul.f32.vlgmr.msra.gmra.mxu1 %v3340_v45 }
 0x240   :  { %865 = vmatmul.f32.vlgmr.msra.gmra.mxu2 %v3340_v45  ;;  %885 = vmatmul.f32.vlgmr.msra.gmra.mxu3 %v3340_v45 }
 0x241   :  { %1067 = vmatpush.msra.mxu0 %v3188_v28  ;;  %1087 = vmatpush.msra.mxu1 %v3350_v8 }
 0x242   :  { %1107 = vmatpush.msra.mxu2 %v3356_v11  ;;  %1127 = vmatpush.msra.mxu3 %v2612_v33  ;;  %v3382_v33 = vld [vmem:[%s4273_s5 + $0x188] sm:$0xff] }
 0x243   :  { %1068 = vmatpush.msra.mxu0 %v3197_v54  ;;  %1088 = vmatpush.msra.mxu1 %v3364_v20 }
 0x244   :  { %1108 = vmatpush.msra.mxu2 %v2617_v51  ;;  %1128 = vmatpush.msra.mxu3 %v2629_v55  ;;  %v3391_v51 = vld [vmem:[%s4273_s5 + $0x168] sm:$0xff]  ;;  %v4464_v55 = vld [vmem:[#allocation6_spill] sm:$0xff] }
 0x245   :  { %1069 = vmatpush.msra.mxu0 %v3206_v17  ;;  %1089 = vmatpush.msra.mxu1 %v3373_v21 }
 0x246   :  { %1109 = vmatpush.msra.mxu2 %v2648_v35  ;;  %1129 = vmatpush.msra.mxu3 %v2658_v37  ;;  %v4465_v35 = vld [vmem:[#allocation59_spill] sm:$0xff]  ;;  %v4467_v37 = vld [vmem:[#allocation8_spill] sm:$0xff] }
 0x247   :  { %1070 = vmatpush.msra.mxu0 %v3215_v26  ;;  %1090 = vmatpush.msra.mxu1 %v3382_v33 }
 0x248   :  { %1110 = vmatpush.msra.mxu2 %v2666_v60  ;;  %1130 = vmatpush.msra.mxu3 %v2676_v62  ;;  %v4468_v60 = vld [vmem:[#allocation10_spill] sm:$0xff]  ;;  %v4470_v62 = vld [vmem:[#allocation4_spill] sm:$0xff] }
 0x249   :  { %1071 = vmatpush.msra.mxu0 %v3224_v30  ;;  %1091 = vmatpush.msra.mxu1 %v3391_v51 }
 0x24a   :  { %1111 = vmatpush.msra.mxu2 %v2704_v42  ;;  %1131 = vmatpush.msra.mxu3 %v2714_v1  ;;  %v4471_v42 = vld [vmem:[#allocation11_spill] sm:$0xff]  ;;  %v4473_v1 = vld [vmem:[#allocation61_spill] sm:$0xff] }
 0x24b   :  { %1072 = vmatpush.msra.mxu0 %v3233_v39  ;;  %1092 = vmatpush.msra.mxu1 %v2653_v36  ;;  %v4466_v36 = vld [vmem:[#allocation3_spill] sm:$0xff] }
 0x24c   :  { %1112 = vmatpush.msra.mxu2 %v2721_v2  ;;  %1132 = vmatpush.msra.mxu3 %v2747_v48  ;;  %v4474_v2 = vld [vmem:[#allocation5_spill] sm:$0xff]  ;;  %v4476_v48 = vld [vmem:[#allocation14_spill] sm:$0xff] }
 0x24d   :  { %1073 = vmatpush.msra.mxu0 %v3242_v41  ;;  %1093 = vmatpush.msra.mxu1 %v2671_v61  ;;  %v4469_v61 = vld [vmem:[#allocation60_spill] sm:$0xff] }
 0x24e   :  { %1113 = vmatpush.msra.mxu2 %v2752_v50  ;;  %1133 = vmatpush.msra.mxu3 %v2764_v7  ;;  %v4477_v50 = vld [vmem:[#allocation62_spill] sm:$0xff]  ;;  %v4479_v7 = vld [vmem:[#allocation15_spill] sm:$0xff] }
 0x24f   :  { %1074 = vmatpush.msra.mxu0 %v3251_v34  ;;  %1094 = vmatpush.msra.mxu1 %v2709_v44  ;;  %v4472_v44 = vld [vmem:[#allocation12_spill] sm:$0xff] }
 0x250   :  { %1114 = vmatpush.msra.mxu2 %v2780_v9  ;;  %1134 = vmatpush.msra.mxu3 %v2790_v53  ;;  %v4480_v9 = vld [vmem:[#allocation16_spill] sm:$0xff]  ;;  %v4482_v53 = vld [vmem:[#allocation9_spill] sm:$0xff] }
 0x251   :  { %1075 = vmatpush.msra.mxu0 %v3260_v29  ;;  %1095 = vmatpush.msra.mxu1 %v2742_v46  ;;  %v4475_v46 = vld [vmem:[#allocation13_spill] sm:$0xff] }
 0x252   :  { %1115 = vmatpush.msra.mxu2 %v2797_v10  ;;  %1135 = vmatpush.msra.mxu3 %v2816_v12  ;;  %v4483_v10 = vld [vmem:[#allocation17_spill] sm:$0xff]  ;;  %v4484_v12 = vld [vmem:[#allocation18_spill] sm:$0xff] }
 0x253   :  { %1076 = vmatpush.msra.mxu0 %v3269_v3  ;;  %1096 = vmatpush.msra.mxu1 %v2759_v6  ;;  %v4478_v6 = vld [vmem:[#allocation7_spill] sm:$0xff] }
 0x254   :  { %1116 = vmatpush.msra.mxu2 %v2821_v14  ;;  %1136 = vmatpush.msra.mxu3 %v2833_v16  ;;  %v4485_v14 = vld [vmem:[#allocation48_spill] sm:$0xff] }
 0x255   :  { %1077 = vmatpush.msra.mxu0 %v3278_v63  ;;  %1097 = vmatpush.msra.mxu1 %v2785_v52  ;;  %v4481_v52 = vld [vmem:[#allocation63_spill] sm:$0xff]  ;;  %v4486_v16 = vld [vmem:[#allocation28_spill] sm:$0xff] }
 0x256   :  { %1117 = vmatpush.msra.mxu2 %v2846_v18  ;;  %1137 = vmatpush.msra.mxu3 %v4464_v55  ;;  %v318_v18 = vadd.f32 %v4486_v16, %v4485_v14 }
 0x257   :  { %1078 = vmatpush.msra.mxu0 %v4465_v35  ;;  %1098 = vmatpush.msra.mxu1 %v4466_v36  ;;  %v4488_v36 = vld [vmem:[#allocation33_spill] sm:$0xff] }
 0x258   :  { %1118 = vmatpush.msra.mxu2 %v4467_v37  ;;  %1138 = vmatpush.msra.mxu3 %v4468_v60  ;;  %v365_v37 = vadd.f32 %v4488_v36, %v3164_v5  ;;  %v3561_v36 = vld [vmem:[%s4273_s5 + $0x108] sm:$0xff] }
 0x259   :  { %1079 = vmatpush.msra.mxu0 %v4469_v61  ;;  %1099 = vmatpush.msra.mxu1 %v4470_v62 }
 0x25a   :  { %1119 = vmatpush.msra.mxu2 %v4471_v42  ;;  %1139 = vmatpush.msra.mxu3 %v4472_v44  ;;  %v4489_v44 = vld [vmem:[#allocation57_spill] sm:$0xff] }
 0x25b   :  { %1080 = vmatpush.msra.mxu0 %v4473_v1  ;;  %1100 = vmatpush.msra.mxu1 %v4474_v2  ;;  %v4490_v2 = vld [vmem:[#allocation37_spill] sm:$0xff] }
 0x25c   :  { %1120 = vmatpush.msra.mxu2 %v4475_v46  ;;  %1140 = vmatpush.msra.mxu3 %v4476_v48  ;;  %v412_v46 = vadd.f32 %v4490_v2, %v4489_v44  ;;  %v3592_v2 = vld [vmem:[%s4273_s5 + $0xf8] sm:$0xff] }
 0x25d   :  { %1081 = vmatpush.msra.mxu0 %v4477_v50  ;;  %1101 = vmatpush.msra.mxu1 %v4478_v6 }
 0x25e   :  { %1121 = vmatpush.msra.mxu2 %v4479_v7  ;;  %1141 = vmatpush.msra.mxu3 %v4480_v9 }
 0x25f   :  { %1082 = vmatpush.msra.mxu0 %v4481_v52  ;;  %1102 = vmatpush.msra.mxu1 %v4482_v53 }
 0x260   :  { %1122 = vmatpush.msra.mxu2 %v4483_v10  ;;  %1142 = vmatpush.msra.mxu3 %v4484_v12 }
 0x2bc   :  { %v826_v4 = vpop.f32.mrf.mxu0  ;;  %v846_v31 = vpop.f32.mrf.mxu1 }
 0x2bd   :  { %v827_v40 = vadd.f32 %v826_v4, %v4487_v57  ;;  %v847_v0 = vadd.f32 %v846_v31, %v318_v18 }
 0x2bf   :  { %v1973_v32 = vmul.f32 -1.442695, %v827_v40  ;;  %v1974_v19 = vmul.f32 -1.442695, %v847_v0 }
 0x2c1   :  { %2029 = vpow2.f32 %v1973_v32 }
 0x2c2   :  { %2031 = vpow2.f32 %v1974_v19 }
 0x2c3   :  { %v866_v55 = vpop.f32.mrf.mxu2  ;;  %v886_v42 = vpop.f32.mrf.mxu3 }
 0x2c4   :  { %v867_v48 = vadd.f32 %v866_v55, %v365_v37  ;;  %v887_v12 = vadd.f32 %v886_v42, %v412_v46  ;;  %v3554_v55 = vld [vmem:[%s4273_s5 + $0x138] sm:$0xff]  ;;  %v3567_v37 = vld [vmem:[%s4273_s5 + $0x110] sm:$0xff]  ;;  %v3599_v46 = vld [vmem:[%s4273_s5 + $0xc8] sm:$0xff] }
 0x2c5   :  { %v3586_v42 = vld [vmem:[%s4273_s5 + $0xf0] sm:$0xff]  ;;  %4492 = vst [vmem:[#allocation20_spill] sm:$0xff] %v3599_v46 }
 0x2c7   :  { %v2030_v23 = vpop.eup %2029 }
 0x2c8   :  { %v2032_v15 = vpop.eup %2031  ;;  %v892_v38 = vadd.f32 1.0, %v2030_v23 }
 0x2c9   :  { %v911_v25 = vadd.f32 1.0, %v2032_v15  ;;  %v3468_v15 = vld [vmem:[%s4273_s5 + $0x1d0] sm:$0xff] }
 0x2ca   :  { %2033 = vrcp.f32 %v892_v38  ;;  %v904_v13 = vand.u32 2147483648, %v892_v38  ;;  %v902_v58 = vand.u32 2147483647, %v892_v38  ;;  %vm898_vm7 = vweird.f32 %v892_v38 }
 0x2cb   :  { %2035 = vrcp.f32 %v911_v25  ;;  %v923_v53 = vand.u32 2147483648, %v911_v25  ;;  %vm917_vm11 = vweird.f32 %v911_v25  ;;  %v921_v16 = vand.u32 2147483647, %v911_v25 }
 0x2cc   :  { %v905_v62 = vor.u32 1.1754944e-38, %v904_v13  ;;  %vm903_vm9 = vcmp.eq.f32.partialorder %v902_v58, 8.507059e+37  ;;  %v3529_v13 = vld [vmem:[%s4273_s5 + $0x150] sm:$0xff]  ;;  %v3542_v58 = vld [vmem:[%s4273_s5 + $0x128] sm:$0xff] }
 0x2cd   :  { %v924_v31 = vor.u32 1.1754944e-38, %v923_v53  ;;  %vm922_vm13 = vcmp.eq.f32.partialorder %v921_v16, 8.507059e+37  ;;  %v3630_v53 = vld [vmem:[%s4273_s5 + $0xb8] sm:$0xff] }
 0x2ce   :  { %4497 = vst [vmem:[#allocation8_spill] sm:$0xff] %v3630_v53  ;;  %v3649_v16 = vld [vmem:[%s4273_s5 + $0x98] sm:$0xff] }
 0x2cf   :  { %4500 = vst [vmem:[#allocation11_spill] sm:$0xff] %v3649_v16 }
 0x2d0   :  { %v2034_v56 = vpop.eup %2033 }
 0x2d1   :  { %v2036_v43 = vpop.eup %2035  ;;  %v894_v49 = vmul.f32 %v2034_v56, %v892_v38  ;;  %vm899_vm6 = vweird.f32 %v2034_v56  ;;  %v3474_v38 = vld [vmem:[%s4273_s5 + $0x1d8] sm:$0xff] }
 0x2d2   :  { %v913_v27 = vmul.f32 %v2036_v43, %v911_v25  ;;  %vm900_vm8 = vmor %vm898_vm7, %vm899_vm6  ;;  %vm918_vm10 = vweird.f32 %v2036_v43  ;;  %v3482_v25 = vld [vmem:[%s4273_s5 + $0x1b0] sm:$0xff] }
 0x2d3   :  { %v895_v22 = vsub.f32 1.0, %v894_v49  ;;  %vm919_vm12 = vmor %vm917_vm11, %vm918_vm10  ;;  %v3502_v49 = vld [vmem:[%s4273_s5 + $0x198] sm:$0xff] }
 0x2d4   :  { %v914_v24 = vsub.f32 1.0, %v913_v27  ;;  %v3510_v27 = vld [vmem:[%s4273_s5 + $0x170] sm:$0xff] }
 0x2d5   :  { %v896_v47 = vmul.f32 %v2034_v56, %v895_v22  ;;  %v3516_v22 = vld [vmem:[%s4273_s5 + $0x178] sm:$0xff] }
 0x2d6   :  { %v915_v59 = vmul.f32 %v2036_v43, %v914_v24  ;;  %v3523_v24 = vld [vmem:[%s4273_s5 + $0x148] sm:$0xff] }
 0x2d7   :  { %v897_v60 = vadd.f32 %v2034_v56, %v896_v47  ;;  %v3535_v47 = vld [vmem:[%s4273_s5 + $0x158] sm:$0xff] }
 0x2d8   :  { %v916_v9 = vadd.f32 %v2036_v43, %v915_v59  ;;  %v3548_v59 = vld [vmem:[%s4273_s5 + $0x130] sm:$0xff] }
 0x2d9   :  { %v901_v6 = vsel %vm900_vm8, %v2034_v56, %v897_v60  ;;  %v3488_v56 = vld [vmem:[%s4273_s5 + $0x1b8] sm:$0xff] }
 0x2da   :  { %v906_v7 = vsel %vm903_vm9, %v905_v62, %v901_v6  ;;  %v920_v4 = vsel %vm919_vm12, %v2036_v43, %v916_v9  ;;  %v3496_v43 = vld [vmem:[%s4273_s5 + $0x190] sm:$0xff]  ;;  %v3573_v60 = vld [vmem:[%s4273_s5 + $0x118] sm:$0xff]  ;;  %v3580_v62 = vld [vmem:[%s4273_s5 + $0xe8] sm:$0xff] }
 0x2db   :  { %v927_v10 = vmul.f32 %v906_v7, %v867_v48  ;;  %v925_v57 = vsel %vm922_vm13, %v924_v31, %v920_v4  ;;  %v3605_v48 = vld [vmem:[%s4273_s5 + $0xd0] sm:$0xff]  ;;  %v3611_v6 = vld [vmem:[%s4273_s5 + $0xd8] sm:$0xff]  ;;  %v3618_v7 = vld [vmem:[%s4273_s5 + $0xa8] sm:$0xff] }
 0x2dc   :  { %v930_v40 = vsub.f32 1.0, %v925_v57  ;;  %v932_v19 = vmul.f32 %v925_v57, %v3340_v45  ;;  %v3460_v45 = vld [vmem:[%s4273_s5 + $0x1f8] sm:$0xff]  ;;  %4493 = vst [vmem:[#allocation31_spill] sm:$0xff] %v3605_v48  ;;  %v3624_v9 = vld [vmem:[%s4273_s5 + $0xb0] sm:$0xff]  ;;  %v3675_v57 = vld [vmem:[%s4273_s5 + $0x48] sm:$0xff] }
 0x2dd   :  { %v928_v18 = vadd.f32 %v927_v10, %v887_v12  ;;  %4494 = vst [vmem:[#allocation34_spill] sm:$0xff] %v3611_v6  ;;  %v3637_v10 = vld [vmem:[%s4273_s5 + $0x88] sm:$0xff]  ;;  %v3643_v12 = vld [vmem:[%s4273_s5 + $0x90] sm:$0xff]  ;;  %v3668_v31 = vld [vmem:[%s4273_s5 + $0x78] sm:$0xff] }
 0x2de   :  { %4495 = vst [vmem:[#allocation6_spill] sm:$0xff] %v3618_v7  ;;  %v3662_v4 = vld [vmem:[%s4273_s5 + $0x70] sm:$0xff] }
 0x2df   :  { %2037 = vtanh.f32 %v928_v18  ;;  %4496 = vst [vmem:[#allocation3_spill] sm:$0xff] %v3624_v9  ;;  %v3656_v18 = vld [vmem:[%s4273_s5 + $0x68] sm:$0xff] }
 0x2e0   :  { %4498 = vst [vmem:[#allocation10_spill] sm:$0xff] %v3637_v10 }
 0x2e1   :  { %4499 = vst [vmem:[#allocation4_spill] sm:$0xff] %v3643_v12 }
 0x2e2   :  { %4501 = vst [vmem:[#allocation12_spill] sm:$0xff] %v3656_v18 }
 0x2e3   :  { %4502 = vst [vmem:[#allocation5_spill] sm:$0xff] %v3662_v4 }
 0x2e4   :  { %4503 = vst [vmem:[#allocation13_spill] sm:$0xff] %v3668_v31 }
 0x2e5   :  { %v2038_v0 = vpop.eup %2037  ;;  %4504 = vst [vmem:[#allocation14_spill] sm:$0xff] %v3675_v57 }
 0x2e6   :  { %v931_v32 = vmul.f32 %v2038_v0, %v930_v40  ;;  %v3681_v40 = vld [vmem:[%s4273_s5 + $0x50] sm:$0xff]  ;;  %v3687_v0 = vld [vmem:[%s4273_s5 + $0x58] sm:$0xff] }
 0x2e7   :  { %4505 = vst [vmem:[#allocation7_spill] sm:$0xff] %v3681_v40 }
 0x2e8   :  { %v3448_v23 = vadd.f32 %v932_v19, %v931_v32  ;;  %4506 = vst [vmem:[#allocation15_spill] sm:$0xff] %v3687_v0  ;;  %v3694_v32 = vld [vmem:[%s4273_s5 + $0x28] sm:$0xff]  ;;  %v3700_v19 = vld [vmem:[%s4273_s5 + $0x30] sm:$0xff] }
 0x2e9   :  { %4507 = vst [vmem:[#allocation16_spill] sm:$0xff] %v3694_v32 }
 0x2ea   :  { %4491 = vst [vmem:[#allocation25_spill] sm:$0xff] %v3448_v23  ;;  %954 = vmatmul.f32.vlgmr.msrb.gmra.mxu0 %v3448_v23  ;;  %974 = vmatmul.f32.vlgmr.msrb.gmra.mxu1 %v3448_v23 }
 0x2eb   :  { %994 = vmatmul.f32.vlgmr.msrb.gmra.mxu2 %v3448_v23  ;;  %1014 = vmatmul.f32.vlgmr.msrb.gmra.mxu3 %v3448_v23  ;;  %4508 = vst [vmem:[#allocation9_spill] sm:$0xff] %v3700_v19 }
 0x2ec   :  { %1196 = vmatpush.msrb.mxu0 %v3188_v28  ;;  %1216 = vmatpush.msrb.mxu1 %v3350_v8 }
 0x2ed   :  { %1236 = vmatpush.msrb.mxu2 %v3356_v11  ;;  %1256 = vmatpush.msrb.mxu3 %v3460_v45 }
 0x2ee   :  { %1197 = vmatpush.msrb.mxu0 %v3197_v54  ;;  %1217 = vmatpush.msrb.mxu1 %v3364_v20 }
 0x2ef   :  { %1237 = vmatpush.msrb.mxu2 %v3468_v15  ;;  %1257 = vmatpush.msrb.mxu3 %v3474_v38 }
 0x2f0   :  { %1198 = vmatpush.msrb.mxu0 %v3206_v17  ;;  %1218 = vmatpush.msrb.mxu1 %v3373_v21 }
 0x2f1   :  { %1238 = vmatpush.msrb.mxu2 %v3482_v25  ;;  %1258 = vmatpush.msrb.mxu3 %v3488_v56 }
 0x2f2   :  { %1199 = vmatpush.msrb.mxu0 %v3215_v26  ;;  %1219 = vmatpush.msrb.mxu1 %v3382_v33 }
 0x2f3   :  { %1239 = vmatpush.msrb.mxu2 %v3496_v43  ;;  %1259 = vmatpush.msrb.mxu3 %v3502_v49 }
 0x2f4   :  { %1200 = vmatpush.msrb.mxu0 %v3224_v30  ;;  %1220 = vmatpush.msrb.mxu1 %v3391_v51 }
 0x2f5   :  { %1240 = vmatpush.msrb.mxu2 %v3510_v27  ;;  %1260 = vmatpush.msrb.mxu3 %v3516_v22 }
 0x2f6   :  { %1201 = vmatpush.msrb.mxu0 %v3233_v39  ;;  %1221 = vmatpush.msrb.mxu1 %v3523_v24 }
 0x2f7   :  { %1241 = vmatpush.msrb.mxu2 %v3529_v13  ;;  %1261 = vmatpush.msrb.mxu3 %v3535_v47 }
 0x2f8   :  { %1202 = vmatpush.msrb.mxu0 %v3242_v41  ;;  %1222 = vmatpush.msrb.mxu1 %v3542_v58 }
 0x2f9   :  { %1242 = vmatpush.msrb.mxu2 %v3548_v59  ;;  %1262 = vmatpush.msrb.mxu3 %v3554_v55 }
 0x2fa   :  { %1203 = vmatpush.msrb.mxu0 %v3251_v34  ;;  %1223 = vmatpush.msrb.mxu1 %v3561_v36 }
 0x2fb   :  { %1243 = vmatpush.msrb.mxu2 %v3567_v37  ;;  %1263 = vmatpush.msrb.mxu3 %v3573_v60 }
 0x2fc   :  { %1204 = vmatpush.msrb.mxu0 %v3260_v29  ;;  %1224 = vmatpush.msrb.mxu1 %v3580_v62 }
 0x2fd   :  { %1244 = vmatpush.msrb.mxu2 %v3586_v42  ;;  %1264 = vmatpush.msrb.mxu3 %v3592_v2 }
 0x2fe   :  { %1205 = vmatpush.msrb.mxu0 %v3269_v3  ;;  %1225 = vmatpush.msrb.mxu1 %v3599_v46 }
 0x2ff   :  { %1245 = vmatpush.msrb.mxu2 %v3605_v48  ;;  %1265 = vmatpush.msrb.mxu3 %v3611_v6 }
 0x300   :  { %1206 = vmatpush.msrb.mxu0 %v3278_v63  ;;  %1226 = vmatpush.msrb.mxu1 %v3618_v7 }
 0x301   :  { %1246 = vmatpush.msrb.mxu2 %v3624_v9  ;;  %1266 = vmatpush.msrb.mxu3 %v3630_v53 }
 0x302   :  { %1207 = vmatpush.msrb.mxu0 %v4465_v35  ;;  %1227 = vmatpush.msrb.mxu1 %v3637_v10 }
 0x303   :  { %1247 = vmatpush.msrb.mxu2 %v3643_v12  ;;  %1267 = vmatpush.msrb.mxu3 %v3649_v16 }
 0x304   :  { %1208 = vmatpush.msrb.mxu0 %v4469_v61  ;;  %1228 = vmatpush.msrb.mxu1 %v3656_v18 }
 0x305   :  { %1248 = vmatpush.msrb.mxu2 %v3662_v4  ;;  %1268 = vmatpush.msrb.mxu3 %v3668_v31 }
 0x306   :  { %1209 = vmatpush.msrb.mxu0 %v4473_v1  ;;  %1229 = vmatpush.msrb.mxu1 %v3675_v57 }
 0x307   :  { %1249 = vmatpush.msrb.mxu2 %v3681_v40  ;;  %1269 = vmatpush.msrb.mxu3 %v3687_v0  ;;  %v3706_v0 = vld [vmem:[%s4273_s5 + $0x38] sm:$0xff] }
 0x308   :  { %1210 = vmatpush.msrb.mxu0 %v4477_v50  ;;  %1230 = vmatpush.msrb.mxu1 %v3694_v32  ;;  %4509 = vst [vmem:[#allocation17_spill] sm:$0xff] %v3706_v0  ;;  %v3713_v32 = vld [vmem:[%s4273_s5 + $0x8] sm:$0xff] }
 0x309   :  { %1250 = vmatpush.msrb.mxu2 %v3700_v19  ;;  %1270 = vmatpush.msrb.mxu3 %v3706_v0  ;;  %4510 = vst [vmem:[#allocation18_spill] sm:$0xff] %v3713_v32  ;;  %v3719_v19 = vld [vmem:[%s4273_s5 + $0x10] sm:$0xff]  ;;  %v3725_v0 = vld [vmem:[%s4273_s5 + $0x18] sm:$0xff] }
 0x30a   :  { %1211 = vmatpush.msrb.mxu0 %v4481_v52  ;;  %1231 = vmatpush.msrb.mxu1 %v3713_v32  ;;  %4511 = vst [vmem:[#allocation28_spill] sm:$0xff] %v3719_v19  ;;  %v4513_v52 = vld [vmem:[#allocation30_spill] sm:$0xff]  ;;  %v4514_v32 = vld [vmem:[#allocation21_spill] sm:$0xff] }
 0x30b   :  { %1251 = vmatpush.msrb.mxu2 %v3719_v19  ;;  %4512 = vst [vmem:[#allocation22_spill] sm:$0xff] %v3725_v0  ;;  %1271 = vmatpush.msrb.mxu3 %v3725_v0  ;;  %v321_v50 = vadd.f32 %v4513_v52, %v4485_v14 }
 0x367   :  { %v955_v40 = vpop.f32.mrf.mxu0  ;;  %v975_v57 = vpop.f32.mrf.mxu1 }
 0x368   :  { %v956_v1 = vadd.f32 %v955_v40, %v4514_v32  ;;  %v976_v31 = vadd.f32 %v975_v57, %v321_v50  ;;  %v4516_v32 = vld [vmem:[#allocation40_spill] sm:$0xff] }
 0x36a   :  { %v1975_v4 = vmul.f32 -1.442695, %v956_v1  ;;  %v1976_v18 = vmul.f32 -1.442695, %v976_v31 }
 0x36c   :  { %2039 = vpow2.f32 %v1975_v4 }
 0x36d   :  { %2041 = vpow2.f32 %v1976_v18  ;;  %v4515_v18 = vld [vmem:[#allocation36_spill] sm:$0xff] }
 0x36e   :  { %v995_v31 = vpop.f32.mrf.mxu2  ;;  %v368_v4 = vadd.f32 %v4515_v18, %v3164_v5  ;;  %v1015_v40 = vpop.f32.mrf.mxu3 }
 0x370   :  { %v996_v63 = vadd.f32 %v995_v31, %v368_v4  ;;  %v4526_v4 = vld [vmem:[#allocation10_spill] sm:$0xff] }
 0x372   :  { %v2040_v19 = vpop.eup %2039 }
 0x373   :  { %v2042_v61 = vpop.eup %2041  ;;  %v1021_v16 = vadd.f32 1.0, %v2040_v19  ;;  %v415_v19 = vadd.f32 %v4516_v32, %v4489_v44 }
 0x374   :  { %v1040_v12 = vadd.f32 1.0, %v2042_v61 }
 0x375   :  { %2043 = vrcp.f32 %v1021_v16  ;;  %v1033_v9 = vand.u32 2147483648, %v1021_v16  ;;  %v1031_v50 = vand.u32 2147483647, %v1021_v16  ;;  %vm1027_vm15 = vweird.f32 %v1021_v16 }
 0x376   :  { %2045 = vrcp.f32 %v1040_v12  ;;  %v1052_v6 = vand.u32 2147483648, %v1040_v12  ;;  %v1016_v48 = vadd.f32 %v1015_v40, %v415_v19  ;;  %vm1046_vm2 = vweird.f32 %v1040_v12  ;;  %v4529_v40 = vld [vmem:[#allocation60_spill] sm:$0xff] }
 0x377   :  { %v1034_v61 = vor.u32 1.1754944e-38, %v1033_v9  ;;  %vm1032_vm4 = vcmp.eq.f32.partialorder %v1031_v50, 8.507059e+37  ;;  %v1050_v46 = vand.u32 2147483647, %v1040_v12  ;;  %v4530_v19 = vld [vmem:[#allocation12_spill] sm:$0xff] }
 0x378   :  { %v1053_v18 = vor.u32 1.1754944e-38, %v1052_v6  ;;  %v4522_v6 = vld [vmem:[#allocation6_spill] sm:$0xff] }
 0x379   :  { %vm1051_vm5 = vcmp.eq.f32.partialorder %v1050_v46, 8.507059e+37  ;;  %v4520_v46 = vld [vmem:[#allocation34_spill] sm:$0xff] }
 0x37b   :  { %v2044_v10 = vpop.eup %2043 }
 0x37c   :  { %v2046_v0 = vpop.eup %2045  ;;  %v1023_v35 = vmul.f32 %v2044_v10, %v1021_v16  ;;  %vm1028_vm14 = vweird.f32 %v2044_v10 }
 0x37d   :  { %v1042_v53 = vmul.f32 %v2046_v0, %v1040_v12  ;;  %vm1029_vm0 = vmor %vm1027_vm15, %vm1028_vm14  ;;  %vm1047_vm1 = vweird.f32 %v2046_v0  ;;  %v4523_v12 = vld [vmem:[#allocation3_spill] sm:$0xff] }
 0x37e   :  { %v1024_v52 = vsub.f32 1.0, %v1023_v35  ;;  %vm1048_vm3 = vmor %vm1046_vm2, %vm1047_vm1 }
 0x37f   :  { %v1043_v14 = vsub.f32 1.0, %v1042_v53 }
 0x380   :  { %v1025_v7 = vmul.f32 %v2044_v10, %v1024_v52 }
 0x381   :  { %v1044_v1 = vmul.f32 %v2046_v0, %v1043_v14 }
 0x382   :  { %v1026_v57 = vadd.f32 %v2044_v10, %v1025_v7 }
 0x383   :  { %v1045_v52 = vadd.f32 %v2046_v0, %v1044_v1  ;;  %v4525_v1 = vld [vmem:[#allocation59_spill] sm:$0xff] }
 0x384   :  { %v1030_v35 = vsel %vm1029_vm0, %v2044_v10, %v1026_v57  ;;  %v4527_v57 = vld [vmem:[#allocation4_spill] sm:$0xff] }
 0x385   :  { %v1035_v53 = vsel %vm1032_vm4, %v1034_v61, %v1030_v35  ;;  %v1049_v16 = vsel %vm1048_vm3, %v2046_v0, %v1045_v52  ;;  %v4524_v0 = vld [vmem:[#allocation8_spill] sm:$0xff]  ;;  %v4528_v61 = vld [vmem:[#allocation11_spill] sm:$0xff]  ;;  %v4531_v35 = vld [vmem:[#allocation5_spill] sm:$0xff] }
 0x386   :  { %v1056_v14 = vmul.f32 %v1035_v53, %v996_v63  ;;  %v1054_v9 = vsel %vm1051_vm5, %v1053_v18, %v1049_v16  ;;  %v4519_v63 = vld [vmem:[#allocation31_spill] sm:$0xff]  ;;  %v4532_v53 = vld [vmem:[#allocation13_spill] sm:$0xff]  ;;  %v4537_v18 = vld [vmem:[#allocation62_spill] sm:$0xff] }
 0x387   :  { %v1059_v5 = vsub.f32 1.0, %v1054_v9  ;;  %v1061_v10 = vmul.f32 %v1054_v9, %v3448_v23  ;;  %v4533_v52 = vld [vmem:[#allocation61_spill] sm:$0xff]  ;;  %v4536_v16 = vld [vmem:[#allocation15_spill] sm:$0xff]  ;;  %v4538_v9 = vld [vmem:[#allocation16_spill] sm:$0xff] }
 0x388   :  { %v1057_v7 = vadd.f32 %v1056_v14, %v1016_v48  ;;  %v4521_v48 = vld [vmem:[#allocation58_spill] sm:$0xff] }
 0x389   :  { %v4534_v14 = vld [vmem:[#allocation14_spill] sm:$0xff] }
 0x38a   :  { %2047 = vtanh.f32 %v1057_v7  ;;  %v4535_v7 = vld [vmem:[#allocation7_spill] sm:$0xff]  ;;  %v4542_v23 = vld [vmem:[#allocation18_spill] sm:$0xff] }
 0x390   :  { %v2048_v32 = vpop.eup %2047 }
 0x391   :  { %v1060_v31 = vmul.f32 %v2048_v32, %v1059_v5  ;;  %v4518_v5 = vld [vmem:[#allocation20_spill] sm:$0xff]  ;;  %v4539_v32 = vld [vmem:[#allocation9_spill] sm:$0xff] }
 0x393   :  { %v3736_v50 = vadd.f32 %v1061_v10, %v1060_v31  ;;  %v4540_v31 = vld [vmem:[#allocation17_spill] sm:$0xff]  ;;  %v4541_v10 = vld [vmem:[#allocation63_spill] sm:$0xff] }
 0x395   :  { %4517 = vst [vmem:[#allocation33_spill] sm:$0xff] %v3736_v50  ;;  %1083 = vmatmul.f32.vlgmr.msra.gmra.mxu0 %v3736_v50  ;;  %1103 = vmatmul.f32.vlgmr.msra.gmra.mxu1 %v3736_v50 }
 0x396   :  { %1123 = vmatmul.f32.vlgmr.msra.gmra.mxu2 %v3736_v50  ;;  %1143 = vmatmul.f32.vlgmr.msra.gmra.mxu3 %v3736_v50 }
 0x397   :  { %1325 = vmatpush.msra.mxu0 %v3188_v28  ;;  %1345 = vmatpush.msra.mxu1 %v3350_v8 }
 0x398   :  { %1365 = vmatpush.msra.mxu2 %v3356_v11  ;;  %1385 = vmatpush.msra.mxu3 %v3460_v45 }
 0x399   :  { %1326 = vmatpush.msra.mxu0 %v3197_v54  ;;  %1346 = vmatpush.msra.mxu1 %v3364_v20 }
 0x39a   :  { %1366 = vmatpush.msra.mxu2 %v3468_v15  ;;  %1386 = vmatpush.msra.mxu3 %v3474_v38 }
 0x39b   :  { %1327 = vmatpush.msra.mxu0 %v3206_v17  ;;  %1347 = vmatpush.msra.mxu1 %v3373_v21 }
 0x39c   :  { %1367 = vmatpush.msra.mxu2 %v3482_v25  ;;  %1387 = vmatpush.msra.mxu3 %v3488_v56 }
 0x39d   :  { %1328 = vmatpush.msra.mxu0 %v3215_v26  ;;  %1348 = vmatpush.msra.mxu1 %v3382_v33 }
 0x39e   :  { %1368 = vmatpush.msra.mxu2 %v3496_v43  ;;  %1388 = vmatpush.msra.mxu3 %v3502_v49 }
 0x39f   :  { %1329 = vmatpush.msra.mxu0 %v3224_v30  ;;  %1349 = vmatpush.msra.mxu1 %v3391_v51 }
 0x3a0   :  { %1369 = vmatpush.msra.mxu2 %v3510_v27  ;;  %1389 = vmatpush.msra.mxu3 %v3516_v22 }
 0x3a1   :  { %1330 = vmatpush.msra.mxu0 %v3233_v39  ;;  %1350 = vmatpush.msra.mxu1 %v3523_v24 }
 0x3a2   :  { %1370 = vmatpush.msra.mxu2 %v3529_v13  ;;  %1390 = vmatpush.msra.mxu3 %v3535_v47 }
 0x3a3   :  { %1331 = vmatpush.msra.mxu0 %v3242_v41  ;;  %1351 = vmatpush.msra.mxu1 %v3542_v58 }
 0x3a4   :  { %1371 = vmatpush.msra.mxu2 %v3548_v59  ;;  %1391 = vmatpush.msra.mxu3 %v3554_v55 }
 0x3a5   :  { %1332 = vmatpush.msra.mxu0 %v3251_v34  ;;  %1352 = vmatpush.msra.mxu1 %v3561_v36 }
 0x3a6   :  { %1372 = vmatpush.msra.mxu2 %v3567_v37  ;;  %1392 = vmatpush.msra.mxu3 %v3573_v60 }
 0x3a7   :  { %1333 = vmatpush.msra.mxu0 %v3260_v29  ;;  %1353 = vmatpush.msra.mxu1 %v3580_v62 }
 0x3a8   :  { %1373 = vmatpush.msra.mxu2 %v3586_v42  ;;  %1393 = vmatpush.msra.mxu3 %v3592_v2 }
 0x3a9   :  { %1334 = vmatpush.msra.mxu0 %v3269_v3  ;;  %1354 = vmatpush.msra.mxu1 %v4518_v5 }
 0x3aa   :  { %1374 = vmatpush.msra.mxu2 %v4519_v63  ;;  %1394 = vmatpush.msra.mxu3 %v4520_v46 }
 0x3ab   :  { %1335 = vmatpush.msra.mxu0 %v4521_v48  ;;  %1355 = vmatpush.msra.mxu1 %v4522_v6 }
 0x3ac   :  { %1375 = vmatpush.msra.mxu2 %v4523_v12  ;;  %1395 = vmatpush.msra.mxu3 %v4524_v0 }
 0x3ad   :  { %1336 = vmatpush.msra.mxu0 %v4525_v1  ;;  %1356 = vmatpush.msra.mxu1 %v4526_v4 }
 0x3ae   :  { %1376 = vmatpush.msra.mxu2 %v4527_v57  ;;  %1396 = vmatpush.msra.mxu3 %v4528_v61 }
 0x3af   :  { %1337 = vmatpush.msra.mxu0 %v4529_v40  ;;  %1357 = vmatpush.msra.mxu1 %v4530_v19 }
 0x3b0   :  { %1377 = vmatpush.msra.mxu2 %v4531_v35  ;;  %1397 = vmatpush.msra.mxu3 %v4532_v53  ;;  %v4543_v53 = vld [vmem:[#allocation28_spill] sm:$0xff] }
 0x3b1   :  { %1338 = vmatpush.msra.mxu0 %v4533_v52  ;;  %1358 = vmatpush.msra.mxu1 %v4534_v14  ;;  %v4544_v52 = vld [vmem:[#allocation22_spill] sm:$0xff]  ;;  %v4545_v14 = vld [vmem:[#allocation48_spill] sm:$0xff] }
 0x3b2   :  { %1378 = vmatpush.msra.mxu2 %v4535_v7  ;;  %1398 = vmatpush.msra.mxu3 %v4536_v16  ;;  %v4546_v7 = vld [vmem:[#allocation32_spill] sm:$0xff] }
 0x3b3   :  { %1339 = vmatpush.msra.mxu0 %v4537_v18  ;;  %1359 = vmatpush.msra.mxu1 %v4538_v9  ;;  %v324_v35 = vadd.f32 %v4546_v7, %v4545_v14  ;;  %v4547_v18 = vld [vmem:[#allocation24_spill] sm:$0xff] }
 0x3b4   :  { %1379 = vmatpush.msra.mxu2 %v4539_v32  ;;  %1399 = vmatpush.msra.mxu3 %v4540_v31 }
 0x3b5   :  { %1340 = vmatpush.msra.mxu0 %v4541_v10  ;;  %1360 = vmatpush.msra.mxu1 %v4542_v23 }
 0x3b6   :  { %1380 = vmatpush.msra.mxu2 %v4543_v53  ;;  %1400 = vmatpush.msra.mxu3 %v4544_v52 }
 0x412   :  { %v1084_v16 = vpop.f32.mrf.mxu0  ;;  %v1104_v19 = vpop.f32.mrf.mxu1 }
 0x413   :  { %v1085_v40 = vadd.f32 %v1084_v16, %v4547_v18  ;;  %v1105_v9 = vadd.f32 %v1104_v19, %v324_v35  ;;  %v4549_v16 = vld [vmem:[#allocation39_spill] sm:$0xff] }
 0x415   :  { %v1977_v61 = vmul.f32 -1.442695, %v1085_v40  ;;  %v1978_v32 = vmul.f32 -1.442695, %v1105_v9 }
 0x417   :  { %2049 = vpow2.f32 %v1977_v61  ;;  %v4548_v61 = vld [vmem:[#allocation55_spill] sm:$0xff] }
 0x418   :  { %2051 = vpow2.f32 %v1978_v32  ;;  %v371_v18 = vadd.f32 %v4549_v16, %v4548_v61 }
 0x419   :  { %v1124_v35 = vpop.f32.mrf.mxu2 }
 0x41a   :  { %v1125_v48 = vadd.f32 %v1124_v35, %v371_v18  ;;  %v4571_v18 = vld [vmem:[#allocation62_spill] sm:$0xff] }
 0x41d   :  { %v2050_v31 = vpop.eup %2049 }
 0x41e   :  { %v2052_v10 = vpop.eup %2051  ;;  %v1150_v57 = vadd.f32 1.0, %v2050_v31  ;;  %v1144_v31 = vpop.f32.mrf.mxu3 }
 0x41f   :  { %v1169_v23 = vadd.f32 1.0, %v2052_v10  ;;  %v4550_v10 = vld [vmem:[#allocation43_spill] sm:$0xff] }
 0x420   :  { %2053 = vrcp.f32 %v1150_v57  ;;  %v1162_v0 = vand.u32 2147483648, %v1150_v57  ;;  %v1160_v19 = vand.u32 2147483647, %v1150_v57  ;;  %vm1156_vm7 = vweird.f32 %v1150_v57 }
 0x421   :  { %2055 = vrcp.f32 %v1169_v23  ;;  %v418_v6 = vadd.f32 %v4550_v10, %v4489_v44  ;;  %v1181_v46 = vand.u32 2147483648, %v1169_v23  ;;  %vm1175_vm11 = vweird.f32 %v1169_v23 }
 0x422   :  { %v1163_v32 = vor.u32 1.1754944e-38, %v1162_v0  ;;  %vm1161_vm9 = vcmp.eq.f32.partialorder %v1160_v19, 8.507059e+37  ;;  %v1179_v5 = vand.u32 2147483647, %v1169_v23 }
 0x423   :  { %v1145_v63 = vadd.f32 %v1144_v31, %v418_v6  ;;  %v1182_v16 = vor.u32 1.1754944e-38, %v1181_v46  ;;  %v4565_v46 = vld [vmem:[#allocation5_spill] sm:$0xff] }
 0x424   :  { %vm1180_vm13 = vcmp.eq.f32.partialorder %v1179_v5, 8.507059e+37  ;;  %v4563_v5 = vld [vmem:[#allocation60_spill] sm:$0xff]  ;;  %v4567_v6 = vld [vmem:[#allocation61_spill] sm:$0xff] }
 0x425   :  { %v4574_v31 = vld [vmem:[#allocation17_spill] sm:$0xff] }
 0x426   :  { %v2054_v53 = vpop.eup %2053 }
 0x427   :  { %v2056_v52 = vpop.eup %2055  ;;  %v1152_v4 = vmul.f32 %v2054_v53, %v1150_v57  ;;  %vm1157_vm6 = vweird.f32 %v2054_v53 }
 0x428   :  { %v1171_v1 = vmul.f32 %v2056_v52, %v1169_v23  ;;  %vm1158_vm8 = vmor %vm1156_vm7, %vm1157_vm6  ;;  %vm1176_vm10 = vweird.f32 %v2056_v52  ;;  %v4561_v23 = vld [vmem:[#allocation4_spill] sm:$0xff] }
 0x429   :  { %v1153_v7 = vsub.f32 1.0, %v1152_v4  ;;  %vm1177_vm12 = vmor %vm1175_vm11, %vm1176_vm10 }
 0x42a   :  { %v1172_v14 = vsub.f32 1.0, %v1171_v1 }
 0x42b   :  { %v1154_v12 = vmul.f32 %v2054_v53, %v1153_v7 }
 0x42c   :  { %v1173_v40 = vmul.f32 %v2056_v52, %v1172_v14 }
 0x42d   :  { %v1155_v9 = vadd.f32 %v2054_v53, %v1154_v12 }
 0x42e   :  { %v1174_v7 = vadd.f32 %v2056_v52, %v1173_v40  ;;  %v4569_v40 = vld [vmem:[#allocation7_spill] sm:$0xff] }
 0x42f   :  { %v1159_v4 = vsel %vm1158_vm8, %v2054_v53, %v1155_v9  ;;  %v4572_v9 = vld [vmem:[#allocation16_spill] sm:$0xff] }
 0x430   :  { %v1164_v1 = vsel %vm1161_vm9, %v1163_v32, %v1159_v4  ;;  %v1178_v57 = vsel %vm1177_vm12, %v2056_v52, %v1174_v7  ;;  %v4568_v52 = vld [vmem:[#allocation14_spill] sm:$0xff]  ;;  %v4573_v32 = vld [vmem:[#allocation9_spill] sm:$0xff]  ;;  %v4575_v4 = vld [vmem:[#allocation63_spill] sm:$0xff] }
 0x431   :  { %v1185_v14 = vmul.f32 %v1164_v1, %v1125_v48  ;;  %v1183_v0 = vsel %vm1180_vm13, %v1182_v16, %v1178_v57  ;;  %v4566_v48 = vld [vmem:[#allocation13_spill] sm:$0xff]  ;;  %v4576_v1 = vld [vmem:[#allocation18_spill] sm:$0xff]  ;;  %v4577_v7 = vld [vmem:[#allocation28_spill] sm:$0xff] }
 0x432   :  { %v1188_v61 = vsub.f32 1.0, %v1183_v0  ;;  %v1190_v53 = vmul.f32 %v1183_v0, %v3736_v50  ;;  %v4580_v57 = vld [vmem:[#allocation35_spill] sm:$0xff] }
 0x433   :  { %v1186_v12 = vadd.f32 %v1185_v14, %v1145_v63  ;;  %v4564_v63 = vld [vmem:[#allocation12_spill] sm:$0xff]  ;;  %v4578_v14 = vld [vmem:[#allocation22_spill] sm:$0xff] }
 0x435   :  { %2057 = vtanh.f32 %v1186_v12  ;;  %v4579_v12 = vld [vmem:[#allocation48_spill] sm:$0xff] }
 0x436   :  { %v327_v16 = vadd.f32 %v4580_v57, %v4579_v12 }
 0x43b   :  { %v2058_v10 = vpop.eup %2057 }
 0x43c   :  { %v1189_v35 = vmul.f32 %v2058_v10, %v1188_v61  ;;  %v4570_v61 = vld [vmem:[#allocation15_spill] sm:$0xff] }
 0x43e   :  { %v3814_v19 = vadd.f32 %v1190_v53, %v1189_v35  ;;  %v4581_v35 = vld [vmem:[#allocation26_spill] sm:$0xff] }
 0x440   :  { %4551 = vst [vmem:[#allocation57_spill] sm:$0xff] %v3814_v19  ;;  %1212 = vmatmul.f32.vlgmr.msrb.gmra.mxu0 %v3814_v19  ;;  %1232 = vmatmul.f32.vlgmr.msrb.gmra.mxu1 %v3814_v19 }
 0x441   :  { %1252 = vmatmul.f32.vlgmr.msrb.gmra.mxu2 %v3814_v19  ;;  %1272 = vmatmul.f32.vlgmr.msrb.gmra.mxu3 %v3814_v19 }
 0x442   :  { %1454 = vmatpush.msrb.mxu0 %v3188_v28  ;;  %1474 = vmatpush.msrb.mxu1 %v3350_v8  ;;  %v4552_v28 = vld [vmem:[#allocation20_spill] sm:$0xff] }
 0x443   :  { %1494 = vmatpush.msrb.mxu2 %v3356_v11  ;;  %1514 = vmatpush.msrb.mxu3 %v3460_v45 }
 0x444   :  { %1455 = vmatpush.msrb.mxu0 %v3197_v54  ;;  %1475 = vmatpush.msrb.mxu1 %v3364_v20  ;;  %v4553_v54 = vld [vmem:[#allocation31_spill] sm:$0xff] }
 0x445   :  { %1495 = vmatpush.msrb.mxu2 %v3468_v15  ;;  %1515 = vmatpush.msrb.mxu3 %v3474_v38 }
 0x446   :  { %1456 = vmatpush.msrb.mxu0 %v3206_v17  ;;  %1476 = vmatpush.msrb.mxu1 %v3373_v21  ;;  %v4554_v17 = vld [vmem:[#allocation34_spill] sm:$0xff] }
 0x447   :  { %1496 = vmatpush.msrb.mxu2 %v3482_v25  ;;  %1516 = vmatpush.msrb.mxu3 %v3488_v56 }
 0x448   :  { %1457 = vmatpush.msrb.mxu0 %v3215_v26  ;;  %1477 = vmatpush.msrb.mxu1 %v3382_v33  ;;  %v4555_v26 = vld [vmem:[#allocation58_spill] sm:$0xff] }
 0x449   :  { %1497 = vmatpush.msrb.mxu2 %v3496_v43  ;;  %1517 = vmatpush.msrb.mxu3 %v3502_v49 }
 0x44a   :  { %1458 = vmatpush.msrb.mxu0 %v3224_v30  ;;  %1478 = vmatpush.msrb.mxu1 %v3391_v51  ;;  %v4556_v30 = vld [vmem:[#allocation6_spill] sm:$0xff] }
 0x44b   :  { %1498 = vmatpush.msrb.mxu2 %v3510_v27  ;;  %1518 = vmatpush.msrb.mxu3 %v3516_v22 }
 0x44c   :  { %1459 = vmatpush.msrb.mxu0 %v3233_v39  ;;  %1479 = vmatpush.msrb.mxu1 %v3523_v24  ;;  %v4557_v39 = vld [vmem:[#allocation3_spill] sm:$0xff] }
 0x44d   :  { %1499 = vmatpush.msrb.mxu2 %v3529_v13  ;;  %1519 = vmatpush.msrb.mxu3 %v3535_v47 }
 0x44e   :  { %1460 = vmatpush.msrb.mxu0 %v3242_v41  ;;  %1480 = vmatpush.msrb.mxu1 %v3542_v58  ;;  %v4558_v41 = vld [vmem:[#allocation8_spill] sm:$0xff] }
 0x44f   :  { %1500 = vmatpush.msrb.mxu2 %v3548_v59  ;;  %1520 = vmatpush.msrb.mxu3 %v3554_v55 }
 0x450   :  { %1461 = vmatpush.msrb.mxu0 %v3251_v34  ;;  %1481 = vmatpush.msrb.mxu1 %v3561_v36  ;;  %v4559_v34 = vld [vmem:[#allocation59_spill] sm:$0xff] }
 0x451   :  { %1501 = vmatpush.msrb.mxu2 %v3567_v37  ;;  %1521 = vmatpush.msrb.mxu3 %v3573_v60 }
 0x452   :  { %1462 = vmatpush.msrb.mxu0 %v3260_v29  ;;  %1482 = vmatpush.msrb.mxu1 %v3580_v62  ;;  %v4560_v29 = vld [vmem:[#allocation10_spill] sm:$0xff] }
 0x453   :  { %1502 = vmatpush.msrb.mxu2 %v3586_v42  ;;  %1522 = vmatpush.msrb.mxu3 %v3592_v2 }
 0x454   :  { %1463 = vmatpush.msrb.mxu0 %v3269_v3  ;;  %1483 = vmatpush.msrb.mxu1 %v4552_v28  ;;  %v4562_v3 = vld [vmem:[#allocation11_spill] sm:$0xff] }
 0x455   :  { %1503 = vmatpush.msrb.mxu2 %v4553_v54  ;;  %1523 = vmatpush.msrb.mxu3 %v4554_v17 }
 0x456   :  { %1464 = vmatpush.msrb.mxu0 %v4555_v26  ;;  %1484 = vmatpush.msrb.mxu1 %v4556_v30 }
 0x457   :  { %1504 = vmatpush.msrb.mxu2 %v4557_v39  ;;  %1524 = vmatpush.msrb.mxu3 %v4558_v41 }
 0x458   :  { %1465 = vmatpush.msrb.mxu0 %v4559_v34  ;;  %1485 = vmatpush.msrb.mxu1 %v4560_v29 }
 0x459   :  { %1505 = vmatpush.msrb.mxu2 %v4561_v23  ;;  %1525 = vmatpush.msrb.mxu3 %v4562_v3 }
 0x45a   :  { %1466 = vmatpush.msrb.mxu0 %v4563_v5  ;;  %1486 = vmatpush.msrb.mxu1 %v4564_v63 }
 0x45b   :  { %1506 = vmatpush.msrb.mxu2 %v4565_v46  ;;  %1526 = vmatpush.msrb.mxu3 %v4566_v48 }
 0x45c   :  { %1467 = vmatpush.msrb.mxu0 %v4567_v6  ;;  %1487 = vmatpush.msrb.mxu1 %v4568_v52 }
 0x45d   :  { %1507 = vmatpush.msrb.mxu2 %v4569_v40  ;;  %1527 = vmatpush.msrb.mxu3 %v4570_v61 }
 0x45e   :  { %1468 = vmatpush.msrb.mxu0 %v4571_v18  ;;  %1488 = vmatpush.msrb.mxu1 %v4572_v9 }
 0x45f   :  { %1508 = vmatpush.msrb.mxu2 %v4573_v32  ;;  %1528 = vmatpush.msrb.mxu3 %v4574_v31 }
 0x460   :  { %1469 = vmatpush.msrb.mxu0 %v4575_v4  ;;  %1489 = vmatpush.msrb.mxu1 %v4576_v1 }
 0x461   :  { %1509 = vmatpush.msrb.mxu2 %v4577_v7  ;;  %1529 = vmatpush.msrb.mxu3 %v4578_v14 }
 0x4bd   :  { %v1213_v0 = vpop.f32.mrf.mxu0  ;;  %v1233_v10 = vpop.f32.mrf.mxu1 }
 0x4be   :  { %v1214_v53 = vadd.f32 %v1213_v0, %v4581_v35  ;;  %v1234_v26 = vadd.f32 %v1233_v10, %v327_v16  ;;  %v4582_v35 = vld [vmem:[#allocation55_spill] sm:$0xff] }
 0x4c0   :  { %v1979_v34 = vmul.f32 -1.442695, %v1214_v53  ;;  %v1980_v5 = vmul.f32 -1.442695, %v1234_v26  ;;  %v4583_v53 = vld [vmem:[#allocation42_spill] sm:$0xff] }
 0x4c1   :  { %v374_v26 = vadd.f32 %v4583_v53, %v4582_v35 }
 0x4c2   :  { %2059 = vpow2.f32 %v1979_v34 }
 0x4c3   :  { %2061 = vpow2.f32 %v1980_v5 }
 0x4c4   :  { %v1253_v10 = vpop.f32.mrf.mxu2 }
 0x4c5   :  { %v1254_v40 = vadd.f32 %v1253_v10, %v374_v26  ;;  %v4018_v26 = vld [vmem:[%s4273_s5 + $0x40] sm:$0xff] }
 0x4c6   :  { %4589 = vst [vmem:[#allocation21_spill] sm:$0xff] %v4018_v26 }
 0x4c8   :  { %v2060_v6 = vpop.eup %2059 }
 0x4c9   :  { %v2062_v18 = vpop.eup %2061  ;;  %v1279_v4 = vadd.f32 1.0, %v2060_v6  ;;  %v1273_v6 = vpop.f32.mrf.mxu3 }
 0x4ca   :  { %v1298_v50 = vadd.f32 1.0, %v2062_v18  ;;  %v4584_v18 = vld [vmem:[#allocation46_spill] sm:$0xff] }
 0x4cb   :  { %2063 = vrcp.f32 %v1279_v4  ;;  %v1291_v32 = vand.u32 2147483648, %v1279_v4  ;;  %v1289_v16 = vand.u32 2147483647, %v1279_v4  ;;  %vm1285_vm15 = vweird.f32 %v1279_v4 }
 0x4cc   :  { %2065 = vrcp.f32 %v1298_v50  ;;  %v421_v61 = vadd.f32 %v4584_v18, %v4489_v44  ;;  %v1310_v52 = vand.u32 2147483648, %v1298_v50  ;;  %vm1304_vm2 = vweird.f32 %v1298_v50 }
 0x4cd   :  { %v1292_v5 = vor.u32 1.1754944e-38, %v1291_v32  ;;  %vm1290_vm4 = vcmp.eq.f32.partialorder %v1289_v16, 8.507059e+37  ;;  %v1308_v46 = vand.u32 2147483647, %v1298_v50 }
 0x4ce   :  { %v1274_v48 = vadd.f32 %v1273_v6, %v421_v61  ;;  %v1311_v53 = vor.u32 1.1754944e-38, %v1310_v52  ;;  %v3982_v52 = vld [vmem:[%s4273_s5 + $0xc0] sm:$0xff] }
 0x4cf   :  { %vm1309_vm5 = vcmp.eq.f32.partialorder %v1308_v46, 8.507059e+37  ;;  %v3910_v46 = vld [vmem:[%s4273_s5 + $0x1c0] sm:$0xff] }
 0x4d0   :  { %v4000_v61 = vld [vmem:[%s4273_s5 + $0x80] sm:$0xff] }
 0x4d1   :  { %v2064_v7 = vpop.eup %2063  ;;  %4585 = vst [vmem:[#allocation37_spill] sm:$0xff] %v4000_v61  ;;  %v4592_v6 = vld [vmem:[#allocation15_spill] sm:$0xff] }
 0x4d2   :  { %v2066_v14 = vpop.eup %2065  ;;  %v1281_v1 = vmul.f32 %v2064_v7, %v1279_v4  ;;  %vm1286_vm14 = vweird.f32 %v2064_v7 }
 0x4d3   :  { %v1300_v31 = vmul.f32 %v2066_v14, %v1298_v50  ;;  %vm1287_vm0 = vmor %vm1285_vm15, %vm1286_vm14  ;;  %vm1305_vm1 = vweird.f32 %v2066_v14  ;;  %v3901_v50 = vld [vmem:[%s4273_s5 + $0x1e0] sm:$0xff] }
 0x4d4   :  { %v1282_v57 = vsub.f32 1.0, %v1281_v1  ;;  %vm1306_vm3 = vmor %vm1304_vm2, %vm1305_vm1 }
 0x4d5   :  { %v1301_v12 = vsub.f32 1.0, %v1300_v31 }
 0x4d6   :  { %v1283_v9 = vmul.f32 %v2064_v7, %v1282_v57 }
 0x4d7   :  { %v1302_v0 = vmul.f32 %v2066_v14, %v1301_v12 }
 0x4d8   :  { %v1284_v34 = vadd.f32 %v2064_v7, %v1283_v9 }
 0x4d9   :  { %v1303_v57 = vadd.f32 %v2066_v14, %v1302_v0  ;;  %v4587_v0 = vld [vmem:[#allocation5_spill] sm:$0xff] }
 0x4da   :  { %v1288_v1 = vsel %vm1287_vm0, %v2064_v7, %v1284_v34  ;;  %v4590_v34 = vld [vmem:[#allocation14_spill] sm:$0xff] }
 0x4db   :  { %v1293_v31 = vsel %vm1290_vm4, %v1292_v5, %v1288_v1  ;;  %v1307_v4 = vsel %vm1306_vm3, %v2066_v14, %v1303_v57  ;;  %v4009_v14 = vld [vmem:[%s4273_s5 + $0x60] sm:$0xff]  ;;  %v4595_v57 = vld [vmem:[#allocation9_spill] sm:$0xff] }
 0x4dc   :  { %v1314_v12 = vmul.f32 %v1293_v31, %v1254_v40  ;;  %v1312_v32 = vsel %vm1309_vm5, %v1311_v53, %v1307_v4  ;;  %v3991_v40 = vld [vmem:[%s4273_s5 + $0xa0] sm:$0xff]  ;;  %4586 = vst [vmem:[#allocation30_spill] sm:$0xff] %v4009_v14  ;;  %v4594_v31 = vld [vmem:[#allocation16_spill] sm:$0xff]  ;;  %v4598_v4 = vld [vmem:[#allocation18_spill] sm:$0xff] }
 0x4dd   :  { %v1317_v35 = vsub.f32 1.0, %v1312_v32  ;;  %v1319_v7 = vmul.f32 %v1312_v32, %v3814_v19  ;;  %v4591_v5 = vld [vmem:[#allocation7_spill] sm:$0xff]  ;;  %v4599_v53 = vld [vmem:[#allocation28_spill] sm:$0xff]  ;;  %v4600_v32 = vld [vmem:[#allocation22_spill] sm:$0xff] }
 0x4de   :  { %v1315_v9 = vadd.f32 %v1314_v12, %v1274_v48  ;;  %v3973_v48 = vld [vmem:[%s4273_s5 + $0xe0] sm:$0xff]  ;;  %v4596_v12 = vld [vmem:[#allocation17_spill] sm:$0xff] }
 0x4df   :  { %v4027_v1 = vld [vmem:[%s4273_s5 + $0x20] sm:$0xff] }
 0x4e0   :  { %2067 = vtanh.f32 %v1315_v9  ;;  %4593 = vst [vmem:[#allocation36_spill] sm:$0xff] %v4027_v1  ;;  %v4036_v9 = vld [vmem:[%s4273_s5] sm:$0xff] }
 0x4e1   :  { %4597 = vst [vmem:[#allocation40_spill] sm:$0xff] %v4036_v9 }
 0x4e6   :  { %v2068_v18 = vpop.eup %2067 }
 0x4e7   :  { %v1318_v10 = vmul.f32 %v2068_v18, %v1317_v35  ;;  %v4588_v35 = vld [vmem:[#allocation13_spill] sm:$0xff]  ;;  %v4601_v18 = vld [vmem:[#allocation48_spill] sm:$0xff] }
 0x4e9   :  { %v3892_v16 = vadd.f32 %v1319_v7, %v1318_v10  ;;  %v4602_v10 = vld [vmem:[#allocation38_spill] sm:$0xff] }
 0x4ea   :  { %v330_v7 = vadd.f32 %v4602_v10, %v4601_v18 }
 0x4eb   :  { %1341 = vmatmul.f32.vlgmr.msra.gmra.mxu0 %v3892_v16  ;;  %1361 = vmatmul.f32.vlgmr.msra.gmra.mxu1 %v3892_v16 }
 0x4ec   :  { %1381 = vmatmul.f32.vlgmr.msra.gmra.mxu2 %v3892_v16  ;;  %1401 = vmatmul.f32.vlgmr.msra.gmra.mxu3 %v3892_v16 }
 0x4ed   :  { %1584 = vmatpush.msra.mxu0 %v3901_v50  ;;  %1604 = vmatpush.msra.mxu1 %v3350_v8  ;;  %v3919_v8 = vld [vmem:[%s4273_s5 + $0x1a0] sm:$0xff] }
 0x4ee   :  { %1624 = vmatpush.msra.mxu2 %v3356_v11  ;;  %1644 = vmatpush.msra.mxu3 %v3460_v45  ;;  %v3928_v11 = vld [vmem:[%s4273_s5 + $0x180] sm:$0xff] }
 0x4ef   :  { %1585 = vmatpush.msra.mxu0 %v3910_v46  ;;  %1605 = vmatpush.msra.mxu1 %v3364_v20  ;;  %v3937_v20 = vld [vmem:[%s4273_s5 + $0x160] sm:$0xff] }
 0x4f0   :  { %1625 = vmatpush.msra.mxu2 %v3468_v15  ;;  %1645 = vmatpush.msra.mxu3 %v3474_v38 }
 0x4f1   :  { %1586 = vmatpush.msra.mxu0 %v3919_v8  ;;  %1606 = vmatpush.msra.mxu1 %v3373_v21  ;;  %v3946_v21 = vld [vmem:[%s4273_s5 + $0x140] sm:$0xff] }
 0x4f2   :  { %1626 = vmatpush.msra.mxu2 %v3482_v25  ;;  %1646 = vmatpush.msra.mxu3 %v3488_v56 }
 0x4f3   :  { %1587 = vmatpush.msra.mxu0 %v3928_v11  ;;  %1607 = vmatpush.msra.mxu1 %v3382_v33  ;;  %v3955_v33 = vld [vmem:[%s4273_s5 + $0x120] sm:$0xff] }
 0x4f4   :  { %1627 = vmatpush.msra.mxu2 %v3496_v43  ;;  %1647 = vmatpush.msra.mxu3 %v3502_v49 }
 0x4f5   :  { %1588 = vmatpush.msra.mxu0 %v3937_v20  ;;  %1608 = vmatpush.msra.mxu1 %v3391_v51  ;;  %v3964_v51 = vld [vmem:[%s4273_s5 + $0x100] sm:$0xff] }
 0x4f6   :  { %1628 = vmatpush.msra.mxu2 %v3510_v27  ;;  %1648 = vmatpush.msra.mxu3 %v3516_v22 }
 0x4f7   :  { %1589 = vmatpush.msra.mxu0 %v3946_v21  ;;  %1609 = vmatpush.msra.mxu1 %v3523_v24 }
 0x4f8   :  { %1629 = vmatpush.msra.mxu2 %v3529_v13  ;;  %1649 = vmatpush.msra.mxu3 %v3535_v47 }
 0x4f9   :  { %1590 = vmatpush.msra.mxu0 %v3955_v33  ;;  %1610 = vmatpush.msra.mxu1 %v3542_v58 }
 0x4fa   :  { %1630 = vmatpush.msra.mxu2 %v3548_v59  ;;  %1650 = vmatpush.msra.mxu3 %v3554_v55 }
 0x4fb   :  { %1591 = vmatpush.msra.mxu0 %v3964_v51  ;;  %1611 = vmatpush.msra.mxu1 %v3561_v36 }
 0x4fc   :  { %1631 = vmatpush.msra.mxu2 %v3567_v37  ;;  %1651 = vmatpush.msra.mxu3 %v3573_v60 }
 0x4fd   :  { %1592 = vmatpush.msra.mxu0 %v3973_v48  ;;  %1612 = vmatpush.msra.mxu1 %v3580_v62 }
 0x4fe   :  { %1632 = vmatpush.msra.mxu2 %v3586_v42  ;;  %1652 = vmatpush.msra.mxu3 %v3592_v2 }
 0x4ff   :  { %1593 = vmatpush.msra.mxu0 %v3982_v52  ;;  %1613 = vmatpush.msra.mxu1 %v4552_v28 }
 0x500   :  { %1633 = vmatpush.msra.mxu2 %v4553_v54  ;;  %1653 = vmatpush.msra.mxu3 %v4554_v17 }
 0x501   :  { %1594 = vmatpush.msra.mxu0 %v3991_v40  ;;  %1614 = vmatpush.msra.mxu1 %v4556_v30 }
 0x502   :  { %1634 = vmatpush.msra.mxu2 %v4557_v39  ;;  %1654 = vmatpush.msra.mxu3 %v4558_v41 }
 0x503   :  { %1595 = vmatpush.msra.mxu0 %v4000_v61  ;;  %1615 = vmatpush.msra.mxu1 %v4560_v29 }
 0x504   :  { %1635 = vmatpush.msra.mxu2 %v4561_v23  ;;  %1655 = vmatpush.msra.mxu3 %v4562_v3 }
 0x505   :  { %1596 = vmatpush.msra.mxu0 %v4009_v14  ;;  %1616 = vmatpush.msra.mxu1 %v4564_v63 }
 0x506   :  { %1636 = vmatpush.msra.mxu2 %v4587_v0  ;;  %1656 = vmatpush.msra.mxu3 %v4588_v35 }
 0x507   :  { %1597 = vmatpush.msra.mxu0 %v4018_v26  ;;  %1617 = vmatpush.msra.mxu1 %v4590_v34 }
 0x508   :  { %1637 = vmatpush.msra.mxu2 %v4591_v5  ;;  %1657 = vmatpush.msra.mxu3 %v4592_v6 }
 0x509   :  { %1598 = vmatpush.msra.mxu0 %v4027_v1  ;;  %1618 = vmatpush.msra.mxu1 %v4594_v31  ;;  %v4603_v31 = vld [vmem:[#allocation19_spill] sm:$0xff] }
 0x50a   :  { %1638 = vmatpush.msra.mxu2 %v4595_v57  ;;  %1658 = vmatpush.msra.mxu3 %v4596_v12 }
 0x50b   :  { %1599 = vmatpush.msra.mxu0 %v4036_v9  ;;  %1619 = vmatpush.msra.mxu1 %v4598_v4 }
 0x50c   :  { %1639 = vmatpush.msra.mxu2 %v4599_v53  ;;  %1659 = vmatpush.msra.mxu3 %v4600_v32 }
 0x568   :  { %v1342_v19 = vpop.f32.mrf.mxu0  ;;  %v1362_v57 = vpop.f32.mrf.mxu1 }
 0x569   :  { %v1343_v12 = vadd.f32 %v1342_v19, %v4603_v31  ;;  %v1363_v1 = vadd.f32 %v1362_v57, %v330_v7  ;;  %v4606_v7 = vld [vmem:[#allocation50_spill] sm:$0xff] }
 0x56a   :  { %v424_v3 = vadd.f32 %v4606_v7, %v4489_v44 }
 0x56b   :  { %v1981_v6 = vmul.f32 -1.442695, %v1343_v12  ;;  %v1982_v5 = vmul.f32 -1.442695, %v1363_v1 }
 0x56d   :  { %2069 = vpow2.f32 %v1981_v6  ;;  %v4604_v6 = vld [vmem:[#allocation55_spill] sm:$0xff] }
 0x56e   :  { %2071 = vpow2.f32 %v1982_v5  ;;  %v4605_v5 = vld [vmem:[#allocation45_spill] sm:$0xff] }
 0x56f   :  { %v1382_v1 = vpop.f32.mrf.mxu2  ;;  %v377_v57 = vadd.f32 %v4605_v5, %v4604_v6 }
 0x571   :  { %v1383_v23 = vadd.f32 %v1382_v1, %v377_v57 }
 0x573   :  { %v2070_v34 = vpop.eup %2069 }
 0x574   :  { %v2072_v9 = vpop.eup %2071  ;;  %v1408_v26 = vadd.f32 1.0, %v2070_v34 }
 0x575   :  { %v1427_v4 = vadd.f32 1.0, %v2072_v9  ;;  %v1402_v9 = vpop.f32.mrf.mxu3 }
 0x576   :  { %2073 = vrcp.f32 %v1408_v26  ;;  %v1420_v63 = vand.u32 2147483648, %v1408_v26  ;;  %v1418_v19 = vand.u32 2147483647, %v1408_v26  ;;  %vm1414_vm7 = vweird.f32 %v1408_v26 }
 0x577   :  { %2075 = vrcp.f32 %v1427_v4  ;;  %v1439_v29 = vand.u32 2147483648, %v1427_v4  ;;  %v1403_v61 = vadd.f32 %v1402_v9, %v424_v3  ;;  %vm1433_vm11 = vweird.f32 %v1427_v4  ;;  %v2192_v3 = vld [vmem:[%s4273_s5 + $0x1a8] sm:$0xff] }
 0x578   :  { %v1421_v34 = vor.u32 1.1754944e-38, %v1420_v63  ;;  %vm1419_vm9 = vcmp.eq.f32.partialorder %v1418_v19, 8.507059e+37  ;;  %v1437_v41 = vand.u32 2147483647, %v1427_v4 }
 0x579   :  { %v1440_v5 = vor.u32 1.1754944e-38, %v1439_v29  ;;  %v2190_v29 = vld [vmem:[%s4273_s5 + $0x1f0] sm:$0xff] }
 0x57a   :  { %vm1438_vm13 = vcmp.eq.f32.partialorder %v1437_v41, 8.507059e+37  ;;  %v2189_v41 = vld [vmem:[%s4273_s5 + $0x1e8] sm:$0xff] }
 0x57c   :  { %v2074_v53 = vpop.eup %2073 }
 0x57d   :  { %v2076_v32 = vpop.eup %2075  ;;  %v1410_v35 = vmul.f32 %v2074_v53, %v1408_v26  ;;  %vm1415_vm6 = vweird.f32 %v2074_v53 }
 0x57e   :  { %v1429_v0 = vmul.f32 %v2076_v32, %v1427_v4  ;;  %vm1416_vm8 = vmor %vm1414_vm7, %vm1415_vm6  ;;  %vm1434_vm10 = vweird.f32 %v2076_v32 }
 0x57f   :  { %v1411_v10 = vsub.f32 1.0, %v1410_v35  ;;  %vm1435_vm12 = vmor %vm1433_vm11, %vm1434_vm10 }
 0x580   :  { %v1430_v18 = vsub.f32 1.0, %v1429_v0 }
 0x581   :  { %v1412_v14 = vmul.f32 %v2074_v53, %v1411_v10 }
 0x582   :  { %v1431_v31 = vmul.f32 %v2076_v32, %v1430_v18 }
 0x583   :  { %v1413_v12 = vadd.f32 %v2074_v53, %v1412_v14 }
 0x584   :  { %v1432_v10 = vadd.f32 %v2076_v32, %v1431_v31 }
 0x585   :  { %v1417_v35 = vsel %vm1416_vm8, %v2074_v53, %v1413_v12 }
 0x586   :  { %v1422_v0 = vsel %vm1419_vm9, %v1421_v34, %v1417_v35  ;;  %v1436_v26 = vsel %vm1435_vm12, %v2076_v32, %v1432_v10  ;;  %v4631_v10 = vld [vmem:[#allocation55_spill] sm:$0xff] }
 0x587   :  { %v1443_v18 = vmul.f32 %v1422_v0, %v1383_v23  ;;  %v1441_v63 = vsel %vm1438_vm13, %v1440_v5, %v1436_v26  ;;  %v2191_v23 = vld [vmem:[%s4273_s5 + $0x1c8] sm:$0xff] }
 0x588   :  { %v1446_v6 = vsub.f32 1.0, %v1441_v63  ;;  %v1448_v53 = vmul.f32 %v1441_v63, %v3892_v16 }
 0x589   :  { %v1444_v14 = vadd.f32 %v1443_v18, %v1403_v61  ;;  %v4632_v18 = vld [vmem:[#allocation49_spill] sm:$0xff] }
 0x58b   :  { %2077 = vtanh.f32 %v1444_v14  ;;  %v380_v14 = vadd.f32 %v4632_v18, %v4631_v10 }
 0x591   :  { %v2078_v7 = vpop.eup %2077 }
 0x592   :  { %v1447_v1 = vmul.f32 %v2078_v7, %v1446_v6  ;;  %v4633_v7 = vld [vmem:[#allocation52_spill] sm:$0xff] }
 0x594   :  { %v4050_v19 = vadd.f32 %v1448_v53, %v1447_v1  ;;  %v427_v1 = vadd.f32 %v4633_v7, %v4489_v44  ;;  %v4636_v7 = vld [vmem:[#allocation51_spill] sm:$0xff] }
 0x596   :  { %1470 = vmatmul.f32.vlgmr.msrb.gmra.mxu0 %v4050_v19  ;;  %1490 = vmatmul.f32.vlgmr.msrb.gmra.mxu1 %v4050_v19 }
 0x597   :  { %1510 = vmatmul.f32.vlgmr.msrb.gmra.mxu2 %v4050_v19  ;;  %1530 = vmatmul.f32.vlgmr.msrb.gmra.mxu3 %v4050_v19 }
 0x598   :  { %1714 = vmatpush.msrb.mxu0 %v3901_v50  ;;  %1734 = vmatpush.msrb.mxu1 %v2189_v41 }
 0x599   :  { %1754 = vmatpush.msrb.mxu2 %v2190_v29  ;;  %1774 = vmatpush.msrb.mxu3 %v3460_v45  ;;  %v2193_v45 = vld [vmem:[%s4273_s5 + $0x188] sm:$0xff] }
 0x59a   :  { %1715 = vmatpush.msrb.mxu0 %v3910_v46  ;;  %1735 = vmatpush.msrb.mxu1 %v2191_v23 }
 0x59b   :  { %1755 = vmatpush.msrb.mxu2 %v3468_v15  ;;  %1775 = vmatpush.msrb.mxu3 %v3474_v38  ;;  %v2194_v15 = vld [vmem:[%s4273_s5 + $0x168] sm:$0xff] }
 0x59c   :  { %1716 = vmatpush.msrb.mxu0 %v3919_v8  ;;  %1736 = vmatpush.msrb.mxu1 %v2192_v3  ;;  %v4607_v38 = vld [vmem:[#allocation8_spill] sm:$0xff]  ;;  %v4630_v8 = vld [vmem:[#allocation23_spill] sm:$0xff] }
 0x59d   :  { %1756 = vmatpush.msrb.mxu2 %v3482_v25  ;;  %1776 = vmatpush.msrb.mxu3 %v3488_v56  ;;  %v4608_v25 = vld [vmem:[#allocation37_spill] sm:$0xff]  ;;  %v4609_v56 = vld [vmem:[#allocation10_spill] sm:$0xff] }
 0x59e   :  { %1717 = vmatpush.msrb.mxu0 %v3928_v11  ;;  %1737 = vmatpush.msrb.mxu1 %v2193_v45 }
 0x59f   :  { %1757 = vmatpush.msrb.mxu2 %v3496_v43  ;;  %1777 = vmatpush.msrb.mxu3 %v3502_v49  ;;  %v4610_v43 = vld [vmem:[#allocation4_spill] sm:$0xff]  ;;  %v4611_v49 = vld [vmem:[#allocation11_spill] sm:$0xff] }
 0x5a0   :  { %1718 = vmatpush.msrb.mxu0 %v3937_v20  ;;  %1738 = vmatpush.msrb.mxu1 %v2194_v15 }
 0x5a1   :  { %1758 = vmatpush.msrb.mxu2 %v3510_v27  ;;  %1778 = vmatpush.msrb.mxu3 %v3516_v22  ;;  %v4612_v27 = vld [vmem:[#allocation30_spill] sm:$0xff]  ;;  %v4613_v22 = vld [vmem:[#allocation12_spill] sm:$0xff] }
 0x5a2   :  { %1719 = vmatpush.msrb.mxu0 %v3946_v21  ;;  %1739 = vmatpush.msrb.mxu1 %v3523_v24  ;;  %v4614_v24 = vld [vmem:[#allocation5_spill] sm:$0xff] }
 0x5a3   :  { %1759 = vmatpush.msrb.mxu2 %v3529_v13  ;;  %1779 = vmatpush.msrb.mxu3 %v3535_v47  ;;  %v4615_v13 = vld [vmem:[#allocation13_spill] sm:$0xff] }
 0x5a4   :  { %1720 = vmatpush.msrb.mxu0 %v3955_v33  ;;  %1740 = vmatpush.msrb.mxu1 %v3542_v58  ;;  %v4616_v47 = vld [vmem:[#allocation21_spill] sm:$0xff]  ;;  %v4617_v58 = vld [vmem:[#allocation14_spill] sm:$0xff] }
 0x5a5   :  { %1760 = vmatpush.msrb.mxu2 %v3548_v59  ;;  %1780 = vmatpush.msrb.mxu3 %v3554_v55  ;;  %v4618_v59 = vld [vmem:[#allocation7_spill] sm:$0xff] }
 0x5a6   :  { %1721 = vmatpush.msrb.mxu0 %v3964_v51  ;;  %1741 = vmatpush.msrb.mxu1 %v3561_v36  ;;  %v4619_v55 = vld [vmem:[#allocation15_spill] sm:$0xff]  ;;  %v4620_v36 = vld [vmem:[#allocation36_spill] sm:$0xff] }
 0x5a7   :  { %1761 = vmatpush.msrb.mxu2 %v3567_v37  ;;  %1781 = vmatpush.msrb.mxu3 %v3573_v60  ;;  %v4621_v37 = vld [vmem:[#allocation16_spill] sm:$0xff]  ;;  %v4622_v60 = vld [vmem:[#allocation9_spill] sm:$0xff] }
 0x5a8   :  { %1722 = vmatpush.msrb.mxu0 %v3973_v48  ;;  %1742 = vmatpush.msrb.mxu1 %v3580_v62  ;;  %v4623_v62 = vld [vmem:[#allocation17_spill] sm:$0xff] }
 0x5a9   :  { %1762 = vmatpush.msrb.mxu2 %v3586_v42  ;;  %1782 = vmatpush.msrb.mxu3 %v3592_v2  ;;  %v4624_v42 = vld [vmem:[#allocation40_spill] sm:$0xff]  ;;  %v4625_v2 = vld [vmem:[#allocation18_spill] sm:$0xff] }
 0x5aa   :  { %1723 = vmatpush.msrb.mxu0 %v3982_v52  ;;  %1743 = vmatpush.msrb.mxu1 %v4552_v28  ;;  %v4626_v28 = vld [vmem:[#allocation28_spill] sm:$0xff] }
 0x5ab   :  { %1763 = vmatpush.msrb.mxu2 %v4553_v54  ;;  %1783 = vmatpush.msrb.mxu3 %v4554_v17  ;;  %v4627_v54 = vld [vmem:[#allocation22_spill] sm:$0xff]  ;;  %v4628_v17 = vld [vmem:[#allocation48_spill] sm:$0xff] }
 0x5ac   :  { %1724 = vmatpush.msrb.mxu0 %v3991_v40  ;;  %1744 = vmatpush.msrb.mxu1 %v4556_v30  ;;  %v4629_v30 = vld [vmem:[#allocation41_spill] sm:$0xff] }
 0x5ad   :  { %1764 = vmatpush.msrb.mxu2 %v4557_v39  ;;  %1784 = vmatpush.msrb.mxu3 %v4607_v38  ;;  %v333_v39 = vadd.f32 %v4629_v30, %v4628_v17 }
 0x5ae   :  { %1725 = vmatpush.msrb.mxu0 %v4608_v25  ;;  %1745 = vmatpush.msrb.mxu1 %v4609_v56 }
 0x5af   :  { %1765 = vmatpush.msrb.mxu2 %v4610_v43  ;;  %1785 = vmatpush.msrb.mxu3 %v4611_v49 }
 0x5b0   :  { %1726 = vmatpush.msrb.mxu0 %v4612_v27  ;;  %1746 = vmatpush.msrb.mxu1 %v4613_v22 }
 0x5b1   :  { %1766 = vmatpush.msrb.mxu2 %v4614_v24  ;;  %1786 = vmatpush.msrb.mxu3 %v4615_v13 }
 0x5b2   :  { %1727 = vmatpush.msrb.mxu0 %v4616_v47  ;;  %1747 = vmatpush.msrb.mxu1 %v4617_v58  ;;  %v1855_v58 = vld [vmem:[%s4278_s6 + $0x78] sm:$0xff] }
 0x5b3   :  { %1767 = vmatpush.msrb.mxu2 %v4618_v59  ;;  %1787 = vmatpush.msrb.mxu3 %v4619_v55  ;;  %v1854_v59 = vld [vmem:[%s4278_s6 + $0x70] sm:$0xff]  ;;  %v1853_v55 = vld [vmem:[%s4278_s6 + $0x68] sm:$0xff] }
 0x5b4   :  { %1728 = vmatpush.msrb.mxu0 %v4620_v36  ;;  %1748 = vmatpush.msrb.mxu1 %v4621_v37  ;;  %v1852_v36 = vld [vmem:[%s4278_s6 + $0x60] sm:$0xff]  ;;  %v4634_v37 = vld [vmem:[#allocation44_spill] sm:$0xff] }
 0x5b5   :  { %1768 = vmatpush.msrb.mxu2 %v4622_v60  ;;  %1788 = vmatpush.msrb.mxu3 %v4623_v62  ;;  %v336_v60 = vadd.f32 %v4634_v37, %v4628_v17  ;;  %v1851_v62 = vld [vmem:[%s4278_s6 + $0x58] sm:$0xff] }
 0x5b6   :  { %1729 = vmatpush.msrb.mxu0 %v4624_v42  ;;  %1749 = vmatpush.msrb.mxu1 %v4625_v2 }
 0x5b7   :  { %1769 = vmatpush.msrb.mxu2 %v4626_v28  ;;  %1789 = vmatpush.msrb.mxu3 %v4627_v54  ;;  %v4635_v28 = vld [vmem:[#allocation27_spill] sm:$0xff] }
 0x613   :  { %v1471_v50 = vpop.f32.mrf.mxu0  ;;  %v1491_v46 = vpop.f32.mrf.mxu1 }
 0x614   :  { %v1472_v11 = vadd.f32 %v1471_v50, %v4630_v8  ;;  %v1492_v20 = vadd.f32 %v1491_v46, %v333_v39  ;;  %v1850_v39 = vld [vmem:[%s4278_s6 + $0x50] sm:$0xff]  ;;  %v1849_v8 = vld [vmem:[%s4278_s6 + $0x48] sm:$0xff] }
 0x616   :  { %v1983_v21 = vmul.f32 -1.442695, %v1472_v11  ;;  %v1984_v33 = vmul.f32 -1.442695, %v1492_v20  ;;  %v1848_v11 = vld [vmem:[%s4278_s6 + $0x40] sm:$0xff]  ;;  %v1847_v20 = vld [vmem:[%s4278_s6 + $0x38] sm:$0xff] }
 0x618   :  { %2079 = vpow2.f32 %v1983_v21  ;;  %v1846_v21 = vld [vmem:[%s4278_s6 + $0x30] sm:$0xff] }
 0x619   :  { %2081 = vpow2.f32 %v1984_v33 }
 0x61a   :  { %v1511_v0 = vpop.f32.mrf.mxu2  ;;  %v1531_v63 = vpop.f32.mrf.mxu3 }
 0x61b   :  { %v1512_v53 = vadd.f32 %v1511_v0, %v380_v14  ;;  %v1532_v15 = vadd.f32 %v1531_v63, %v427_v1  ;;  %v383_v1 = vadd.f32 %v4636_v7, %v4631_v10 }
 0x61e   :  { %v2080_v51 = vpop.eup %2079 }
 0x61f   :  { %v2082_v48 = vpop.eup %2081  ;;  %v1537_v52 = vadd.f32 1.0, %v2080_v51  ;;  %v1845_v51 = vld [vmem:[%s4278_s6 + $0x28] sm:$0xff] }
 0x620   :  { %v1556_v40 = vadd.f32 1.0, %v2082_v48 }
 0x621   :  { %2083 = vrcp.f32 %v1537_v52  ;;  %v1549_v12 = vand.u32 2147483648, %v1537_v52  ;;  %v1547_v9 = vand.u32 2147483647, %v1537_v52  ;;  %vm1543_vm15 = vweird.f32 %v1537_v52 }
 0x622   :  { %2085 = vrcp.f32 %v1556_v40  ;;  %v1568_v3 = vand.u32 2147483648, %v1556_v40  ;;  %vm1562_vm2 = vweird.f32 %v1556_v40  ;;  %v1566_v38 = vand.u32 2147483647, %v1556_v40 }
 0x623   :  { %v1550_v5 = vor.u32 1.1754944e-38, %v1549_v12  ;;  %vm1548_vm4 = vcmp.eq.f32.partialorder %v1547_v9, 8.507059e+37 }
 0x624   :  { %v1569_v43 = vor.u32 1.1754944e-38, %v1568_v3  ;;  %vm1567_vm5 = vcmp.eq.f32.partialorder %v1566_v38, 8.507059e+37 }
 0x627   :  { %v2084_v61 = vpop.eup %2083 }
 0x628   :  { %v2086_v4 = vpop.eup %2085  ;;  %v1539_v32 = vmul.f32 %v2084_v61, %v1537_v52  ;;  %vm1544_vm14 = vweird.f32 %v2084_v61 }
 0x629   :  { %v1558_v31 = vmul.f32 %v2086_v4, %v1556_v40  ;;  %vm1545_vm0 = vmor %vm1543_vm15, %vm1544_vm14  ;;  %vm1563_vm1 = vweird.f32 %v2086_v4 }
 0x62a   :  { %v1540_v6 = vsub.f32 1.0, %v1539_v32  ;;  %vm1564_vm3 = vmor %vm1562_vm2, %vm1563_vm1  ;;  %v1842_v32 = vld [vmem:[%s4278_s6 + $0x10] sm:$0xff] }
 0x62b   :  { %v1559_v57 = vsub.f32 1.0, %v1558_v31  ;;  %v1841_v31 = vld [vmem:[%s4278_s6 + $0x8] sm:$0xff] }
 0x62c   :  { %v1541_v34 = vmul.f32 %v2084_v61, %v1540_v6  ;;  %v1840_v6 = vld [vmem:[%s4278_s6] sm:$0xff] }
 0x62d   :  { %v1560_v35 = vmul.f32 %v2086_v4, %v1559_v57 }
 0x62e   :  { %v1542_v26 = vadd.f32 %v2084_v61, %v1541_v34 }
 0x62f   :  { %v1561_v23 = vadd.f32 %v2086_v4, %v1560_v35 }
 0x630   :  { %v1546_v41 = vsel %vm1545_vm0, %v2084_v61, %v1542_v26  ;;  %v1844_v61 = vld [vmem:[%s4278_s6 + $0x20] sm:$0xff] }
 0x631   :  { %v1551_v29 = vsel %vm1548_vm4, %v1550_v5, %v1546_v41  ;;  %v1565_v56 = vsel %vm1564_vm3, %v2086_v4, %v1561_v23  ;;  %v1843_v4 = vld [vmem:[%s4278_s6 + $0x18] sm:$0xff] }
 0x632   :  { %v1572_v45 = vmul.f32 %v1551_v29, %v1512_v53  ;;  %v1570_v49 = vsel %vm1567_vm5, %v1569_v43, %v1565_v56  ;;  %v4637_v23 = vld [vmem:[#allocation54_spill] sm:$0xff] }
 0x633   :  { %v1575_v27 = vsub.f32 1.0, %v1570_v49  ;;  %v1577_v13 = vmul.f32 %v1570_v49, %v4050_v19  ;;  %v430_v3 = vadd.f32 %v4637_v23, %v4489_v44 }
 0x634   :  { %v1573_v25 = vadd.f32 %v1572_v45, %v1532_v15 }
 0x636   :  { %2087 = vtanh.f32 %v1573_v25 }
 0x63c   :  { %v2088_v22 = vpop.eup %2087 }
 0x63d   :  { %v1576_v24 = vmul.f32 %v2088_v22, %v1575_v27 }
 0x63f   :  { %v4140_v47 = vadd.f32 %v1577_v13, %v1576_v24 }
 0x641   :  { %1579 = vst [vmem:[%s4277_s9] sm:$0xff] %v4140_v47  ;;  %1600 = vmatmul.f32.vlgmr.msra.gmra.mxu0 %v4140_v47  ;;  %1620 = vmatmul.f32.vlgmr.msra.gmra.mxu1 %v4140_v47 }
 0x642   :  { %1640 = vmatmul.f32.vlgmr.msra.gmra.mxu2 %v4140_v47  ;;  %1660 = vmatmul.f32.vlgmr.msra.gmra.mxu3 %v4140_v47 }
 0x643   :  { %1860 = vmatpush.msra.mxu0 %v1855_v58 }
 0x645   :  { %1861 = vmatpush.msra.mxu0 %v1854_v59 }
 0x647   :  { %1862 = vmatpush.msra.mxu0 %v1853_v55 }
 0x649   :  { %1863 = vmatpush.msra.mxu0 %v1852_v36 }
 0x64b   :  { %1864 = vmatpush.msra.mxu0 %v1851_v62  ;;  %v4638_v62 = vld [vmem:[#allocation25_spill] sm:$0xff] }
 0x64d   :  { %1865 = vmatpush.msra.mxu0 %v1850_v39 }
 0x64f   :  { %1866 = vmatpush.msra.mxu0 %v1849_v8 }
 0x651   :  { %1867 = vmatpush.msra.mxu0 %v1848_v11 }
 0x653   :  { %1868 = vmatpush.msra.mxu0 %v1847_v20 }
 0x655   :  { %1869 = vmatpush.msra.mxu0 %v1846_v21 }
 0x657   :  { %1870 = vmatpush.msra.mxu0 %v1845_v51 }
 0x659   :  { %1871 = vmatpush.msra.mxu0 %v1844_v61 }
 0x65b   :  { %1872 = vmatpush.msra.mxu0 %v1843_v4 }
 0x65d   :  { %1873 = vmatpush.msra.mxu0 %v1842_v32 }
 0x65f   :  { %1874 = vmatpush.msra.mxu0 %v1841_v31 }
 0x661   :  { %1875 = vmatpush.msra.mxu0 %v1840_v6 }
 0x6be   :  { %v1601_v42 = vpop.f32.mrf.mxu0  ;;  %v1621_v2 = vpop.f32.mrf.mxu1 }
 0x6bf   :  { %v1602_v54 = vadd.f32 %v1601_v42, %v4635_v28  ;;  %v1622_v30 = vadd.f32 %v1621_v2, %v336_v60  ;;  %v4639_v42 = vld [vmem:[#allocation33_spill] sm:$0xff]  ;;  %v4641_v28 = vld [vmem:[#allocation47_spill] sm:$0xff] }
 0x6c0   :  { %v4640_v2 = vld [vmem:[#allocation57_spill] sm:$0xff] }
 0x6c1   :  { %v1985_v50 = vmul.f32 -1.442695, %v1602_v54  ;;  %v1986_v46 = vmul.f32 -1.442695, %v1622_v30  ;;  %v339_v54 = vadd.f32 %v4641_v28, %v4628_v17 }
 0x6c3   :  { %2089 = vpow2.f32 %v1985_v50  ;;  %v4642_v50 = vld [vmem:[#allocation29_spill] sm:$0xff] }
 0x6c4   :  { %2091 = vpow2.f32 %v1986_v46 }
 0x6c5   :  { %v1641_v63 = vpop.f32.mrf.mxu2  ;;  %v1661_v29 = vpop.f32.mrf.mxu3 }
 0x6c6   :  { %v1642_v45 = vadd.f32 %v1641_v63, %v383_v1  ;;  %v1662_v49 = vadd.f32 %v1661_v29, %v430_v3  ;;  %v4644_v1 = vld [vmem:[#allocation56_spill] sm:$0xff] }
 0x6c9   :  { %v2090_v33 = vpop.eup %2089 }
 0x6ca   :  { %v2092_v48 = vpop.eup %2091  ;;  %v1667_v52 = vadd.f32 1.0, %v2090_v33 }
 0x6cb   :  { %v1686_v40 = vadd.f32 1.0, %v2092_v48 }
 0x6cc   :  { %2093 = vrcp.f32 %v1667_v52  ;;  %v1679_v18 = vand.u32 2147483648, %v1667_v52  ;;  %v1677_v26 = vand.u32 2147483647, %v1667_v52  ;;  %vm1673_vm7 = vweird.f32 %v1667_v52 }
 0x6cd   :  { %2095 = vrcp.f32 %v1686_v40  ;;  %v1698_v56 = vand.u32 2147483648, %v1686_v40  ;;  %vm1692_vm11 = vweird.f32 %v1686_v40  ;;  %v1696_v27 = vand.u32 2147483647, %v1686_v40 }
 0x6ce   :  { %v1680_v41 = vor.u32 1.1754944e-38, %v1679_v18  ;;  %vm1678_vm9 = vcmp.eq.f32.partialorder %v1677_v26, 8.507059e+37 }
 0x6cf   :  { %v1699_v13 = vor.u32 1.1754944e-38, %v1698_v56  ;;  %vm1697_vm13 = vcmp.eq.f32.partialorder %v1696_v27, 8.507059e+37 }
 0x6d2   :  { %v2094_v57 = vpop.eup %2093 }
 0x6d3   :  { %v2096_v12 = vpop.eup %2095  ;;  %v1669_v34 = vmul.f32 %v2094_v57, %v1667_v52  ;;  %vm1674_vm6 = vweird.f32 %v2094_v57 }
 0x6d4   :  { %v1688_v9 = vmul.f32 %v2096_v12, %v1686_v40  ;;  %vm1675_vm8 = vmor %vm1673_vm7, %vm1674_vm6  ;;  %vm1693_vm10 = vweird.f32 %v2096_v12 }
 0x6d5   :  { %v1670_v35 = vsub.f32 1.0, %v1669_v34  ;;  %vm1694_vm12 = vmor %vm1692_vm11, %vm1693_vm10 }
 0x6d6   :  { %v1689_v0 = vsub.f32 1.0, %v1688_v9 }
 0x6d7   :  { %v1671_v14 = vmul.f32 %v2094_v57, %v1670_v35 }
 0x6d8   :  { %v1690_v5 = vmul.f32 %v2096_v12, %v1689_v0 }
 0x6d9   :  { %v1672_v53 = vadd.f32 %v2094_v57, %v1671_v14  ;;  %v4643_v14 = vld [vmem:[#allocation53_spill] sm:$0xff] }
 0x6da   :  { %v1691_v25 = vadd.f32 %v2096_v12, %v1690_v5  ;;  %v386_v26 = vadd.f32 %v4643_v14, %v4631_v10 }
 0x6db   :  { %v1676_v15 = vsel %vm1675_vm8, %v2094_v57, %v1672_v53  ;;  %v433_v53 = vadd.f32 %v4644_v1, %v4489_v44 }
 0x6dc   :  { %v1681_v38 = vsel %vm1678_vm9, %v1680_v41, %v1676_v15  ;;  %v1695_v24 = vsel %vm1694_vm12, %v2096_v12, %v1691_v25 }
 0x6dd   :  { %v1702_v43 = vmul.f32 %v1681_v38, %v1642_v45  ;;  %v1700_v58 = vsel %vm1697_vm13, %v1699_v13, %v1695_v24 }
 0x6de   :  { %v1705_v59 = vsub.f32 1.0, %v1700_v58  ;;  %v1707_v37 = vmul.f32 %v1700_v58, %v4140_v47 }
 0x6df   :  { %v1703_v22 = vadd.f32 %v1702_v43, %v1662_v49 }
 0x6e1   :  { %2097 = vtanh.f32 %v1703_v22 }
 0x6e7   :  { %v2098_v55 = vpop.eup %2097 }
 0x6e8   :  { %v1706_v36 = vmul.f32 %v2098_v55, %v1705_v59 }
 0x6ea   :  { %v4206_v60 = vadd.f32 %v1707_v37, %v1706_v36 }
 0x6ec   :  { %1709 = vst [vmem:[%s4279_s10] sm:$0xff] %v4206_v60  ;;  %1730 = vmatmul.f32.vlgmr.msrb.gmra.mxu0 %v4206_v60  ;;  %1750 = vmatmul.f32.vlgmr.msrb.gmra.mxu1 %v4206_v60 }
 0x6ed   :  { %1770 = vmatmul.f32.vlgmr.msrb.gmra.mxu2 %v4206_v60  ;;  %1790 = vmatmul.f32.vlgmr.msrb.gmra.mxu3 %v4206_v60 }
 0x6f4   :  { %1876 = vmatmul.f32.vlgmr.msra.gmra.mxu0 %v4638_v62 }
 0x6fc   :  { %1879 = vmatmul.f32.gmra.mxu0 %v4639_v42 }
 0x704   :  { %1882 = vmatmul.f32.gmra.mxu0 %v4640_v2 }
 0x70c   :  { %1885 = vmatmul.f32.gmra.mxu0 %v3892_v16  ;;  %v4229_v16 = vld [vmem:[%s4280_s7] ss:$0 sm:$0xff] }
 0x714   :  { %1888 = vmatmul.f32.gmra.mxu0 %v4050_v19 }
 0x71c   :  { %1891 = vmatmul.f32.gmra.mxu0 %v4140_v47 }
 0x724   :  { %1894 = vmatmul.f32.gmra.mxu0 %v4206_v60 }
 0x769   :  { %v1731_v30 = vpop.f32.mrf.mxu0  ;;  %v1751_v39 = vpop.f32.mrf.mxu1 }
 0x76a   :  { %v1732_v46 = vadd.f32 %v1731_v30, %v4642_v50  ;;  %v1752_v8 = vadd.f32 %v1751_v39, %v339_v54 }
 0x76c   :  { %v1987_v11 = vmul.f32 -1.442695, %v1732_v46  ;;  %v1988_v20 = vmul.f32 -1.442695, %v1752_v8 }
 0x76e   :  { %2099 = vpow2.f32 %v1987_v11 }
 0x76f   :  { %2101 = vpow2.f32 %v1988_v20 }
 0x770   :  { %v1771_v0 = vpop.f32.mrf.mxu2  ;;  %v1791_v7 = vpop.f32.mrf.mxu3 }
 0x771   :  { %v1877_v19 = vpop.f32.mrf.mxu0  ;;  %v1772_v41 = vadd.f32 %v1771_v0, %v386_v26  ;;  %v1792_v10 = vadd.f32 %v1791_v7, %v433_v53 }
 0x772   :  { %v1878_v47 = vadd.f32 %v4229_v16, %v1877_v19 }
 0x774   :  { %v2100_v21 = vpop.eup %2099  ;;  %1901 = vst [vmem:[%s4281_s8] sm:$0xff] %v1878_v47 }
 0x775   :  { %v2102_v17 = vpop.eup %2101  ;;  %v1797_v33 = vadd.f32 1.0, %v2100_v21 }
 0x776   :  { %v1816_v51 = vadd.f32 1.0, %v2102_v17 }
 0x777   :  { %2103 = vrcp.f32 %v1797_v33  ;;  %v1809_v6 = vand.u32 2147483648, %v1797_v33  ;;  %v1807_v9 = vand.u32 2147483647, %v1797_v33  ;;  %vm1803_vm15 = vweird.f32 %v1797_v33 }
 0x778   :  { %2105 = vrcp.f32 %v1816_v51  ;;  %v1828_v15 = vand.u32 2147483648, %v1816_v51  ;;  %vm1822_vm2 = vweird.f32 %v1816_v51  ;;  %v1826_v25 = vand.u32 2147483647, %v1816_v51 }
 0x779   :  { %v1880_v48 = vpop.f32.mrf.mxu0  ;;  %v1810_v63 = vor.u32 1.1754944e-38, %v1809_v6  ;;  %vm1808_vm4 = vcmp.eq.f32.partialorder %v1807_v9, 8.507059e+37 }
 0x77a   :  { %v1881_v52 = vadd.f32 %v4229_v16, %v1880_v48  ;;  %v1829_v44 = vor.u32 1.1754944e-38, %v1828_v15  ;;  %vm1827_vm5 = vcmp.eq.f32.partialorder %v1826_v25, 8.507059e+37 }
 0x77c   :  { %1902 = vst [vmem:[%s4281_s8 + $0x8] sm:$0xff] %v1881_v52 }
 0x77d   :  { %v2104_v40 = vpop.eup %2103 }
 0x77e   :  { %v2106_v61 = vpop.eup %2105  ;;  %v1799_v4 = vmul.f32 %v2104_v40, %v1797_v33  ;;  %vm1804_vm14 = vweird.f32 %v2104_v40 }
 0x77f   :  { %v1818_v32 = vmul.f32 %v2106_v61, %v1816_v51  ;;  %vm1805_vm0 = vmor %vm1803_vm15, %vm1804_vm14  ;;  %vm1823_vm1 = vweird.f32 %v2106_v61 }
 0x780   :  { %v1800_v31 = vsub.f32 1.0, %v1799_v4  ;;  %vm1824_vm3 = vmor %vm1822_vm2, %vm1823_vm1 }
 0x781   :  { %v1883_v57 = vpop.f32.mrf.mxu0  ;;  %v1819_v12 = vsub.f32 1.0, %v1818_v32 }
 0x782   :  { %v1801_v34 = vmul.f32 %v2104_v40, %v1800_v31  ;;  %v1884_v35 = vadd.f32 %v4229_v16, %v1883_v57 }
 0x783   :  { %v1820_v18 = vmul.f32 %v2106_v61, %v1819_v12 }
 0x784   :  { %v1802_v5 = vadd.f32 %v2104_v40, %v1801_v34  ;;  %1903 = vst [vmem:[%s4281_s8 + $0x10] sm:$0xff] %v1884_v35 }
 0x785   :  { %v1821_v3 = vadd.f32 %v2106_v61, %v1820_v18 }
 0x786   :  { %v1806_v29 = vsel %vm1805_vm0, %v2104_v40, %v1802_v5 }
 0x787   :  { %v1811_v23 = vsel %vm1808_vm4, %v1810_v63, %v1806_v29  ;;  %v1825_v49 = vsel %vm1824_vm3, %v2106_v61, %v1821_v3 }
 0x788   :  { %v1832_v45 = vmul.f32 %v1811_v23, %v1772_v41  ;;  %v1830_v27 = vsel %vm1827_vm5, %v1829_v44, %v1825_v49 }
 0x789   :  { %v1886_v38 = vpop.f32.mrf.mxu0  ;;  %v1835_v24 = vsub.f32 1.0, %v1830_v27  ;;  %v1837_v55 = vmul.f32 %v1830_v27, %v4206_v60 }
 0x78a   :  { %v1833_v56 = vadd.f32 %v1832_v45, %v1792_v10  ;;  %v1887_v43 = vadd.f32 %v4229_v16, %v1886_v38 }
 0x78c   :  { %2107 = vtanh.f32 %v1833_v56  ;;  %1904 = vst [vmem:[%s4281_s8 + $0x18] sm:$0xff] %v1887_v43 }
 0x791   :  { %v1889_v22 = vpop.f32.mrf.mxu0 }
 0x792   :  { %v2108_v13 = vpop.eup %2107  ;;  %v1890_v58 = vadd.f32 %v4229_v16, %v1889_v22 }
 0x793   :  { %v1836_v59 = vmul.f32 %v2108_v13, %v1835_v24 }
 0x794   :  { %1905 = vst [vmem:[%s4281_s8 + $0x20] sm:$0xff] %v1890_v58 }
 0x795   :  { %v1838_v36 = vadd.f32 %v1837_v55, %v1836_v59 }
 0x797   :  { %1839 = vst [vmem:[%s4282_s11] sm:$0xff] %v1838_v36  ;;  %1897 = vmatmul.f32.gmra.mxu0 %v1838_v36 }
 0x799   :  { %v1892_v37 = vpop.f32.mrf.mxu0 }
 0x79a   :  { %v1893_v62 = vadd.f32 %v4229_v16, %v1892_v37 }
 0x79c   :  { %1906 = vst [vmem:[%s4281_s8 + $0x28] sm:$0xff] %v1893_v62 }
 0x7a1   :  { %v1895_v42 = vpop.f32.mrf.mxu0 }
 0x7a2   :  { %v1896_v60 = vadd.f32 %v4229_v16, %v1895_v42 }
 0x7a4   :  { %1907 = vst [vmem:[%s4281_s8 + $0x30] sm:$0xff] %v1896_v60 }
 0x814   :  { %v1898_v2 = vpop.f32.mrf.mxu0 }
 0x815   :  { %v1899_v28 = vadd.f32 %v4229_v16, %v1898_v2 }
 0x817   :  { %1908 = vst [vmem:[%s4281_s8 + $0x38] sm:$0xff] %v1899_v28 }

</bundles_post_ra>
